<compile_context>
chip_gen: v7x
topology: tpu7x:2x2x1
jax: 0.10.0
libtpu: 0.0.40
codegen_flags: <defaults>
</compile_context>

<pallas_src>
import jax
import jax.numpy as jnp
from jax.experimental import pallas as pl
from jax.experimental.pallas import tpu as pltpu


def _round_up(n, m):
    return ((n + m - 1) // m) * m


def _identity_kernel(x_ref, wc_ref, bc_ref,
                     w1_ref, b1_ref,
                     w2_ref, b2_ref,
                     w3_ref, b3_ref,
                     out_ref):
    # ---- conv1: Conv2d(1, 1, (1, E)) on the (B,1,S,E) NCHW view -------------
    # == per-position dot over E + scalar bias.  Done as VPU broadcast-mul +
    # lane reduce: x stays in its native (f32) dtype, no N=1 MXU dot, no
    # (TB*S,1)->(TB,S) relayout.  Compute hides under the x DMA.
    x = x_ref[...]                                     # (tb, S, E)
    h0 = jnp.sum(x * wc_ref[0], axis=-1)               # (tb, S) f32
    h0 = jnp.maximum(h0 + bc_ref[0, 0], 0.0)           # conv bias (SMEM scalar) + ReLU

    # ---- fc1 + ReLU (dropout p=0.0 is identity) ------------------------------
    # MXU: bf16 operands, f32 accumulation, f32 biases.
    h1 = jnp.dot(h0.astype(jnp.bfloat16), w1_ref[...],
                 preferred_element_type=jnp.float32) + b1_ref[...]
    h1 = jnp.maximum(h1, 0.0)

    # ---- fc2 + ReLU ----------------------------------------------------------
    h2 = jnp.dot(h1.astype(jnp.bfloat16), w2_ref[...],
                 preferred_element_type=jnp.float32) + b2_ref[...]
    h2 = jnp.maximum(h2, 0.0)

    # ---- fc3 (no activation) -------------------------------------------------
    out = jnp.dot(h2.astype(jnp.bfloat16), w3_ref[...],
                  preferred_element_type=jnp.float32) + b3_ref[...]
    out_ref[...] = out.astype(out_ref.dtype)


def identity_forward(x, params, *, block_b=None):
    """x: (B, SEQ_LEN, EMB) in its native dtype -> (B, out_dim) float32.

    Batch tile sizing (per buffer, f32 x, E lane-padded to 256):
      tb * S * 256 * 4 bytes; double-buffered it must fit ~60% of vmem_limit.
    tb is also capped so the batch grid has >= 2 steps when B > 8 (v7x megacore).
    """
    wc, bc, w1, b1, w2, b2, w3, b3 = params
    B, S, E = x.shape
    assert wc.shape == (1, E), wc.shape
    hid1 = w1.shape[1]
    h_dim = w2.shape[1]
    out_dim = w3.shape[1]

    # Resident weights as bf16 (VMEM headroom, MXU-native); biases stay f32 (tiny).
    w1b = w1.astype(jnp.bfloat16)
    w2b = w2.astype(jnp.bfloat16)
    w3b = w3.astype(jnp.bfloat16)
    wcf = wc.astype(jnp.float32)                 # conv weight stays f32 (VPU path)
    bcf = bc.reshape(1, 1).astype(jnp.float32)   # scalar conv bias -> SMEM
    b1f = b1.astype(jnp.float32)
    b2f = b2.astype(jnp.float32)
    b3f = b3.astype(jnp.float32)

    # ---- VMEM budget & batch tile -------------------------------------------
    try:
        vmem_cap = int(pltpu.get_tpu_info().vmem_capacity_bytes)
    except Exception:
        vmem_cap = 64 << 20                      # conservative: v7x per-TC VMEM
    vmem_limit = min((vmem_cap * 7) // 8, 100 << 20)

    lane_e = _round_up(E, 128)                   # 200 -> 256 lane padding
    x_row_bytes = S * lane_e * x.dtype.itemsize  # per batch row, as stored in VMEM
    cap_rows = int(vmem_limit * 0.6) // (2 * x_row_bytes)   # double-buffered x
    cap_rows = max(8, (cap_rows // 8) * 8)

    tb = cap_rows if block_b is None else min(block_b, cap_rows)
    if B > 8:
        # At least 2 grid steps so both v7x TensorCores get work.
        tb = min(tb, _round_up(pl.cdiv(B, 2), 8))
    if tb >= B:
        tb = B                                   # single full block (== array dim)
    else:
        tb = max(8, (tb // 8) * 8)               # sublane-aligned partial blocks
    num_blocks = pl.cdiv(B, tb)                  # ragged last block is fine:
    # all ops are batch-row independent; do NOT add cross-row reductions here.

    flops = 2 * B * (S * E + S * hid1 + hid1 * h_dim + h_dim * out_dim)
    bytes_accessed = (
        B * S * E * x.dtype.itemsize
        + w1b.size * 2 + w2b.size * 2 + w3b.size * 2
        + (wcf.size + bcf.size + b1f.size + b2f.size + b3f.size) * 4
        + B * out_dim * 4
    )

    out = pl.pallas_call(
        _identity_kernel,
        out_shape=jax.ShapeDtypeStruct((B, out_dim), jnp.float32),
        grid=(num_blocks,),
        in_specs=[
            pl.BlockSpec((tb, S, E), lambda i: (i, 0, 0)),                 # x tile (pipelined)
            pl.BlockSpec((1, E), lambda i: (0, 0)),                        # conv weight
            pl.BlockSpec(memory_space=pltpu.MemorySpace.SMEM),             # conv bias scalar
            pl.BlockSpec((S, hid1), lambda i: (0, 0)),                     # w1 (VMEM-resident)
            pl.BlockSpec((1, hid1), lambda i: (0, 0)),                     # b1
            pl.BlockSpec((hid1, h_dim), lambda i: (0, 0)),                 # w2
            pl.BlockSpec((1, h_dim), lambda i: (0, 0)),                    # b2
            pl.BlockSpec((h_dim, out_dim), lambda i: (0, 0)),              # w3
            pl.BlockSpec((1, out_dim), lambda i: (0, 0)),                  # b3
        ],
        out_specs=pl.BlockSpec((tb, out_dim), lambda i: (i, 0)),
        compiler_params=pltpu.CompilerParams(
            dimension_semantics=("parallel",),
            vmem_limit_bytes=int(vmem_limit)),
        cost_estimate=pl.CostEstimate(
            flops=int(flops), transcendentals=0,
            bytes_accessed=int(bytes_accessed)),
    )(x, wcf, bcf, w1b, b1f, w2b, b2f, w3b, b3f)

    return out


def init_params(key, seq_len, emb=200, h_dim=100, out_dim=10):
    """Deterministic synthetic parameters matching the PyTorch module's shapes."""
    ks = jax.random.split(key, 8)
    # Conv2d(1, 1, (1, emb)): weight (1,1,1,emb) -> (1, emb); bias (1,) -> (1,1)
    wc = jax.random.normal(ks[0], (1, emb), jnp.float32) / jnp.sqrt(emb)
    bc = jax.random.normal(ks[1], (1, 1), jnp.float32) * 0.01
    # Linear(seq_len, 512) etc., stored transposed as (in, out)
    w1 = jax.random.normal(ks[2], (seq_len, 512), jnp.float32) / jnp.sqrt(seq_len)
    b1 = jax.random.normal(ks[3], (1, 512), jnp.float32) * 0.01
    w2 = jax.random.normal(ks[4], (512, h_dim), jnp.float32) / jnp.sqrt(512.0)
    b2 = jax.random.normal(ks[5], (1, h_dim), jnp.float32) * 0.01
    w3 = jax.random.normal(ks[6], (h_dim, out_dim), jnp.float32) / jnp.sqrt(h_dim)
    b3 = jax.random.normal(ks[7], (1, out_dim), jnp.float32) * 0.01
    return (wc, bc, w1, b1, w2, b2, w3, b3)


def reference_forward(x, params):
    """Pure-JAX reference mirroring the kernel's numerics.

    conv in f32; fc matmuls with bf16 operands and f32 accumulation; f32 biases.
    Dropout p=0.0 is identity.
    """
    wc, bc, w1, b1, w2, b2, w3, b3 = params

    def mm(a, w):
        return jnp.dot(a.astype(jnp.bfloat16), w.astype(jnp.bfloat16),
                       preferred_element_type=jnp.float32)

    h0 = jnp.einsum('bse,e->bs', x.astype(jnp.float32), wc[0].astype(jnp.float32))
    h0 = jnp.maximum(h0 + bc[0, 0], 0.0)
    h1 = jnp.maximum(mm(h0, w1) + b1.astype(jnp.float32), 0.0)
    h2 = jnp.maximum(mm(h1, w2) + b2.astype(jnp.float32), 0.0)
    return mm(h2, w3) + b3.astype(jnp.float32)


if __name__ == "__main__":
    B = 16
    SEQ_LEN = 128       # gene_num + 1 (small, MXU-friendly example size)
    EMB = 200           # fixed by Conv2d kernel width (1, 200)
    H_DIM = 100
    OUT_DIM = 10

    key = jax.random.PRNGKey(0)
    kx, kp = jax.random.split(key)
    x = jax.random.normal(kx, (B, SEQ_LEN, EMB), jnp.float32)
    params = init_params(kp, SEQ_LEN, EMB, H_DIM, OUT_DIM)

    # Auto tile sizing picks tb=8 here (>=2 grid steps), exercising the batch grid.
    out = identity_forward(x, params)
    out = jax.block_until_ready(out)

    ref = reference_forward(x, params)
    assert out.shape == (B, OUT_DIM), out.shape
    max_err = float(jnp.max(jnp.abs(out - ref)))
    assert jnp.allclose(out, ref, atol=1e-2, rtol=1e-2), max_err

    print("KERNEL_OK")
</pallas_src>

<mosaic_0001>
module attributes {stable_mosaic.version = 11 : i64} {
  func.func @_identity_kernel(%arg0: i32, %arg1: memref<8x128x200xf32, #tpu.memory_space<vmem>>, %arg2: memref<1x200xf32, #tpu.memory_space<vmem>>, %arg3: memref<1x1xf32, #tpu.memory_space<smem>>, %arg4: memref<128x512xbf16, #tpu.memory_space<vmem>>, %arg5: memref<1x512xf32, #tpu.memory_space<vmem>>, %arg6: memref<512x100xbf16, #tpu.memory_space<vmem>>, %arg7: memref<1x100xf32, #tpu.memory_space<vmem>>, %arg8: memref<100x10xbf16, #tpu.memory_space<vmem>>, %arg9: memref<1x10xf32, #tpu.memory_space<vmem>>, %arg10: memref<8x10xf32, #tpu.memory_space<vmem>>) attributes {dimension_semantics = [#tpu.dimension_semantics<parallel>], iteration_bounds = array<i64: 2>, scalar_prefetch = 0 : i64, scratch_operands = 0 : i64, tpu.core_type = #tpu.core_type<tc>, window_params = [{transform_indices = @transform_0, window_bounds = array<i64: 8, 128, 200>}, {pipeline_mode = #tpu.pipeline_mode<synchronous>, transform_indices = @transform_1, window_bounds = array<i64: 1, 200>}, {transform_indices = @transform_2, window_bounds = array<i64: 1, 1>}, {pipeline_mode = #tpu.pipeline_mode<synchronous>, transform_indices = @transform_3, window_bounds = array<i64: 128, 512>}, {pipeline_mode = #tpu.pipeline_mode<synchronous>, transform_indices = @transform_4, window_bounds = array<i64: 1, 512>}, {pipeline_mode = #tpu.pipeline_mode<synchronous>, transform_indices = @transform_5, window_bounds = array<i64: 512, 100>}, {pipeline_mode = #tpu.pipeline_mode<synchronous>, transform_indices = @transform_6, window_bounds = array<i64: 1, 100>}, {pipeline_mode = #tpu.pipeline_mode<synchronous>, transform_indices = @transform_7, window_bounds = array<i64: 100, 10>}, {pipeline_mode = #tpu.pipeline_mode<synchronous>, transform_indices = @transform_8, window_bounds = array<i64: 1, 10>}, {transform_indices = @transform_9, window_bounds = array<i64: 8, 10>}]} {
    %c0 = arith.constant 0 : index
    %c0_0 = arith.constant 0 : index
    %c0_1 = arith.constant 0 : index
    %0 = vector.load %arg1[%c0, %c0_0, %c0_1] : memref<8x128x200xf32, #tpu.memory_space<vmem>>, vector<8x128x200xf32>
    %c0_2 = arith.constant 0 : index
    %c0_3 = arith.constant 0 : index
    %1 = vector.load %arg2[%c0_2, %c0_3] : memref<1x200xf32, #tpu.memory_space<vmem>>, vector<1x200xf32>
    %2 = vector.shape_cast %1 : vector<1x200xf32> to vector<200xf32>
    %3 = vector.shape_cast %2 : vector<200xf32> to vector<1x1x200xf32>
    %4 = vector.broadcast %3 : vector<1x1x200xf32> to vector<8x128x200xf32>
    %5 = arith.mulf %0, %4 : vector<8x128x200xf32>
    %cst = arith.constant dense<0.000000e+00> : vector<8x128xf32>
    %6 = vector.multi_reduction <add>, %5, %cst [2] : vector<8x128x200xf32> to vector<8x128xf32>
    %c0_4 = arith.constant 0 : index
    %c0_5 = arith.constant 0 : index
    %7 = memref.load %arg3[%c0_4, %c0_5] : memref<1x1xf32, #tpu.memory_space<smem>>
    %8 = vector.broadcast %7 : f32 to vector<8x128xf32>
    %9 = arith.addf %6, %8 : vector<8x128xf32>
    %cst_6 = arith.constant 0.000000e+00 : f32
    %10 = vector.broadcast %cst_6 : f32 to vector<8x128xf32>
    %11 = arith.maximumf %9, %10 : vector<8x128xf32>
    %12 = arith.truncf %11 : vector<8x128xf32> to vector<8x128xbf16>
    %c0_7 = arith.constant 0 : index
    %c0_8 = arith.constant 0 : index
    %13 = vector.load %arg4[%c0_7, %c0_8] : memref<128x512xbf16, #tpu.memory_space<vmem>>, vector<128x512xbf16>
    %cst_9 = arith.constant dense<0.000000e+00> : vector<8x512xf32>
    %14 = tpu.matmul %12, %13, %cst_9 {dimension_numbers = #tpu.dot_dimension_numbers<[1], [0], [0], [1], [0, 0, 1, 1], [], []>} : vector<8x128xbf16>, vector<128x512xbf16>, vector<8x512xf32> -> vector<8x512xf32>
    %c0_10 = arith.constant 0 : index
    %c0_11 = arith.constant 0 : index
    %15 = vector.load %arg5[%c0_10, %c0_11] : memref<1x512xf32, #tpu.memory_space<vmem>>, vector<1x512xf32>
    %16 = vector.broadcast %15 : vector<1x512xf32> to vector<8x512xf32>
    %17 = arith.addf %14, %16 : vector<8x512xf32>
    %cst_12 = arith.constant 0.000000e+00 : f32
    %18 = vector.broadcast %cst_12 : f32 to vector<8x512xf32>
    %19 = arith.maximumf %17, %18 : vector<8x512xf32>
    %20 = arith.truncf %19 : vector<8x512xf32> to vector<8x512xbf16>
    %c0_13 = arith.constant 0 : index
    %c0_14 = arith.constant 0 : index
    %21 = vector.load %arg6[%c0_13, %c0_14] : memref<512x100xbf16, #tpu.memory_space<vmem>>, vector<512x100xbf16>
    %cst_15 = arith.constant dense<0.000000e+00> : vector<8x100xf32>
    %22 = tpu.matmul %20, %21, %cst_15 {dimension_numbers = #tpu.dot_dimension_numbers<[1], [0], [0], [1], [0, 0, 1, 1], [], []>} : vector<8x512xbf16>, vector<512x100xbf16>, vector<8x100xf32> -> vector<8x100xf32>
    %c0_16 = arith.constant 0 : index
    %c0_17 = arith.constant 0 : index
    %23 = vector.load %arg7[%c0_16, %c0_17] : memref<1x100xf32, #tpu.memory_space<vmem>>, vector<1x100xf32>
    %24 = vector.broadcast %23 : vector<1x100xf32> to vector<8x100xf32>
    %25 = arith.addf %22, %24 : vector<8x100xf32>
    %cst_18 = arith.constant 0.000000e+00 : f32
    %26 = vector.broadcast %cst_18 : f32 to vector<8x100xf32>
    %27 = arith.maximumf %25, %26 : vector<8x100xf32>
    %28 = arith.truncf %27 : vector<8x100xf32> to vector<8x100xbf16>
    %c0_19 = arith.constant 0 : index
    %c0_20 = arith.constant 0 : index
    %29 = vector.load %arg8[%c0_19, %c0_20] : memref<100x10xbf16, #tpu.memory_space<vmem>>, vector<100x10xbf16>
    %cst_21 = arith.constant dense<0.000000e+00> : vector<8x10xf32>
    %30 = tpu.matmul %28, %29, %cst_21 {dimension_numbers = #tpu.dot_dimension_numbers<[1], [0], [0], [1], [0, 0, 1, 1], [], []>} : vector<8x100xbf16>, vector<100x10xbf16>, vector<8x10xf32> -> vector<8x10xf32>
    %c0_22 = arith.constant 0 : index
    %c0_23 = arith.constant 0 : index
    %31 = vector.load %arg9[%c0_22, %c0_23] : memref<1x10xf32, #tpu.memory_space<vmem>>, vector<1x10xf32>
    %32 = vector.broadcast %31 : vector<1x10xf32> to vector<8x10xf32>
    %33 = arith.addf %30, %32 : vector<8x10xf32>
    %c0_24 = arith.constant 0 : index
    %c0_25 = arith.constant 0 : index
    %34 = vector.load %arg10[%c0_24, %c0_25] : memref<8x10xf32, #tpu.memory_space<vmem>>, vector<8x10xf32>
    tpu.vector_store %arg10[%c0_24, %c0_25], %33 {strides = array<i32>} : memref<8x10xf32, #tpu.memory_space<vmem>>, vector<8x10xf32>,
    return
  }
  func.func @transform_0(%arg0: i32) -> (i32, i32, i32) {
    %c0_i32 = arith.constant 0 : i32
    %c0_i32_0 = arith.constant 0 : i32
    %c0_i32_1 = arith.constant 0 : i32
    return %arg0, %c0_i32, %c0_i32_0 : i32, i32, i32
  }
  func.func @transform_1(%arg0: i32) -> (i32, i32) {
    %c0_i32 = arith.constant 0 : i32
    %c0_i32_0 = arith.constant 0 : i32
    %c0_i32_1 = arith.constant 0 : i32
    return %c0_i32, %c0_i32_0 : i32, i32
  }
  func.func @transform_2(%arg0: i32) -> (i32, i32) {
    %c0_i32 = arith.constant 0 : i32
    %c0_i32_0 = arith.constant 0 : i32
    %c0_i32_1 = arith.constant 0 : i32
    return %c0_i32, %c0_i32_0 : i32, i32
  }
  func.func @transform_3(%arg0: i32) -> (i32, i32) {
    %c0_i32 = arith.constant 0 : i32
    %c0_i32_0 = arith.constant 0 : i32
    %c0_i32_1 = arith.constant 0 : i32
    return %c0_i32, %c0_i32_0 : i32, i32
  }
  func.func @transform_4(%arg0: i32) -> (i32, i32) {
    %c0_i32 = arith.constant 0 : i32
    %c0_i32_0 = arith.constant 0 : i32
    %c0_i32_1 = arith.constant 0 : i32
    return %c0_i32, %c0_i32_0 : i32, i32
  }
  func.func @transform_5(%arg0: i32) -> (i32, i32) {
    %c0_i32 = arith.constant 0 : i32
    %c0_i32_0 = arith.constant 0 : i32
    %c0_i32_1 = arith.constant 0 : i32
    return %c0_i32, %c0_i32_0 : i32, i32
  }
  func.func @transform_6(%arg0: i32) -> (i32, i32) {
    %c0_i32 = arith.constant 0 : i32
    %c0_i32_0 = arith.constant 0 : i32
    %c0_i32_1 = arith.constant 0 : i32
    return %c0_i32, %c0_i32_0 : i32, i32
  }
  func.func @transform_7(%arg0: i32) -> (i32, i32) {
    %c0_i32 = arith.constant 0 : i32
    %c0_i32_0 = arith.constant 0 : i32
    %c0_i32_1 = arith.constant 0 : i32
    return %c0_i32, %c0_i32_0 : i32, i32
  }
  func.func @transform_8(%arg0: i32) -> (i32, i32) {
    %c0_i32 = arith.constant 0 : i32
    %c0_i32_0 = arith.constant 0 : i32
    %c0_i32_1 = arith.constant 0 : i32
    return %c0_i32, %c0_i32_0 : i32, i32
  }
  func.func @transform_9(%arg0: i32) -> (i32, i32) {
    %c0_i32 = arith.constant 0 : i32
    %c0_i32_0 = arith.constant 0 : i32
    return %arg0, %c0_i32 : i32, i32
  }
}

</mosaic_0001>

<bundles_post_ra>
// kernel: tpu_custom_call.1
= control target key start
LH: loop header
LB: loop body
LE: loop exit
PB: predicated region body
PF: predicated region fallthrough
CT: control target
= control target key end

     0   :  { %s5559_s0 = inlined_call_operand.vmem [shape: f32[16,128,200], index: 0, kind: input, shape index: {}]   ;;  %s5560_s1 = inlined_call_operand.vmem [shape: f32[1,200], index: 1, kind: input, shape index: {}]   ;;  %s5561_s2 = inlined_call_operand.<no memory space> [shape: f32[1,1], index: 2, kind: input, shape index: {}]   ;;  %s5562_s3 = inlined_call_operand.vmem [shape: bf16[128,512], index: 3, kind: input, shape index: {}]   ;;  %s5563_s4 = inlined_call_operand.vmem [shape: f32[1,512], index: 4, kind: input, shape index: {}]   ;;  %s5564_s5 = inlined_call_operand.vmem [shape: bf16[512,100], index: 5, kind: input, shape index: {}]   ;;  %s5565_s6 = inlined_call_operand.vmem [shape: f32[1,100], index: 6, kind: input, shape index: {}]   ;;  %s5566_s7 = inlined_call_operand.vmem [shape: bf16[100,10], index: 7, kind: input, shape index: {}]   ;;  %s5567_s8 = inlined_call_operand.vmem [shape: f32[1,10], index: 8, kind: input, shape index: {}]   ;;  %s5568_s9 = inlined_call_operand.hbm [shape: f32[16,10], index: 9, kind: output, shape index: {}]  }
   0x1   :  { %14 = sst [smem:[#allocation2]] %s5561_s2 }
   0x2   :  { %15 = vsyncpa [#allocation4], 0 }
   0x3   :  { %17 = vsyncpa [#allocation4 + $0x1], 0  ;;  %s3807_s11 = smov 0   ;;  %s3809_s12 = smov 0  }
   0x4   :  { %s3811_s13 = smov 0   ;;  %s3813_s14 = smov 0  }
   0x5 LB: > { %s3828_s2 = sadd.s32 4294967295, %s3748_s14   ;;  %s3400_s15 = sadd.s32 4294967294, %s3748_s14   ;;  %s3748_s14 = sphi %s3813_s14, %s5574_s14   ;;  %s3744_s13 = sphi %s3811_s13, %s5573_s13   ;;  %s3740_s12 = sphi %s3809_s12, %s5572_s12   ;;  %s3736_s11 = sphi %s3807_s11, %s5571_s11  }
   0x6   : > { %s3832_s16 = sadd.s32 1, %s3748_s14   ;;  %s224_s17 = sadd.s32 1, %s3744_s13 }
   0x7   : > { %s221_s18 = ssub.s32 %s3748_s14, %s3832_s16  ;;  %p234_p0 = scmp.ne.s32.totalorder %s3744_s13, %s3740_s12 }
   0x8   : > { %p222_p1 = scmp.eq.s32.totalorder %s221_s18, 0  ;;  %p235_p2 = scmp.eq.s32.totalorder %s3828_s2, 1 }
   0x9   : > { %p240_p3 = scmp.ne.s32.totalorder %s3740_s12, %s3736_s11  ;;  %p241_p4 = scmp.eq.s32.totalorder %s3400_s15, 1 }
   0xa   : > { %s3843_s19 = scalar_select %p222_p1, %s3744_s13, %s224_s17  }
   0xb   : > { %p3845_p5 = por %p235_p2, %p234_p0  ;;  %p3849_p6 = por %p241_p4, %p240_p3 }
   0xc   : > { %p3403_p7 = scmp.ge.s32.totalorder %s3748_s14, 1  ;;  %p293_p8 = scmp.lt.s32.totalorder %s3748_s14, 3 }
   0xe   : > { %p294_p9 = pnand %p3403_p7, %p293_p8 }
   0xf   : > { %s3405_s22 = sshll.u32 (!%p294_p9), %s3828_s2, 3  ;;  %v596_v0 = vlaneseq (!%p294_p9)  ;;  %v594_v1 = vld [vmem:[%s5560_s1] sm:$0x3] (!%p294_p9)  ;;  %vm862_vm0 = vcmask (!%p294_p9), 588800   ;;  %s4197_s29 = sld [smem:[#allocation2]] (!%p294_p9)  ;;  %vm1954_vm1 = vcmask (!%p294_p9), 130112  }
  0x10   : > { %297 = sbr.rel (%p294_p9) target bundleno = 1113 (0x459), region = 56  ;;  %p331_p10 = scmp.lt.s32.totalorder (!%p294_p9), %s3405_s22, 15  ;;  %vm1961_vm2 = vcmask (!%p294_p9), 195712   ;;  %vm1968_vm3 = vcmask (!%p294_p9), 261312   ;;  %vm1975_vm4 = vcmask (!%p294_p9), 326912   ;;  %vm1982_vm5 = vcmask (!%p294_p9), 392512  }
  0x11   : > { %v3860_v2 = vshrl.u32 (!%p294_p9), %v596_v0, 7  ;;  %vm1989_vm6 = vcmask (!%p294_p9), 458112   ;;  %vm1996_vm7 = vcmask (!%p294_p9), 523712   ;;  %vm2003_vm8 = vcmask (!%p294_p9), 589312   ;;  %s327_s17 = sand.u32 (!%p294_p9), 1, %s3740_s12   ;;  %s3483_s24 = sshll.u32 (!%p294_p9), %s3828_s2, 7 }
  0x12   : > { %vm2010_vm9 = vcmask (!%p294_p9), 654912   ;;  %vm2017_vm10 = vcmask (!%p294_p9), 720512   ;;  %vm2024_vm11 = vcmask (!%p294_p9), 786112   ;;  %vm2031_vm12 = vcmask (!%p294_p9), 851712   ;;  %s3404_s18 = sshll.u32 (!%p294_p9), %s327_s17, 3  ;;  %s3328_s2 = scalar_lea.sflag (!%p294_p9), [#allocation4], %s327_s17 }
  0x13   : > { %v598_v3 = vsub.s32 (!%p294_p9), 0, %v3860_v2  ;;  %v602_v4 = vsub.s32 (!%p294_p9), 1, %v3860_v2  ;;  %vm2038_vm13 = vcmask (!%p294_p9), 917312   ;;  %vm2045_vm14 = vcmask (!%p294_p9), 982912   ;;  %s3753_s10 = smov (!%p294_p9), [#allocation3]  }
  0x14   : > { %vm2052_vm15 = vcmask (!%p294_p9), 1048512   ;;  %s3690_s15 = sshll.u32 (!%p294_p9), %s3753_s10, 4  ;;  %s3691_s15 = int_to_ptr.vmem [resolvable:$false] %s3690_s15 }
  0x15   : > { %v3871_v5 = vrot.slane (!%p294_p9), %v594_v1, %v598_v3  ;;  %v3875_v6 = vrot.slane (!%p294_p9), %v594_v1, %v602_v4 }
  0x17   : > { %s5576_s22 = smov (!%p331_p10, %s3405_s22), 15 }
  0x18   : > { %s3486_s25 = sshll.u32 %s5576_s22, 8 }
  0x19   : > { %s3867_s28 = scalar_lea.vmem %s5559_s0, %s3486_s25  ;;  %s329_s25 = scalar_lea.vmem [#allocation3], %s3404_s18 }
  0x1a   : > { %v370_v7 = vld [vmem:[%s3867_s28 + $0x100] sm:$0xff]  ;;  %v371_v8 = vld [vmem:[%s3867_s28 + $0x108] sm:$0xff]  ;;  %v372_v14 = vld [vmem:[%s3867_s28 + $0x110] sm:$0xff]  ;;  %s3341_s26 = sshll.u32 %s329_s25, 4  ;;  %s3692_s18 = scalar_lea.vmem %s3691_s15, 256  ;;  %s5519_s26 = int_to_ptr.vmem [resolvable:$true] %s3341_s26 }
  0x1b   : > { %v338_v9 = vld [vmem:[%s3867_s28] sm:$0xff]  ;;  %v638_v10 = vmul.f32 %v3871_v5, %v370_v7  ;;  %v639_v11 = vmul.f32 %v3875_v6, %v371_v8  ;;  %v339_v12 = vld [vmem:[%s3867_s28 + $0x8] sm:$0xff]  ;;  %v373_v15 = vld [vmem:[%s3867_s28 + $0x118] sm:$0xff]  ;;  %v640_v17 = vmul.f32 %v3871_v5, %v372_v14  ;;  %s3686_s30 = scalar_lea.vmem %s5519_s26, 128  ;;  %p3693_p0 = scmp.lt.s32.totalorder %s5519_s26, %s3691_s15 }
  0x1c   : > { %v606_v13 = vmul.f32 %v3871_v5, %v338_v9  ;;  %v607_v16 = vmul.f32 %v3875_v6, %v339_v12  ;;  %v641_v18 = vmul.f32 %v3875_v6, %v373_v15  ;;  %v340_v19 = vld [vmem:[%s3867_s28 + $0x10] sm:$0xff]  ;;  %v341_v20 = vld [vmem:[%s3867_s28 + $0x18] sm:$0xff]  ;;  %v343_v26 = vld [vmem:[%s3867_s28 + $0x28] sm:$0xff]  ;;  %p3687_p11 = scmp.ne.s32.totalorder %s5519_s26, %s3686_s30  ;;  %p3694_p1 = scmp.lt.s32.totalorder %s3692_s18, %s3686_s30 }
  0x1d   : > { %v927_v21 = vsel %vm862_vm0, %v639_v11, 0.0  ;;  %v608_v22 = vmul.f32 %v3871_v5, %v340_v19  ;;  %v609_v23 = vmul.f32 %v3875_v6, %v341_v20  ;;  %v344_v24 = vld [vmem:[%s3867_s28 + $0x30] sm:$0xff]  ;;  %v345_v25 = vld [vmem:[%s3867_s28 + $0x38] sm:$0xff]  ;;  %v342_v31 = vld [vmem:[%s3867_s28 + $0x20] sm:$0xff]  ;;  %v611_v38 = vmul.f32 %v3875_v6, %v343_v26 }
  0x1e   : > { %v928_v27 = vadd.f32 %v927_v21, %v638_v10  ;;  %v863_v28 = vsel %vm862_vm0, %v607_v16, 0.0  ;;  %v931_v29 = vsel %vm862_vm0, %v641_v18, 0.0  ;;  %v613_v30 = vmul.f32 %v3875_v6, %v345_v25  ;;  %v377_v32 = vld [vmem:[%s3867_s28 + $0x138] sm:$0xff]  ;;  %v375_v35 = vld [vmem:[%s3867_s28 + $0x128] sm:$0xff]  ;;  %v376_v42 = vld [vmem:[%s3867_s28 + $0x130] sm:$0xff]  ;;  %p3688_p12 = pnand %p3687_p11, %p3845_p5  ;;  %p3695_p2 = por %p3694_p1, %p3693_p0 }
  0x1f   : > { %v864_v33 = vadd.f32 %v863_v28, %v606_v13  ;;  %v867_v34 = vsel %vm862_vm0, %v609_v23, 0.0  ;;  %v932_v36 = vadd.f32 %v931_v29, %v640_v17  ;;  %v612_v37 = vmul.f32 %v3871_v5, %v344_v24  ;;  %v374_v45 = vld [vmem:[%s3867_s28 + $0x120] sm:$0xff]  ;;  %v405_v47 = vld [vmem:[%s3867_s28 + $0x218] sm:$0xff]  ;;  %v403_v48 = vld [vmem:[%s3867_s28 + $0x208] sm:$0xff] }
  0x20   : > { %929 = vadd.xlane.f32.xlu1 %v928_v27  ;;  %v868_v39 = vadd.f32 %v867_v34, %v608_v22  ;;  %v875_v40 = vsel %vm862_vm0, %v613_v30, 0.0  ;;  %v610_v41 = vmul.f32 %v3871_v5, %v342_v31  ;;  %v645_v43 = vmul.f32 %v3875_v6, %v377_v32  ;;  %v404_v54 = vld [vmem:[%s3867_s28 + $0x210] sm:$0xff]  ;;  %v402_v57 = vld [vmem:[%s3867_s28 + $0x200] sm:$0xff]  ;;  %v409_v59 = vld [vmem:[%s3867_s28 + $0x238] sm:$0xff]  ;;  %p3689_p13 = pneg %p3688_p12 }
  0x21   : > { %865 = vadd.xlane.f32.xlu0 %v864_v33  ;;  %v871_v44 = vsel %vm862_vm0, %v611_v38, 0.0  ;;  %v643_v46 = vmul.f32 %v3875_v6, %v375_v35  ;;  %v876_v49 = vadd.f32 %v875_v40, %v612_v37  ;;  %v644_v50 = vmul.f32 %v3871_v5, %v376_v42  ;;  %v407_v60 = vld [vmem:[%s3867_s28 + $0x228] sm:$0xff]  ;;  %v408_v8 = vld [vmem:[%s3867_s28 + $0x230] sm:$0xff]  ;;  %v406_v11 = vld [vmem:[%s3867_s28 + $0x220] sm:$0xff] }
  0x22   : > { %v872_v51 = vadd.f32 %v871_v44, %v610_v41  ;;  %v939_v52 = vsel %vm862_vm0, %v645_v43, 0.0  ;;  %v642_v53 = vmul.f32 %v3871_v5, %v374_v45  ;;  %v673_v55 = vmul.f32 %v3875_v6, %v405_v47  ;;  %v437_v13 = vld [vmem:[%s3867_s28 + $0x318] sm:$0xff]  ;;  %v435_v14 = vld [vmem:[%s3867_s28 + $0x308] sm:$0xff]  ;;  %v436_v20 = vld [vmem:[%s3867_s28 + $0x310] sm:$0xff]  ;;  %p3696_p3 = pnand %p3695_p2, %p3689_p13 }
  0x23   : > { %v935_v56 = vsel %vm862_vm0, %v643_v46, 0.0  ;;  %v671_v58 = vmul.f32 %v3875_v6, %v403_v48  ;;  %v940_v61 = vadd.f32 %v939_v52, %v644_v50  ;;  %v672_v62 = vmul.f32 %v3871_v5, %v404_v54  ;;  %v434_v23 = vld [vmem:[%s3867_s28 + $0x300] sm:$0xff]  ;;  %v349_v25 = vld [vmem:[%s3867_s28 + $0x58] sm:$0xff]  ;;  %v347_v26 = vld [vmem:[%s3867_s28 + $0x48] sm:$0xff] }
  0x24   : > { %933 = vadd.xlane.f32.xlu1 %v932_v36  ;;  %v936_v63 = vadd.f32 %v935_v56, %v642_v53  ;;  %v995_v1 = vsel %vm862_vm0, %v673_v55, 0.0  ;;  %v670_v7 = vmul.f32 %v3871_v5, %v402_v57  ;;  %v677_v9 = vmul.f32 %v3875_v6, %v409_v59  ;;  %v348_v32 = vld [vmem:[%s3867_s28 + $0x50] sm:$0xff]  ;;  %v346_v35 = vld [vmem:[%s3867_s28 + $0x40] sm:$0xff]  ;;  %v381_v37 = vld [vmem:[%s3867_s28 + $0x158] sm:$0xff] }
  0x25   : > { %869 = vadd.xlane.f32.xlu0 %v868_v39  ;;  %v991_v10 = vsel %vm862_vm0, %v671_v58, 0.0  ;;  %v675_v12 = vmul.f32 %v3875_v6, %v407_v60  ;;  %v996_v15 = vadd.f32 %v995_v1, %v672_v62  ;;  %v676_v16 = vmul.f32 %v3871_v5, %v408_v8  ;;  %v379_v38 = vld [vmem:[%s3867_s28 + $0x148] sm:$0xff]  ;;  %v380_v44 = vld [vmem:[%s3867_s28 + $0x150] sm:$0xff]  ;;  %v378_v47 = vld [vmem:[%s3867_s28 + $0x140] sm:$0xff] }
  0x26   : > { %v992_v17 = vadd.f32 %v991_v10, %v670_v7  ;;  %v1003_v18 = vsel %vm862_vm0, %v677_v9, 0.0  ;;  %v674_v19 = vmul.f32 %v3871_v5, %v406_v11  ;;  %v705_v21 = vmul.f32 %v3875_v6, %v437_v13  ;;  %v439_v50 = vld [vmem:[%s3867_s28 + $0x328] sm:$0xff]  ;;  %v440_v56 = vld [vmem:[%s3867_s28 + $0x330] sm:$0xff]  ;;  %v438_v59 = vld [vmem:[%s3867_s28 + $0x320] sm:$0xff] }
  0x27   : > { %v999_v22 = vsel %vm862_vm0, %v675_v12, 0.0  ;;  %v703_v24 = vmul.f32 %v3875_v6, %v435_v14  ;;  %v1004_v27 = vadd.f32 %v1003_v18, %v676_v16  ;;  %v704_v28 = vmul.f32 %v3871_v5, %v436_v20  ;;  %v467_v62 = vld [vmem:[%s3867_s28 + $0x408] sm:$0xff]  ;;  %v468_v10 = vld [vmem:[%s3867_s28 + $0x410] sm:$0xff]  ;;  %v466_v13 = vld [vmem:[%s3867_s28 + $0x400] sm:$0xff] }
  0x28   : > { %877 = vadd.xlane.f32.xlu1 %v876_v49  ;;  %v1000_v29 = vadd.f32 %v999_v22, %v674_v19  ;;  %v1059_v30 = vsel %vm862_vm0, %v705_v21, 0.0  ;;  %v702_v31 = vmul.f32 %v3871_v5, %v434_v23  ;;  %v617_v33 = vmul.f32 %v3875_v6, %v349_v25  ;;  %v441_v49 = vld [vmem:[%s3867_s28 + $0x338] sm:$0xff]  ;;  %v411_v16 = vld [vmem:[%s3867_s28 + $0x248] sm:$0xff]  ;;  %v412_v22 = vld [vmem:[%s3867_s28 + $0x250] sm:$0xff] }
  0x29   : > { %873 = vadd.xlane.f32.xlu0 %v872_v51  ;;  %v1055_v34 = vsel %vm862_vm0, %v703_v24, 0.0  ;;  %v615_v36 = vmul.f32 %v3875_v6, %v347_v26  ;;  %v1060_v39 = vadd.f32 %v1059_v30, %v704_v28  ;;  %v616_v40 = vmul.f32 %v3871_v5, %v348_v32  ;;  %v410_v25 = vld [vmem:[%s3867_s28 + $0x240] sm:$0xff]  ;;  %v471_v28 = vld [vmem:[%s3867_s28 + $0x428] sm:$0xff] }
  0x2a   : > { %v1056_v41 = vadd.f32 %v1055_v34, %v702_v31  ;;  %v883_v42 = vsel %vm862_vm0, %v617_v33, 0.0  ;;  %v614_v43 = vmul.f32 %v3871_v5, %v346_v35  ;;  %v649_v45 = vmul.f32 %v3875_v6, %v381_v37  ;;  %v472_v34 = vld [vmem:[%s3867_s28 + $0x430] sm:$0xff]  ;;  %v470_v37 = vld [vmem:[%s3867_s28 + $0x420] sm:$0xff] }
  0x2b   : > { %v879_v46 = vsel %vm862_vm0, %v615_v36, 0.0  ;;  %v647_v48 = vmul.f32 %v3875_v6, %v379_v38  ;;  %v884_v51 = vadd.f32 %v883_v42, %v616_v40  ;;  %v648_v52 = vmul.f32 %v3871_v5, %v380_v44  ;;  %v499_v40 = vld [vmem:[%s3867_s28 + $0x508] sm:$0xff] }
  0x2c   : > { %941 = vadd.xlane.f32.xlu1 %v940_v61  ;;  %v880_v53 = vadd.f32 %v879_v46, %v614_v43  ;;  %v947_v54 = vsel %vm862_vm0, %v649_v45, 0.0  ;;  %v646_v55 = vmul.f32 %v3871_v5, %v378_v47  ;;  %v709_v57 = vmul.f32 %v3875_v6, %v441_v49  ;;  %v469_v61 = vld [vmem:[%s3867_s28 + $0x418] sm:$0xff]  ;;  %v500_v46 = vld [vmem:[%s3867_s28 + $0x510] sm:$0xff]  ;;  %v498_v49 = vld [vmem:[%s3867_s28 + $0x500] sm:$0xff] }
  0x2d   : > { %937 = vadd.xlane.f32.xlu0 %v936_v63  ;;  %v943_v58 = vsel %vm862_vm0, %v647_v48, 0.0  ;;  %v707_v60 = vmul.f32 %v3875_v6, %v439_v50  ;;  %v948_v63 = vadd.f32 %v947_v54, %v648_v52  ;;  %v708_v1 = vmul.f32 %v3871_v5, %v440_v56  ;;  %v351_v52 = vld [vmem:[%s3867_s28 + $0x68] sm:$0xff] }
  0x2e   : > { %v944_v7 = vadd.f32 %v943_v58, %v646_v55  ;;  %v1067_v8 = vsel %vm862_vm0, %v709_v57, 0.0  ;;  %v706_v9 = vmul.f32 %v3871_v5, %v438_v59  ;;  %v737_v11 = vmul.f32 %v3875_v6, %v469_v61  ;;  %v352_v58 = vld [vmem:[%s3867_s28 + $0x70] sm:$0xff]  ;;  %v350_v61 = vld [vmem:[%s3867_s28 + $0x60] sm:$0xff] }
  0x2f   : > { %v1063_v12 = vsel %vm862_vm0, %v707_v60, 0.0  ;;  %v735_v14 = vmul.f32 %v3875_v6, %v467_v62  ;;  %v736_v18 = vmul.f32 %v3871_v5, %v468_v10  ;;  %v734_v21 = vmul.f32 %v3871_v5, %v466_v13 }
  0x30   : > { %997 = vadd.xlane.f32.xlu1 %v996_v15  ;;  %v413_v15 = vld [vmem:[%s3867_s28 + $0x258] sm:$0xff]  ;;  %v1064_v19 = vadd.f32 %v1063_v12, %v706_v9  ;;  %v1123_v20 = vsel %vm862_vm0, %v737_v11, 0.0  ;;  %v679_v26 = vmul.f32 %v3875_v6, %v411_v16  ;;  %v680_v30 = vmul.f32 %v3871_v5, %v412_v22  ;;  %v384_v12 = vld [vmem:[%s3867_s28 + $0x170] sm:$0xff] }
  0x31   : > { %993 = vadd.xlane.f32.xlu0 %v992_v17  ;;  %v1068_v17 = vadd.f32 %v1067_v8, %v708_v1  ;;  %v681_v23 = vmul.f32 %v3875_v6, %v413_v15  ;;  %v1119_v24 = vsel %vm862_vm0, %v735_v14, 0.0  ;;  %v678_v33 = vmul.f32 %v3871_v5, %v410_v25  ;;  %v383_v1 = vld [vmem:[%s3867_s28 + $0x168] sm:$0xff]  ;;  %v382_v15 = vld [vmem:[%s3867_s28 + $0x160] sm:$0xff] }
  0x32   : > { %v1120_v31 = vadd.f32 %v1119_v24, %v734_v21  ;;  %v1007_v36 = vsel %vm862_vm0, %v679_v26, 0.0  ;;  %v739_v38 = vmul.f32 %v3875_v6, %v471_v28  ;;  %v740_v42 = vmul.f32 %v3871_v5, %v472_v34  ;;  %v444_v24 = vld [vmem:[%s3867_s28 + $0x350] sm:$0xff] }
  0x33   : > { %v1011_v32 = vsel %vm862_vm0, %v681_v23, 0.0  ;;  %v1008_v43 = vadd.f32 %v1007_v36, %v678_v33  ;;  %v738_v45 = vmul.f32 %v3871_v5, %v470_v37  ;;  %v767_v50 = vmul.f32 %v3875_v6, %v499_v40  ;;  %v504_v33 = vld [vmem:[%s3867_s28 + $0x530] sm:$0xff]  ;;  %v531_v40 = vld [vmem:[%s3867_s28 + $0x608] sm:$0xff] }
  0x34   : > { %1005 = vadd.xlane.f32.xlu1 %v1004_v27  ;;  %v473_v27 = vld [vmem:[%s3867_s28 + $0x438] sm:$0xff]  ;;  %v1127_v48 = vsel %vm862_vm0, %v739_v38, 0.0  ;;  %v768_v54 = vmul.f32 %v3871_v5, %v500_v46  ;;  %v766_v57 = vmul.f32 %v3871_v5, %v498_v49  ;;  %v619_v62 = vmul.f32 %v3875_v6, %v351_v52  ;;  %v502_v38 = vld [vmem:[%s3867_s28 + $0x520] sm:$0xff] }
  0x35   : > { %1001 = vadd.xlane.f32.xlu0 %v1000_v29  ;;  %v1124_v29 = vadd.f32 %v1123_v20, %v736_v18  ;;  %v741_v35 = vmul.f32 %v3875_v6, %v473_v27  ;;  %v1128_v55 = vadd.f32 %v1127_v48, %v738_v45  ;;  %v1183_v60 = vsel %vm862_vm0, %v767_v50, 0.0  ;;  %v443_v18 = vld [vmem:[%s3867_s28 + $0x348] sm:$0xff]  ;;  %v442_v27 = vld [vmem:[%s3867_s28 + $0x340] sm:$0xff]  ;;  %v417_v48 = vld [vmem:[%s3867_s28 + $0x278] sm:$0xff] }
  0x36   : > { %v620_v8 = vmul.f32 %v3871_v5, %v352_v58  ;;  %v1184_v9 = vadd.f32 %v1183_v60, %v766_v57  ;;  %v618_v11 = vmul.f32 %v3871_v5, %v350_v61  ;;  %v887_v14 = vsel %vm862_vm0, %v619_v62, 0.0  ;;  %v477_v60 = vld [vmem:[%s3867_s28 + $0x458] sm:$0xff]  ;;  %v475_v61 = vld [vmem:[%s3867_s28 + $0x448] sm:$0xff] }
  0x37   : > { %v1131_v44 = vsel %vm862_vm0, %v741_v35, 0.0  ;;  %v651_v16 = vmul.f32 %v3875_v6, %v383_v1  ;;  %v652_v20 = vmul.f32 %v3871_v5, %v384_v12  ;;  %v650_v23 = vmul.f32 %v3871_v5, %v382_v15  ;;  %v476_v12 = vld [vmem:[%s3867_s28 + $0x450] sm:$0xff] }
  0x38   : > { %1061 = vadd.xlane.f32.xlu1 %v1060_v39  ;;  %v501_v39 = vld [vmem:[%s3867_s28 + $0x518] sm:$0xff]  ;;  %v888_v21 = vadd.f32 %v887_v14, %v618_v11  ;;  %v711_v28 = vmul.f32 %v3875_v6, %v443_v18  ;;  %v710_v36 = vmul.f32 %v3871_v5, %v442_v27  ;;  %v772_v45 = vmul.f32 %v3871_v5, %v504_v33 }
  0x39   : > { %1057 = vadd.xlane.f32.xlu0 %v1056_v41  ;;  %v1012_v41 = vadd.f32 %v1011_v32, %v680_v30  ;;  %v769_v47 = vmul.f32 %v3875_v6, %v501_v39  ;;  %v951_v26 = vsel %vm862_vm0, %v651_v16, 0.0  ;;  %v503_v30 = vld [vmem:[%s3867_s28 + $0x528] sm:$0xff]  ;;  %v712_v32 = vmul.f32 %v3871_v5, %v444_v24  ;;  %v533_v39 = vld [vmem:[%s3867_s28 + $0x618] sm:$0xff]  ;;  %v474_v16 = vld [vmem:[%s3867_s28 + $0x440] sm:$0xff] }
  0x3a   : > { %v952_v34 = vadd.f32 %v951_v26, %v650_v23  ;;  %v770_v46 = vmul.f32 %v3871_v5, %v502_v38  ;;  %v799_v52 = vmul.f32 %v3875_v6, %v531_v40  ;;  %v745_v15 = vmul.f32 %v3875_v6, %v477_v60  ;;  %v536_v24 = vld [vmem:[%s3867_s28 + $0x630] sm:$0xff]  ;;  %v565_v26 = vld [vmem:[%s3867_s28 + $0x718] sm:$0xff] }
  0x3b   : > { %v1187_v56 = vsel %vm862_vm0, %v769_v47, 0.0  ;;  %v530_v47 = vld [vmem:[%s3867_s28 + $0x600] sm:$0xff]  ;;  %v742_v23 = vmul.f32 %v3871_v5, %v474_v16  ;;  %v833_v40 = vmul.f32 %v3875_v6, %v565_v26  ;;  %v388_v60 = vld [vmem:[%s3867_s28 + $0x190] sm:$0xff] }
  0x3c   : > { %885 = vadd.xlane.f32.xlu1 %v884_v51  ;;  %v353_v51 = vld [vmem:[%s3867_s28 + $0x78] sm:$0xff]  ;;  %v1247_v1 = vsel %vm862_vm0, %v799_v52, 0.0  ;;  %v354_v52 = vld [vmem:[%s3867_s28 + $0x80] sm:$0xff] }
  0x3d   : > { %881 = vadd.xlane.f32.xlu0 %v880_v53  ;;  %v1132_v53 = vadd.f32 %v1131_v44, %v740_v42  ;;  %v621_v59 = vmul.f32 %v3875_v6, %v353_v51  ;;  %v771_v42 = vmul.f32 %v3875_v6, %v503_v30  ;;  %v801_v51 = vmul.f32 %v3875_v6, %v533_v39 }
  0x3f   : > { %v891_v10 = vsel %vm862_vm0, %v621_v59, 0.0  ;;  %v798_v59 = vmul.f32 %v3871_v5, %v530_v47 }
  0x40   : > { %949 = vadd.xlane.f32.xlu1 %v948_v63  ;;  %v385_v63 = vld [vmem:[%s3867_s28 + $0x178] sm:$0xff] }
  0x41   : > { %945 = vadd.xlane.f32.xlu0 %v944_v7  ;;  %v1188_v7 = vadd.f32 %v1187_v56, %v768_v54  ;;  %v653_v13 = vmul.f32 %v3875_v6, %v385_v63  ;;  %v416_v54 = vld [vmem:[%s3867_s28 + $0x270] sm:$0xff]  ;;  %v415_v56 = vld [vmem:[%s3867_s28 + $0x268] sm:$0xff]  ;;  %v1251_v63 = vsel %vm862_vm0, %v801_v51, 0.0 }
  0x43   : > { %v955_v22 = vsel %vm862_vm0, %v653_v13, 0.0  ;;  %v1248_v13 = vadd.f32 %v1247_v1, %v798_v59  ;;  %v622_v59 = vmul.f32 %v3871_v5, %v354_v52 }
  0x44   : > { %1069 = vadd.xlane.f32.xlu1 %v1068_v17  ;;  %v445_v17 = vld [vmem:[%s3867_s28 + $0x358] sm:$0xff] }
  0x45   : > { %1065 = vadd.xlane.f32.xlu0 %v1064_v19  ;;  %v892_v19 = vadd.f32 %v891_v10, %v620_v8  ;;  %v713_v25 = vmul.f32 %v3875_v6, %v445_v17  ;;  %v683_v8 = vmul.f32 %v3875_v6, %v415_v56  ;;  %v684_v10 = vmul.f32 %v3871_v5, %v416_v54  ;;  %v387_v56 = vld [vmem:[%s3867_s28 + $0x188] sm:$0xff] }
  0x46   : > { %v743_v17 = vmul.f32 %v3875_v6, %v475_v61  ;;  %v386_v61 = vld [vmem:[%s3867_s28 + $0x180] sm:$0xff] }
  0x47   : > { %v1075_v35 = vsel %vm862_vm0, %v713_v25, 0.0  ;;  %v1015_v18 = vsel %vm862_vm0, %v683_v8, 0.0  ;;  %v534_v25 = vld [vmem:[%s3867_s28 + $0x620] sm:$0xff] }
  0x48   : > { %1125 = vadd.xlane.f32.xlu1 %v1124_v29  ;;  %v505_v29 = vld [vmem:[%s3867_s28 + $0x538] sm:$0xff]  ;;  %v1076_v44 = vadd.f32 %v1075_v35, %v712_v32  ;;  %v563_v32 = vld [vmem:[%s3867_s28 + $0x708] sm:$0xff]  ;;  %v564_v35 = vld [vmem:[%s3867_s28 + $0x710] sm:$0xff]  ;;  %v802_v39 = vmul.f32 %v3871_v5, %v534_v25 }
  0x49   : > { %1121 = vadd.xlane.f32.xlu0 %v1120_v31  ;;  %v956_v31 = vadd.f32 %v955_v22, %v652_v20  ;;  %v773_v37 = vmul.f32 %v3875_v6, %v505_v29  ;;  %v535_v20 = vld [vmem:[%s3867_s28 + $0x628] sm:$0xff]  ;;  %v744_v22 = vmul.f32 %v3871_v5, %v476_v12  ;;  %v1135_v29 = vsel %vm862_vm0, %v743_v17, 0.0  ;;  %v508_v25 = vld [vmem:[%s3867_s28 + $0x550] sm:$0xff] }
  0x4a   : > { %v656_v12 = vmul.f32 %v3871_v5, %v388_v60  ;;  %v654_v17 = vmul.f32 %v3871_v5, %v386_v61  ;;  %v541_v61 = vld [vmem:[%s3867_s28 + $0x658] sm:$0xff] }
  0x4b   : > { %v1195_v50 = vsel %vm862_vm0, %v773_v37, 0.0  ;;  %v1136_v37 = vadd.f32 %v1135_v29, %v742_v23 }
  0x4c   : > { %1013 = vadd.xlane.f32.xlu1 %v1012_v41  ;;  %v1071_v41 = vsel %vm862_vm0, %v711_v28, 0.0  ;;  %v1196_v57 = vadd.f32 %v1195_v50, %v772_v45  ;;  %v1139_v28 = vsel %vm862_vm0, %v745_v15, 0.0  ;;  %v1315_v50 = vsel %vm862_vm0, %v833_v40, 0.0 }
  0x4d   : > { %1009 = vadd.xlane.f32.xlu0 %v1008_v43  ;;  %v532_v43 = vld [vmem:[%s3867_s28 + $0x610] sm:$0xff]  ;;  %v1072_v49 = vadd.f32 %v1071_v41, %v710_v36  ;;  %v1140_v33 = vadd.f32 %v1139_v28, %v744_v22  ;;  %v562_v36 = vld [vmem:[%s3867_s28 + $0x700] sm:$0xff]  ;;  %v357_v41 = vld [vmem:[%s3867_s28 + $0x98] sm:$0xff] }
  0x4e   : > { %v800_v58 = vmul.f32 %v3871_v5, %v532_v43  ;;  %v831_v43 = vmul.f32 %v3875_v6, %v563_v32  ;;  %v830_v47 = vmul.f32 %v3871_v5, %v562_v36  ;;  %v625_v51 = vmul.f32 %v3875_v6, %v357_v41  ;;  %v569_v32 = vld [vmem:[%s3867_s28 + $0x738] sm:$0xff]  ;;  %v568_v36 = vld [vmem:[%s3867_s28 + $0x730] sm:$0xff]  ;;  %v566_v41 = vld [vmem:[%s3867_s28 + $0x720] sm:$0xff] }
  0x50   : > { %1133 = vadd.xlane.f32.xlu1 %v1132_v53  ;;  %v1191_v53 = vsel %vm862_vm0, %v771_v42, 0.0  ;;  %v1311_v54 = vsel %vm862_vm0, %v831_v43, 0.0  ;;  %v899_v1 = vsel %vm862_vm0, %v625_v51, 0.0 }
  0x51   : > { %1129 = vadd.xlane.f32.xlu0 %v1128_v55  ;;  %v414_v55 = vld [vmem:[%s3867_s28 + $0x260] sm:$0xff]  ;;  %v1192_v62 = vadd.f32 %v1191_v53, %v770_v46  ;;  %v832_v46 = vmul.f32 %v3871_v5, %v564_v35  ;;  %v776_v35 = vmul.f32 %v3871_v5, %v508_v25  ;;  %v391_v25 = vld [vmem:[%s3867_s28 + $0x1a8] sm:$0xff] }
  0x52   : > { %v682_v11 = vmul.f32 %v3871_v5, %v414_v55  ;;  %v389_v55 = vld [vmem:[%s3867_s28 + $0x198] sm:$0xff] }
  0x53   : > { %v657_v8 = vmul.f32 %v3875_v6, %v389_v55  ;;  %v480_v55 = vld [vmem:[%s3867_s28 + $0x470] sm:$0xff] }
  0x54   : > { %1189 = vadd.xlane.f32.xlu1 %v1188_v7  ;;  %v685_v7 = vmul.f32 %v3875_v6, %v417_v48  ;;  %v1016_v27 = vadd.f32 %v1015_v18, %v682_v11  ;;  %v356_v48 = vld [vmem:[%s3867_s28 + $0x90] sm:$0xff] }
  0x55   : > { %1185 = vadd.xlane.f32.xlu0 %v1184_v9  ;;  %v1252_v9 = vadd.f32 %v1251_v63, %v800_v58  ;;  %v624_v58 = vmul.f32 %v3871_v5, %v356_v48  ;;  %v1312_v63 = vadd.f32 %v1311_v54, %v830_v47  ;;  %v963_v16 = vsel %vm862_vm0, %v657_v8, 0.0  ;;  %v481_v47 = vld [vmem:[%s3867_s28 + $0x478] sm:$0xff] }
  0x56   : > { %v1019_v14 = vsel %vm862_vm0, %v685_v7, 0.0  ;;  %v964_v23 = vadd.f32 %v963_v16, %v656_v12  ;;  %v836_v48 = vmul.f32 %v3871_v5, %v568_v36  ;;  %v749_v60 = vmul.f32 %v3875_v6, %v481_v47  ;;  %v361_v8 = vld [vmem:[%s3867_s28 + $0xb8] sm:$0xff]  ;;  %v451_v36 = vld [vmem:[%s3867_s28 + $0x388] sm:$0xff] }
  0x57   : > { %v900_v11 = vadd.f32 %v899_v1, %v624_v58  ;;  %v540_v1 = vld [vmem:[%s3867_s28 + $0x650] sm:$0xff]  ;;  %v748_v12 = vmul.f32 %v3871_v5, %v480_v55  ;;  %v393_v16 = vld [vmem:[%s3867_s28 + $0x1b8] sm:$0xff] }
  0x58   : > { %893 = vadd.xlane.f32.xlu1 %v892_v19  ;;  %v537_v19 = vld [vmem:[%s3867_s28 + $0x638] sm:$0xff] }
  0x59   : > { %889 = vadd.xlane.f32.xlu0 %v888_v21  ;;  %v1020_v21 = vadd.f32 %v1019_v14, %v684_v10  ;;  %v805_v30 = vmul.f32 %v3875_v6, %v537_v19  ;;  %v447_v10 = vld [vmem:[%s3867_s28 + $0x368] sm:$0xff]  ;;  %v509_v14 = vld [vmem:[%s3867_s28 + $0x558] sm:$0xff] }
  0x5a   : > { %v507_v19 = vld [vmem:[%s3867_s28 + $0x548] sm:$0xff]  ;;  %v715_v22 = vmul.f32 %v3875_v6, %v447_v10  ;;  %v777_v26 = vmul.f32 %v3875_v6, %v509_v14  ;;  %v360_v14 = vld [vmem:[%s3867_s28 + $0xb0] sm:$0xff] }
  0x5b   : > { %v1259_v38 = vsel %vm862_vm0, %v805_v30, 0.0  ;;  %v775_v28 = vmul.f32 %v3875_v6, %v507_v19  ;;  %v1147_v19 = vsel %vm862_vm0, %v749_v60, 0.0 }
  0x5c   : > { %957 = vadd.xlane.f32.xlu1 %v956_v31  ;;  %v803_v31 = vmul.f32 %v3875_v6, %v535_v20 }
  0x5d   : > { %953 = vadd.xlane.f32.xlu0 %v952_v34  ;;  %v804_v34 = vmul.f32 %v3871_v5, %v536_v24  ;;  %v1199_v40 = vsel %vm862_vm0, %v775_v28, 0.0  ;;  %v629_v28 = vmul.f32 %v3875_v6, %v361_v8 }
  0x5e   : > { %v1255_v42 = vsel %vm862_vm0, %v803_v31, 0.0 }
  0x5f   : > { %v1260_v45 = vadd.f32 %v1259_v38, %v804_v34  ;;  %v567_v34 = vld [vmem:[%s3867_s28 + $0x728] sm:$0xff]  ;;  %v1203_v38 = vsel %vm862_vm0, %v777_v26, 0.0  ;;  %v907_v47 = vsel %vm862_vm0, %v629_v28, 0.0 }
  0x60   : > { %1077 = vadd.xlane.f32.xlu1 %v1076_v44  ;;  %v355_v44 = vld [vmem:[%s3867_s28 + $0x88] sm:$0xff]  ;;  %v1204_v51 = vadd.f32 %v1203_v38, %v776_v35  ;;  %v661_v35 = vmul.f32 %v3875_v6, %v393_v16  ;;  %v572_v16 = vld [vmem:[%s3867_s28 + $0x750] sm:$0xff] }
  0x61   : > { %1073 = vadd.xlane.f32.xlu0 %v1072_v49  ;;  %v1256_v49 = vadd.f32 %v1255_v42, %v802_v39  ;;  %v623_v53 = vmul.f32 %v3875_v6, %v355_v44  ;;  %v421_v42 = vld [vmem:[%s3867_s28 + $0x298] sm:$0xff]  ;;  %v837_v44 = vmul.f32 %v3875_v6, %v569_v32 }
  0x62   : > { %v689_v54 = vmul.f32 %v3875_v6, %v421_v42  ;;  %v511_v42 = vld [vmem:[%s3867_s28 + $0x568] sm:$0xff] }
  0x63   : > { %v895_v7 = vsel %vm862_vm0, %v623_v53, 0.0  ;;  %v834_v53 = vmul.f32 %v3871_v5, %v566_v41  ;;  %v659_v41 = vmul.f32 %v3875_v6, %v391_v25 }
  0x64   : > { %1197 = vadd.xlane.f32.xlu1 %v1196_v57  ;;  %v1316_v57 = vadd.f32 %v1315_v50, %v832_v46  ;;  %v896_v15 = vadd.f32 %v895_v7, %v622_v59  ;;  %v419_v46 = vld [vmem:[%s3867_s28 + $0x288] sm:$0xff]  ;;  %v418_v50 = vld [vmem:[%s3867_s28 + $0x280] sm:$0xff]  ;;  %v1027_v10 = vsel %vm862_vm0, %v689_v54, 0.0  ;;  %v971_v54 = vsel %vm862_vm0, %v661_v35, 0.0 }
  0x65   : > { %1193 = vadd.xlane.f32.xlu0 %v1192_v62  ;;  %v449_v62 = vld [vmem:[%s3867_s28 + $0x378] sm:$0xff]  ;;  %v687_v59 = vmul.f32 %v3875_v6, %v419_v46  ;;  %v539_v7 = vld [vmem:[%s3867_s28 + $0x648] sm:$0xff] }
  0x66   : > { %v717_v18 = vmul.f32 %v3875_v6, %v449_v62  ;;  %v478_v62 = vld [vmem:[%s3867_s28 + $0x460] sm:$0xff] }
  0x68   : > { %1253 = vadd.xlane.f32.xlu1 %v1252_v9  ;;  %v655_v9 = vmul.f32 %v3875_v6, %v387_v56  ;;  %v1083_v30 = vsel %vm862_vm0, %v717_v18, 0.0  ;;  %v479_v56 = vld [vmem:[%s3867_s28 + $0x468] sm:$0xff]  ;;  %v1023_v18 = vsel %vm862_vm0, %v687_v59, 0.0 }
  0x69   : > { %1249 = vadd.xlane.f32.xlu0 %v1248_v13  ;;  %v448_v13 = vld [vmem:[%s3867_s28 + $0x370] sm:$0xff] }
  0x6a   : > { %v959_v20 = vsel %vm862_vm0, %v655_v9, 0.0  ;;  %v716_v24 = vmul.f32 %v3871_v5, %v448_v13  ;;  %v538_v13 = vld [vmem:[%s3867_s28 + $0x640] sm:$0xff] }
  0x6b   : > { %v960_v29 = vadd.f32 %v959_v20, %v654_v17  ;;  %v747_v20 = vmul.f32 %v3875_v6, %v479_v56  ;;  %v512_v56 = vld [vmem:[%s3867_s28 + $0x570] sm:$0xff] }
  0x6c   : > { %1021 = vadd.xlane.f32.xlu1 %v1020_v21  ;;  %v446_v21 = vld [vmem:[%s3867_s28 + $0x360] sm:$0xff] }
  0x6d   : > { %1017 = vadd.xlane.f32.xlu0 %v1016_v27  ;;  %v506_v27 = vld [vmem:[%s3867_s28 + $0x540] sm:$0xff]  ;;  %v714_v31 = vmul.f32 %v3871_v5, %v446_v21  ;;  %v1143_v38 = vsel %vm862_vm0, %v747_v20, 0.0 }
  0x6e   : > { %v774_v39 = vmul.f32 %v3871_v5, %v506_v27  ;;  %v358_v21 = vld [vmem:[%s3867_s28 + $0xa0] sm:$0xff]  ;;  %v746_v27 = vmul.f32 %v3871_v5, %v478_v62  ;;  %v779_v62 = vmul.f32 %v3875_v6, %v511_v42  ;;  %v4268_v42 = vstv %s4197_s29  ;;  %s5517_s29 = scalar_lea.hbm %s5568_s9, %s3483_s24 }
  0x70   : > { %1141 = vadd.xlane.f32.xlu1 %v1140_v33  ;;  %v1079_v33 = vsel %vm862_vm0, %v715_v22, 0.0  ;;  %v1200_v52 = vadd.f32 %v1199_v40, %v774_v39  ;;  %v392_v22 = vld [vmem:[%s3867_s28 + $0x1b0] sm:$0xff]  ;;  %v806_v39 = vmul.f32 %v3871_v5, %v538_v13  ;;  %v628_v40 = vmul.f32 %v3871_v5, %v360_v14 }
  0x71   : > { %1137 = vadd.xlane.f32.xlu0 %v1136_v37  ;;  %v1084_v37 = vadd.f32 %v1083_v30, %v716_v24  ;;  %v1080_v43 = vadd.f32 %v1079_v33, %v714_v31  ;;  %v807_v24 = vmul.f32 %v3875_v6, %v539_v7  ;;  %v390_v30 = vld [vmem:[%s3867_s28 + $0x1a0] sm:$0xff]  ;;  %v453_v31 = vld [vmem:[%s3867_s28 + $0x398] sm:$0xff]  ;;  %v1148_v33 = vadd.f32 %v1147_v19, %v748_v12 }
  0x72   : > { %v660_v46 = vmul.f32 %v3871_v5, %v392_v22  ;;  %v658_v55 = vmul.f32 %v3871_v5, %v390_v30  ;;  %v570_v22 = vld [vmem:[%s3867_s28 + $0x740] sm:$0xff]  ;;  %v1207_v25 = vsel %vm862_vm0, %v779_v62, 0.0 }
  0x73   : > { %v542_v62 = vld [vmem:[%s3867_s28 + $0x660] sm:$0xff] }
  0x74   : > { %1261 = vadd.xlane.f32.xlu1 %v1260_v45  ;;  %v835_v45 = vmul.f32 %v3875_v6, %v567_v34  ;;  %v808_v34 = vmul.f32 %v3871_v5, %v540_v1  ;;  %v908_v1 = vadd.f32 %v907_v47, %v628_v40  ;;  %v4228_v12 = vadd.f32 %v971_v54, %v660_v46 }
  0x75   : > { %1257 = vadd.xlane.f32.xlu0 %v1256_v49  ;;  %v420_v49 = vld [vmem:[%s3867_s28 + $0x290] sm:$0xff] }
  0x76   : > { %v1319_v58 = vsel %vm862_vm0, %v835_v45, 0.0  ;;  %v626_v45 = vmul.f32 %v3871_v5, %v358_v21 }
  0x77   : > { %v1320_v17 = vadd.f32 %v1319_v58, %v834_v53  ;;  %v1144_v53 = vadd.f32 %v1143_v38, %v746_v27  ;;  %v510_v58 = vld [vmem:[%s3867_s28 + $0x560] sm:$0xff]  ;;  %v424_v27 = vld [vmem:[%s3867_s28 + $0x2b0] sm:$0xff] }
  0x78   : > { %1317 = vadd.xlane.f32.xlu1 %v1316_v57  ;;  %v1323_v57 = vsel %vm862_vm0, %v837_v44, 0.0  ;;  %v1263_v44 = vsel %vm862_vm0, %v807_v24, 0.0  ;;  %v778_v20 = vmul.f32 %v3871_v5, %v510_v58  ;;  %v483_v24 = vld [vmem:[%s3867_s28 + $0x488] sm:$0xff]  ;;  %v482_v38 = vld [vmem:[%s3867_s28 + $0x480] sm:$0xff]  ;;  %v544_v58 = vld [vmem:[%s3867_s28 + $0x670] sm:$0xff] }
  0x79   : > { %1313 = vadd.xlane.f32.xlu0 %v1312_v63  ;;  %v688_v63 = vmul.f32 %v3871_v5, %v420_v49  ;;  %v1324_v9 = vadd.f32 %v1323_v57, %v836_v48  ;;  %v452_v49 = vld [vmem:[%s3867_s28 + $0x390] sm:$0xff]  ;;  %v1264_v60 = vadd.f32 %v1263_v44, %v806_v39  ;;  %v751_v39 = vmul.f32 %v3875_v6, %v483_v24  ;;  %v545_v44 = vld [vmem:[%s3867_s28 + $0x678] sm:$0xff] }
  0x7a   : > { %v720_v8 = vmul.f32 %v3871_v5, %v452_v49  ;;  %v4264_v40 = vadd.f32 %v1207_v25, %v778_v20  ;;  %v543_v49 = vld [vmem:[%s3867_s28 + $0x668] sm:$0xff]  ;;  %v812_v20 = vmul.f32 %v3871_v5, %v544_v58  ;;  %v810_v25 = vmul.f32 %v3871_v5, %v542_v62 }
  0x7b   : > { %v1028_v26 = vadd.f32 %v1027_v10, %v688_v63  ;;  %v573_v63 = vld [vmem:[%s3867_s28 + $0x758] sm:$0xff]  ;;  %v571_v10 = vld [vmem:[%s3867_s28 + $0x748] sm:$0xff] }
  0x7c   : > { %901 = vadd.xlane.f32.xlu1 %v900_v11  ;;  %v686_v11 = vmul.f32 %v3871_v5, %v418_v50  ;;  %v721_v50 = vmul.f32 %v3875_v6, %v453_v31  ;;  %v841_v21 = vmul.f32 %v3875_v6, %v573_v63  ;;  %v811_v63 = vmul.f32 %v3875_v6, %v543_v49  ;;  %v514_v49 = vld [vmem:[%s3867_s28 + $0x580] sm:$0xff] }
  0x7d   : > { %897 = vadd.xlane.f32.xlu0 %v896_v15  ;;  %v359_v15 = vld [vmem:[%s3867_s28 + $0xa8] sm:$0xff] }
  0x7e   : > { %v1024_v32 = vadd.f32 %v1023_v18, %v686_v11  ;;  %v425_v11 = vld [vmem:[%s3867_s28 + $0x2b8] sm:$0xff]  ;;  %v1091_v13 = vsel %vm862_vm0, %v721_v50, 0.0 }
  0x7f   : > { %v693_v28 = vmul.f32 %v3875_v6, %v425_v11  ;;  %v4250_v30 = vadd.f32 %v1091_v13, %v720_v8  ;;  %v365_v50 = vld [vmem:[%s3867_s28 + $0xd8] sm:$0xff]  ;;  %v364_v8 = vld [vmem:[%s3867_s28 + $0xd0] sm:$0xff] }
  0x80   : > { %965 = vadd.xlane.f32.xlu1 %v964_v23  ;;  %v809_v23 = vmul.f32 %v3875_v6, %v541_v61  ;;  %v967_v61 = vsel %vm862_vm0, %v659_v41, 0.0  ;;  %v1331_v41 = vsel %vm862_vm0, %v841_v21, 0.0  ;;  %v362_v21 = vld [vmem:[%s3867_s28 + $0xc0] sm:$0xff] }
  0x81   : > { %961 = vadd.xlane.f32.xlu0 %v960_v29  ;;  %v627_v29 = vmul.f32 %v3875_v6, %v359_v15  ;;  %v780_v15 = vmul.f32 %v3871_v5, %v512_v56  ;;  %v4235_v18 = vadd.f32 %v967_v61, %v658_v55  ;;  %v1035_v46 = vsel %vm862_vm0, %v693_v28, 0.0  ;;  %v396_v28 = vld [vmem:[%s3867_s28 + $0x1d0] sm:$0xff] }
  0x83   : > { %v903_v48 = vsel %vm862_vm0, %v627_v29, 0.0  ;;  %v4248_v29 = vand.u32 127, %v596_v0 }
  0x84   : > { %1085 = vadd.xlane.f32.xlu1 %v1084_v37  ;;  %v513_v37 = vld [vmem:[%s3867_s28 + $0x578] sm:$0xff]  ;;  %v4222_v7 = vadd.f32 %v903_v48, %v626_v45 }
  0x85   : > { %1081 = vadd.xlane.f32.xlu0 %v1080_v43  ;;  %v1267_v43 = vsel %vm862_vm0, %v809_v23, 0.0  ;;  %v781_v57 = vmul.f32 %v3875_v6, %v513_v37  ;;  %v485_v23 = vld [vmem:[%s3867_s28 + $0x498] sm:$0xff]  ;;  %v484_v37 = vld [vmem:[%s3867_s28 + $0x490] sm:$0xff]  ;;  %v1949_v48 = vadd.s32 4294967288, %v4248_v29  ;;  %v1956_v54 = vadd.s32 4294967280, %v4248_v29 }
  0x86   : > { %v1268_v59 = vadd.f32 %v1267_v43, %v808_v34  ;;  %v753_v0 = vmul.f32 %v3875_v6, %v485_v23  ;;  %v692_v43 = vmul.f32 %v3871_v5, %v424_v27  ;;  %v455_v23 = vld [vmem:[%s3867_s28 + $0x3a8] sm:$0xff] }
  0x87   : > { %v1211_v19 = vsel %vm862_vm0, %v781_v57, 0.0  ;;  %v1151_v57 = vsel %vm862_vm0, %v751_v39, 0.0  ;;  %v4305_v13 = vsub.s32 %v1949_v48, %v3860_v2  ;;  %v516_v48 = vld [vmem:[%s3867_s28 + $0x590] sm:$0xff] }
  0x88   : > { %1205 = vadd.xlane.f32.xlu1 %v1204_v51  ;;  %v450_v51 = vld [vmem:[%s3867_s28 + $0x380] sm:$0xff]  ;;  %v4257_v35 = vadd.f32 %v1211_v19, %v780_v15  ;;  %v1155_v56 = vsel %vm862_vm0, %v753_v0, 0.0  ;;  %v4290_v61 = vadd.f32 %v1035_v46, %v692_v43  ;;  %v397_v15 = vld [vmem:[%s3867_s28 + $0x1d8] sm:$0xff] }
  0x89   : > { %1201 = vadd.xlane.f32.xlu0 %v1200_v52  ;;  %v719_v52 = vmul.f32 %v3875_v6, %v451_v36  ;;  %v838_v36 = vmul.f32 %v3871_v5, %v570_v22  ;;  %v457_v22 = vld [vmem:[%s3867_s28 + $0x3b8] sm:$0xff]  ;;  %v394_v0 = vld [vmem:[%s3867_s28 + $0x1c0] sm:$0xff] }
  0x8a   : > { %v725_v43 = vmul.f32 %v3875_v6, %v457_v22 }
  0x8b   : > { %v1087_v14 = vsel %vm862_vm0, %v719_v52, 0.0  ;;  %v752_v52 = vmul.f32 %v3871_v5, %v484_v37  ;;  %v665_v37 = vmul.f32 %v3875_v6, %v397_v15 }
  0x8c   : > { %1325 = vadd.xlane.f32.xlu1 %v1324_v9  ;;  %v718_v9 = vmul.f32 %v3871_v5, %v450_v51 }
  0x8d   : > { %1321 = vadd.xlane.f32.xlu0 %v1320_v17  ;;  %v423_v17 = vld [vmem:[%s3867_s28 + $0x2a8] sm:$0xff]  ;;  %v979_v58 = vsel %vm862_vm0, %v665_v37, 0.0 }
  0x8e   : > { %v4252_v31 = vadd.f32 %v1087_v14, %v718_v9  ;;  %v691_v34 = vmul.f32 %v3875_v6, %v423_v17  ;;  %v633_v9 = vmul.f32 %v3875_v6, %v365_v50  ;;  %v1963_v14 = vadd.s32 4294967272, %v4248_v29 }
  0x8f   : > { %v4310_v17 = vadd.f32 %v1155_v56, %v752_v52  ;;  %v577_v56 = vld [vmem:[%s3867_s28 + $0x778] sm:$0xff] }
  0x90   : > { %1029 = vadd.xlane.f32.xlu1 %v1028_v26  ;;  %v839_v26 = vmul.f32 %v3875_v6, %v571_v10  ;;  %v1031_v51 = vsel %vm862_vm0, %v691_v34, 0.0  ;;  %v363_v10 = vld [vmem:[%s3867_s28 + $0xc8] sm:$0xff]  ;;  %v1271_v34 = vsel %vm862_vm0, %v811_v63, 0.0  ;;  %v4336_v39 = vsub.s32 %v1963_v14, %v3860_v2  ;;  %v429_v14 = vld [vmem:[%s3867_s28 + $0x2d8] sm:$0xff] }
  0x91   : > { %1025 = vadd.xlane.f32.xlu0 %v1024_v32  ;;  %v840_v32 = vmul.f32 %v3871_v5, %v572_v16  ;;  %v395_v16 = vld [vmem:[%s3867_s28 + $0x1c8] sm:$0xff]  ;;  %v631_v27 = vmul.f32 %v3875_v6, %v363_v10  ;;  %v784_v10 = vmul.f32 %v3871_v5, %v516_v48  ;;  %v697_v37 = vmul.f32 %v3875_v6, %v429_v14 }
  0x92   : > { %v1327_v45 = vsel %vm862_vm0, %v839_v26, 0.0  ;;  %v632_v26 = vmul.f32 %v3871_v5, %v364_v8  ;;  %v1099_v8 = vsel %vm862_vm0, %v725_v43, 0.0 }
  0x93   : > { %v4282_v55 = vadd.f32 %v1331_v41, %v840_v32  ;;  %v517_v32 = vld [vmem:[%s3867_s28 + $0x598] sm:$0xff]  ;;  %v630_v41 = vmul.f32 %v3871_v5, %v362_v21  ;;  %v574_v21 = vld [vmem:[%s3867_s28 + $0x760] sm:$0xff] }
  0x94   : > { %1149 = vadd.xlane.f32.xlu1 %v1148_v33  ;;  %v422_v33 = vld [vmem:[%s3867_s28 + $0x2a0] sm:$0xff]  ;;  %v842_v43 = vmul.f32 %v3871_v5, %v574_v21 }
  0x95   : > { %1145 = vadd.xlane.f32.xlu0 %v1144_v53  ;;  %v690_v47 = vmul.f32 %v3871_v5, %v422_v33  ;;  %v750_v53 = vmul.f32 %v3871_v5, %v482_v38  ;;  %v515_v33 = vld [vmem:[%s3867_s28 + $0x588] sm:$0xff]  ;;  %v663_v38 = vmul.f32 %v3875_v6, %v395_v16 }
  0x96   : > { %v783_v50 = vmul.f32 %v3875_v6, %v515_v33 }
  0x97   : > { %v4298_v11 = vadd.f32 %v1031_v51, %v690_v47  ;;  %v4312_v19 = vadd.f32 %v1151_v57, %v750_v53  ;;  %v664_v47 = vmul.f32 %v3871_v5, %v396_v28  ;;  %v4350_v51 = vadd.f32 %v1271_v34, %v810_v25  ;;  %v575_v57 = vld [vmem:[%s3867_s28 + $0x768] sm:$0xff]  ;;  %v489_v28 = vld [vmem:[%s3867_s28 + $0x4b8] sm:$0xff] }
  0x98   : > { %1269 = vadd.xlane.f32.xlu1 %v1268_v59  ;;  %v813_v59 = vmul.f32 %v3875_v6, %v545_v44  ;;  %v454_v44 = vld [vmem:[%s3867_s28 + $0x3a0] sm:$0xff]  ;;  %v911_v53 = vsel %vm862_vm0, %v631_v27, 0.0  ;;  %v1215_v16 = vsel %vm862_vm0, %v783_v50, 0.0  ;;  %v843_v22 = vmul.f32 %v3875_v6, %v575_v57  ;;  %v427_v27 = vld [vmem:[%s3867_s28 + $0x2c8] sm:$0xff]  ;;  %v369_v50 = vld [vmem:[%s3867_s28 + $0xf8] sm:$0xff] }
  0x99   : > { %1265 = vadd.xlane.f32.xlu0 %v1264_v60  ;;  %v4288_v60 = vadd.f32 %v1327_v45, %v838_v36  ;;  %v915_v36 = vsel %vm862_vm0, %v633_v9, 0.0  ;;  %v723_v45 = vmul.f32 %v3875_v6, %v455_v23  ;;  %v722_v63 = vmul.f32 %v3871_v5, %v454_v44  ;;  %v426_v44 = vld [vmem:[%s3867_s28 + $0x2c0] sm:$0xff] }
  0x9a   : > { %v1275_v24 = vsel %vm862_vm0, %v813_v59, 0.0  ;;  %v4352_v52 = vadd.f32 %v915_v36, %v632_v26  ;;  %v975_v59 = vsel %vm862_vm0, %v663_v38, 0.0  ;;  %v4375_v23 = vadd.f32 %v911_v53, %v630_v41  ;;  %v428_v36 = vld [vmem:[%s3867_s28 + $0x2d0] sm:$0xff]  ;;  %v549_v38 = vld [vmem:[%s3867_s28 + $0x698] sm:$0xff] }
  0x9b   : > { %v4343_v46 = vadd.f32 %v1275_v24, %v812_v20  ;;  %v1095_v9 = vsel %vm862_vm0, %v723_v45, 0.0  ;;  %v576_v20 = vld [vmem:[%s3867_s28 + $0x770] sm:$0xff]  ;;  %v4377_v24 = vadd.f32 %v979_v58, %v664_v47  ;;  %v1970_v26 = vadd.s32 4294967264, %v4248_v29  ;;  %v547_v45 = vld [vmem:[%s3867_s28 + $0x688] sm:$0xff] }
  0x9c   : > { %909 = vadd.xlane.f32.xlu1 %v908_v1  ;;  %v4302_v1 = vsub.s32 %v4248_v29, %v3860_v2  ;;  %v4387_v33 = vadd.f32 %v1095_v9, %v722_v63  ;;  %v1977_v34 = vadd.s32 4294967256, %v4248_v29  ;;  %v1335_v48 = vsel %vm862_vm0, %v843_v22, 0.0  ;;  %v548_v58 = vld [vmem:[%s3867_s28 + $0x690] sm:$0xff]  ;;  %v546_v9 = vld [vmem:[%s3867_s28 + $0x680] sm:$0xff] }
  0x9d   : > { %905 = vadd.xlane.f32.xlu0 %v4222_v7  ;;  %v4315_v7 = vsub.s32 %v1956_v54, %v3860_v2  ;;  %v662_v54 = vmul.f32 %v3871_v5, %v394_v0  ;;  %v487_v0 = vld [vmem:[%s3867_s28 + $0x4a8] sm:$0xff]  ;;  %v4410_v53 = vsub.s32 %v1970_v26, %v3860_v2  ;;  %v1043_v63 = vsel %vm862_vm0, %v697_v37, 0.0 }
  0x9e   : > { %v755_v57 = vmul.f32 %v3875_v6, %v487_v0  ;;  %v814_v37 = vmul.f32 %v3871_v5, %v546_v9  ;;  %v366_v0 = vld [vmem:[%s3867_s28 + $0xe0] sm:$0xff] }
  0x9f   : > { %v4379_v25 = vadd.f32 %v975_v59, %v662_v54  ;;  %v696_v54 = vmul.f32 %v3871_v5, %v428_v36  ;;  %v817_v59 = vmul.f32 %v3875_v6, %v549_v38 }
  0xa0   : > { %973 = vadd.xlane.f32.xlu1 %v4228_v12  ;;  %v456_v12 = vld [vmem:[%s3867_s28 + $0x3b0] sm:$0xff] }
  0xa1   : > { %969 = vadd.xlane.f32.xlu0 %v4235_v18  ;;  %v785_v18 = vmul.f32 %v3875_v6, %v517_v32  ;;  %v724_v62 = vmul.f32 %v3871_v5, %v456_v12  ;;  %v844_v12 = vmul.f32 %v3871_v5, %v576_v20  ;;  %v637_v20 = vmul.f32 %v3875_v6, %v369_v50 }
  0xa2   : > { %v1283_v36 = vsel %vm862_vm0, %v817_v59, 0.0  ;;  %v400_v59 = vld [vmem:[%s3867_s28 + $0x1f0] sm:$0xff] }
  0xa3   : > { %v1219_v15 = vsel %vm862_vm0, %v785_v18, 0.0  ;;  %v4385_v32 = vadd.f32 %v1099_v8, %v724_v62  ;;  %v695_v18 = vmul.f32 %v3875_v6, %v427_v27  ;;  %v4419_v62 = vsub.s32 %v1977_v34, %v3860_v2 }
  0xa4   : > { %1093 = vadd.xlane.f32.xlu1 %v4250_v30  ;;  %v782_v30 = vmul.f32 %v3871_v5, %v514_v49  ;;  %v4395_v41 = vadd.f32 %v1219_v15, %v784_v10  ;;  %v488_v49 = vld [vmem:[%s3867_s28 + $0x4b0] sm:$0xff]  ;;  %v694_v8 = vmul.f32 %v3871_v5, %v426_v44  ;;  %v815_v10 = vmul.f32 %v3875_v6, %v547_v45  ;;  %v401_v45 = vld [vmem:[%s3867_s28 + $0x1f8] sm:$0xff] }
  0xa5   : > { %1089 = vadd.xlane.f32.xlu0 %v4252_v31  ;;  %v845_v31 = vmul.f32 %v3875_v6, %v577_v56  ;;  %v486_v56 = vld [vmem:[%s3867_s28 + $0x4a0] sm:$0xff]  ;;  %v4428_v15 = vadd.f32 %v1335_v48, %v842_v43  ;;  %v1039_v22 = vsel %vm862_vm0, %v695_v18, 0.0  ;;  %v816_v27 = vmul.f32 %v3871_v5, %v548_v58 }
  0xa6   : > { %v1159_v34 = vsel %vm862_vm0, %v755_v57, 0.0  ;;  %v634_v58 = vmul.f32 %v3871_v5, %v366_v0 }
  0xa7   : > { %v1339_v47 = vsel %vm862_vm0, %v845_v31, 0.0  ;;  %v367_v31 = vld [vmem:[%s3867_s28 + $0xe8] sm:$0xff]  ;;  %v4461_v57 = vadd.f32 %v1283_v36, %v816_v27  ;;  %v668_v27 = vmul.f32 %v3871_v5, %v400_v59  ;;  %v460_v36 = vld [vmem:[%s3867_s28 + $0x3d0] sm:$0xff] }
  0xa8   : > { %1213 = vadd.xlane.f32.xlu1 %v4257_v35  ;;  %v4397_v35 = vadd.f32 %v1215_v16, %v782_v30  ;;  %v4426_v14 = vadd.f32 %v1339_v47, %v844_v12  ;;  %v368_v16 = vld [vmem:[%s3867_s28 + $0xf0] sm:$0xff]  ;;  %v1279_v12 = vsel %vm862_vm0, %v815_v10, 0.0  ;;  %v635_v44 = vmul.f32 %v3875_v6, %v367_v31  ;;  %v399_v47 = vld [vmem:[%s3867_s28 + $0x1e8] sm:$0xff] }
  0xa9   : > { %1209 = vadd.xlane.f32.xlu0 %v4264_v40  ;;  %v757_v40 = vmul.f32 %v3875_v6, %v489_v28  ;;  %v4438_v28 = vadd.f32 %v1043_v63, %v696_v54  ;;  %v636_v43 = vmul.f32 %v3871_v5, %v368_v16  ;;  %v4467_v9 = vadd.f32 %v1279_v12, %v814_v37  ;;  %v458_v37 = vld [vmem:[%s3867_s28 + $0x3c0] sm:$0xff] }
  0xaa   : > { %v667_v10 = vmul.f32 %v3875_v6, %v399_v47 }
  0xab   : > { %v1163_v26 = vsel %vm862_vm0, %v757_v40, 0.0  ;;  %v923_v40 = vsel %vm862_vm0, %v637_v20, 0.0 }
  0xac   : > { %1333 = vadd.xlane.f32.xlu1 %v4282_v55  ;;  %v756_v55 = vmul.f32 %v3871_v5, %v488_v49  ;;  %v4453_v49 = vadd.f32 %v1039_v22, %v694_v8  ;;  %v669_v8 = vmul.f32 %v3875_v6, %v401_v45  ;;  %v4474_v31 = vadd.f32 %v923_v40, %v636_v43 }
  0xad   : > { %1329 = vadd.xlane.f32.xlu0 %v4288_v60  ;;  %v930_v30 = vpop.xlane.xlu1 %929  ;;  %v754_v60 = vmul.f32 %v3871_v5, %v486_v56  ;;  %v983_v47 = vsel %vm862_vm0, %v667_v10, 0.0  ;;  %v728_v40 = vmul.f32 %v3871_v5, %v460_v36 }
  0xae   : > { %v866_v21 = vpop.xlane.xlu0 %865  ;;  %v1393_v38 = vadd.f32 %v4268_v42, %v930_v30  ;;  %v461_v30 = vld [vmem:[%s3867_s28 + $0x3d8] sm:$0xff]  ;;  %v987_v45 = vsel %vm862_vm0, %v669_v8, 0.0 }
  0xaf   : > { %v1377_v48 = vadd.f32 %v4268_v42, %v866_v21  ;;  %v4459_v56 = vadd.f32 %v1159_v34, %v754_v60  ;;  %v919_v21 = vsel %vm862_vm0, %v635_v44, 0.0  ;;  %v729_v12 = vmul.f32 %v3875_v6, %v461_v30 }
  0xb0   : > { %1037 = vadd.xlane.f32.xlu1 %v4290_v61  ;;  %v4455_v61 = vadd.f32 %v1163_v26, %v756_v55  ;;  %v459_v55 = vld [vmem:[%s3867_s28 + $0x3c8] sm:$0xff]  ;;  %v1521_v16 = vmax.f32 %v1393_v38, 0.0  ;;  %v1984_v30 = vadd.s32 4294967248, %v4248_v29 }
  0xb1   : > { %1033 = vadd.xlane.f32.xlu0 %v4298_v11  ;;  %v934_v18 = vpop.xlane.xlu1 %933  ;;  %v398_v11 = vld [vmem:[%s3867_s28 + $0x1e0] sm:$0xff]  ;;  %v1505_v22 = vmax.f32 %v1377_v48, 0.0  ;;  %v727_v43 = vmul.f32 %v3875_v6, %v459_v55  ;;  %v4496_v55 = vadd.f32 %v987_v45, %v668_v27 }
  0xb2   : > { %v1394_v50 = vadd.f32 %v4268_v42, %v934_v18  ;;  %v870_v54 = vpop.xlane.xlu0 %869  ;;  %v666_v34 = vmul.f32 %v3871_v5, %v398_v11  ;;  %v4489_v18 = vadd.f32 %v919_v21, %v634_v58  ;;  %v1107_v58 = vsel %vm862_vm0, %v729_v12, 0.0 }
  0xb3   : > { %v1378_v63 = vadd.f32 %v4268_v42, %v870_v54 }
  0xb4   : > { %v1522_v20 = vmax.f32 %v1394_v50, 0.0  ;;  %1157 = vadd.xlane.f32.xlu1 %v4310_v17  ;;  %v726_v50 = vmul.f32 %v3871_v5, %v458_v37 }
  0xb5   : > { %v1506_v26 = vmax.f32 %v1378_v63, 0.0  ;;  %1153 = vadd.xlane.f32.xlu0 %v4312_v19  ;;  %v878_v60 = vpop.xlane.xlu1 %877 }
  0xb6   : > { %v1641_v0 = vpack.c.bf16 %v1522_v20, %v1521_v16  ;;  %v1380_v38 = vadd.f32 %v4268_v42, %v878_v60  ;;  %v874_v17 = vpop.xlane.xlu0 %873 }
  0xb7   : > { %v1633_v44 = vpack.c.bf16 %v1506_v26, %v1505_v22  ;;  %v1379_v19 = vadd.f32 %v4268_v42, %v874_v17  ;;  %v1103_v22 = vsel %vm862_vm0, %v727_v43, 0.0  ;;  %v4507_v17 = vadd.f32 %v1107_v58, %v728_v40  ;;  %v521_v40 = vld [vmem:[%s3867_s28 + $0x5b8] sm:$0xff] }
  0xb8   : > { %v1508_v48 = vmax.f32 %v1380_v38, 0.0  ;;  %1277 = vadd.xlane.f32.xlu1 %v4343_v46  ;;  %v4498_v46 = vadd.f32 %v983_v47, %v666_v34  ;;  %v1831_v16 = vunpack.c.l.b16 %v1641_v0  ;;  %v1832_v26 = vunpack.c.h.b16 %v1641_v0 }
  0xb9   : > { %v1815_v54 = vunpack.c.l.b16 %v1633_v44  ;;  %v1816_v59 = vunpack.c.h.b16 %v1633_v44  ;;  %v1507_v11 = vmax.f32 %v1379_v19, 0.0  ;;  %1273 = vadd.xlane.f32.xlu0 %v4350_v51  ;;  %v942_v63 = vpop.xlane.xlu1 %941  ;;  %v4510_v43 = vadd.f32 %v1103_v22, %v726_v50 }
  0xba   : > { %v1396_v8 = vadd.f32 %v4268_v42, %v942_v63  ;;  %v938_v10 = vpop.xlane.xlu0 %937  ;;  %v4513_v44 = vsub.s32 %v1984_v30, %v3860_v2  ;;  %v2061_v50 = vrot.slane %v1832_v26, %v4305_v13  ;;  %v789_v26 = vmul.f32 %v3875_v6, %v521_v40 }
  0xbb   : > { %v1634_v20 = vpack.c.bf16 %v1508_v48, %v1507_v11  ;;  %v1395_v21 = vadd.f32 %v4268_v42, %v938_v10  ;;  %v1948_v51 = vrot.slane %v1815_v54, %v4302_v1  ;;  %v1953_v60 = vrot.slane %v1816_v59, %v4305_v13  ;;  %v520_v48 = vld [vmem:[%s3867_s28 + $0x5b0] sm:$0xff] }
  0xbc   : > { %v1524_v36 = vmax.f32 %v1396_v8, 0.0  ;;  %917 = vadd.xlane.f32.xlu1 %v4352_v52  ;;  %v1991_v52 = vadd.s32 4294967240, %v4248_v29  ;;  %v2057_v54 = vrot.slane %v1831_v16, %v4302_v1 }
  0xbd   : > { %v1817_v27 = vunpack.c.l.b16 %v1634_v20  ;;  %v1818_v34 = vunpack.c.h.b16 %v1634_v20  ;;  %v1523_v37 = vmax.f32 %v1395_v21, 0.0  ;;  %913 = vadd.xlane.f32.xlu0 %v4375_v23  ;;  %v998_v38 = vpop.xlane.xlu1 %997  ;;  %v1955_v59 = vsel %vm1954_vm1, %v1953_v60, %v1948_v51  ;;  %v518_v20 = vld [vmem:[%s3867_s28 + $0x5a0] sm:$0xff] }
  0xbe   : > { %v1410_v12 = vadd.f32 %v4268_v42, %v998_v38  ;;  %v994_v0 = vpop.xlane.xlu0 %993 }
  0xbf   : > { %v1960_v19 = vrot.slane %v1817_v27, %v4315_v7  ;;  %v1967_v45 = vrot.slane %v1818_v34, %v4336_v39  ;;  %v1642_v47 = vpack.c.bf16 %v1524_v36, %v1523_v37  ;;  %v1409_v23 = vadd.f32 %v4268_v42, %v994_v0  ;;  %v519_v27 = vld [vmem:[%s3867_s28 + $0x5a8] sm:$0xff]  ;;  %v580_v34 = vld [vmem:[%s3867_s28 + $0x790] sm:$0xff] }
  0xc0   : > { %v1538_v11 = vmax.f32 %v1410_v12, 0.0  ;;  %981 = vadd.xlane.f32.xlu1 %v4377_v24  ;;  %v788_v24 = vmul.f32 %v3871_v5, %v520_v48  ;;  %v2062_v37 = vsel %vm1954_vm1, %v2061_v50, %v2057_v54  ;;  %v4542_v12 = vsub.s32 %v1991_v52, %v3860_v2  ;;  %v579_v54 = vld [vmem:[%s3867_s28 + $0x788] sm:$0xff] }
  0xc1   : > { %v1962_v63 = vsel %vm1961_vm2, %v1960_v19, %v1955_v59  ;;  %v1833_v30 = vunpack.c.l.b16 %v1642_v47  ;;  %v1834_v8 = vunpack.c.h.b16 %v1642_v47  ;;  %v1537_v10 = vmax.f32 %v1409_v23, 0.0  ;;  %977 = vadd.xlane.f32.xlu0 %v4379_v25  ;;  %v1006_v58 = vpop.xlane.xlu1 %1005  ;;  %v581_v19 = vld [vmem:[%s3867_s28 + $0x798] sm:$0xff] }
  0xc2   : > { %v4529_v16 = vsel %vm1968_vm3, %v1967_v45, %v1962_v63  ;;  %v1412_v21 = vadd.f32 %v4268_v42, %v1006_v58  ;;  %v1002_v22 = vpop.xlane.xlu0 %1001  ;;  %v786_v0 = vmul.f32 %v3871_v5, %v518_v20  ;;  %v787_v59 = vmul.f32 %v3875_v6, %v519_v27  ;;  %v433_v63 = vld [vmem:[%s3867_s28 + $0x2f8] sm:$0xff]  ;;  %v578_v58 = vld [vmem:[%s3867_s28 + $0x780] sm:$0xff]  ;;  %v432_v20 = vld [vmem:[%s3867_s28 + $0x2f0] sm:$0xff] }
  0xc3   : > { %v2066_v51 = vrot.slane %v1833_v30, %v4315_v7  ;;  %v2071_v60 = vrot.slane %v1834_v8, %v4336_v39  ;;  %v1649_v36 = vpack.c.bf16 %v1538_v11, %v1537_v10  ;;  %v1411_v25 = vadd.f32 %v4268_v42, %v1002_v22 }
  0xc4   : > { %v1540_v38 = vmax.f32 %v1412_v21, 0.0  ;;  %1101 = vadd.xlane.f32.xlu1 %v4385_v32  ;;  %v848_v11 = vmul.f32 %v3871_v5, %v580_v34  ;;  %v1227_v10 = vsel %vm862_vm0, %v789_v26, 0.0  ;;  %v701_v34 = vmul.f32 %v3875_v6, %v433_v63  ;;  %v430_v63 = vld [vmem:[%s3867_s28 + $0x2e0] sm:$0xff] }
  0xc5   : > { %v2067_v45 = vsel %vm1961_vm2, %v2066_v51, %v2062_v37  ;;  %v1847_v47 = vunpack.c.l.b16 %v1649_v36  ;;  %v1848_v23 = vunpack.c.h.b16 %v1649_v36  ;;  %v1539_v48 = vmax.f32 %v1411_v25, 0.0  ;;  %1097 = vadd.xlane.f32.xlu0 %v4387_v33  ;;  %v1062_v40 = vpop.xlane.xlu1 %1061 }
  0xc6   : > { %v4550_v32 = vsel %vm1968_vm3, %v2071_v60, %v2067_v45  ;;  %v1426_v52 = vadd.f32 %v4268_v42, %v1062_v40  ;;  %v1058_v50 = vpop.xlane.xlu0 %1057  ;;  %v849_v33 = vmul.f32 %v3875_v6, %v581_v19  ;;  %v847_v60 = vmul.f32 %v3875_v6, %v579_v54  ;;  %v431_v40 = vld [vmem:[%s3867_s28 + $0x2e8] sm:$0xff] }
  0xc7   : > { %v1650_v30 = vpack.c.bf16 %v1540_v38, %v1539_v48  ;;  %v1425_v8 = vadd.f32 %v4268_v42, %v1058_v50  ;;  %v2136_v21 = vrot.slane %v1847_v47, %v4302_v1  ;;  %v2140_v22 = vrot.slane %v1848_v23, %v4305_v13 }
  0xc8   : > { %v1554_v51 = vmax.f32 %v1426_v52, 0.0  ;;  %1221 = vadd.xlane.f32.xlu1 %v4395_v41  ;;  %v1223_v19 = vsel %vm862_vm0, %v787_v59, 0.0  ;;  %v846_v41 = vmul.f32 %v3871_v5, %v578_v58  ;;  %v700_v45 = vmul.f32 %v3871_v5, %v432_v20 }
  0xc9   : > { %v1849_v36 = vunpack.c.l.b16 %v1650_v30  ;;  %v1850_v25 = vunpack.c.h.b16 %v1650_v30  ;;  %v1553_v27 = vmax.f32 %v1425_v8, 0.0  ;;  %1217 = vadd.xlane.f32.xlu0 %v4397_v35  ;;  %v886_v26 = vpop.xlane.xlu1 %885  ;;  %v2141_v54 = vsel %vm1954_vm1, %v2140_v22, %v2136_v21  ;;  %v492_v22 = vld [vmem:[%s3867_s28 + $0x4d0] sm:$0xff] }
  0xca   : > { %v1382_v37 = vadd.f32 %v4268_v42, %v886_v26  ;;  %v882_v38 = vpop.xlane.xlu0 %881  ;;  %v4579_v50 = vadd.f32 %v1227_v10, %v788_v24  ;;  %v1347_v59 = vsel %vm862_vm0, %v849_v33, 0.0  ;;  %v1343_v20 = vsel %vm862_vm0, %v847_v60, 0.0  ;;  %v490_v26 = vld [vmem:[%s3867_s28 + $0x4c0] sm:$0xff] }
  0xcb   : > { %v2145_v47 = vrot.slane %v1849_v36, %v4315_v7  ;;  %v2150_v23 = vrot.slane %v1850_v25, %v4336_v39  ;;  %v4573_v48 = vpack.c.bf16 %v1554_v51, %v1553_v27  ;;  %v1381_v35 = vadd.f32 %v4268_v42, %v882_v38  ;;  %v493_v36 = vld [vmem:[%s3867_s28 + $0x4d8] sm:$0xff] }
  0xcc   : > { %v1510_v52 = vmax.f32 %v1382_v37, 0.0  ;;  %1341 = vadd.xlane.f32.xlu1 %v4426_v14  ;;  %v1051_v21 = vsel %vm862_vm0, %v701_v34, 0.0  ;;  %v4592_v33 = vadd.f32 %v1223_v19, %v786_v0  ;;  %v699_v51 = vmul.f32 %v3875_v6, %v431_v40  ;;  %v491_v34 = vld [vmem:[%s3867_s28 + $0x4c8] sm:$0xff] }
  0xcd   : > { %v2146_v30 = vsel %vm1961_vm2, %v2145_v47, %v2141_v54  ;;  %v1509_v8 = vmax.f32 %v1381_v35, 0.0  ;;  %1337 = vadd.xlane.f32.xlu0 %v4428_v15  ;;  %v950_v58 = vpop.xlane.xlu1 %949  ;;  %v4597_v27 = vadd.f32 %v1347_v59, %v848_v11  ;;  %v4600_v60 = vmul.f32 %v3871_v5, %v430_v63  ;;  %v552_v54 = vld [vmem:[%s3867_s28 + $0x6b0] sm:$0xff] }
  0xce   : > { %v4589_v14 = vsel %vm1968_vm3, %v2150_v23, %v2146_v30  ;;  %v1398_v24 = vadd.f32 %v4268_v42, %v950_v58  ;;  %v946_v10 = vpop.xlane.xlu0 %945  ;;  %v4605_v38 = vadd.f32 %v1343_v20, %v846_v41  ;;  %v4607_v0 = vadd.f32 %v1051_v21, %v700_v45  ;;  %v553_v58 = vld [vmem:[%s3867_s28 + $0x6b8] sm:$0xff]  ;;  %v550_v20 = vld [vmem:[%s3867_s28 + $0x6a0] sm:$0xff] }
  0xcf   : > { %v1635_v25 = vpack.c.bf16 %v1510_v52, %v1509_v8  ;;  %v1397_v15 = vadd.f32 %v4268_v42, %v946_v10  ;;  %v4610_v19 = vmul.f32 %v3871_v5, %v492_v22  ;;  %v761_v40 = vmul.f32 %v3875_v6, %v493_v36 }
  0xd0   : > { %v1526_v37 = vmax.f32 %v1398_v24, 0.0  ;;  %1045 = vadd.xlane.f32.xlu1 %v4438_v28  ;;  %v1047_v45 = vsel %vm862_vm0, %v699_v51, 0.0  ;;  %v758_v52 = vmul.f32 %v3871_v5, %v490_v26  ;;  %v759_v59 = vmul.f32 %v3875_v6, %v491_v34 }
  0xd1   : > { %v1819_v47 = vunpack.c.l.b16 %v1635_v25  ;;  %v1820_v23 = vunpack.c.h.b16 %v1635_v25  ;;  %v1525_v11 = vmax.f32 %v1397_v15, 0.0  ;;  %1041 = vadd.xlane.f32.xlu0 %v4453_v49  ;;  %v1070_v35 = vpop.xlane.xlu1 %1069  ;;  %v1863_v21 = vunpack.c.l.b16 %v4573_v48 }
  0xd2   : > { %v1428_v28 = vadd.f32 %v4268_v42, %v1070_v35  ;;  %v1066_v41 = vpop.xlane.xlu0 %1065  ;;  %v1864_v22 = vunpack.c.h.b16 %v4573_v48  ;;  %v820_v10 = vmul.f32 %v3871_v5, %v552_v54  ;;  %v551_v54 = vld [vmem:[%s3867_s28 + $0x6a8] sm:$0xff] }
  0xd3   : > { %v1974_v63 = vrot.slane %v1819_v47, %v4410_v53  ;;  %v1981_v30 = vrot.slane %v1820_v23, %v4419_v62  ;;  %v1643_v8 = vpack.c.bf16 %v1526_v37, %v1525_v11  ;;  %v1427_v49 = vadd.f32 %v4268_v42, %v1066_v41 }
  0xd4   : > { %v1556_v24 = vmax.f32 %v1428_v28, 0.0  ;;  %1165 = vadd.xlane.f32.xlu1 %v4455_v61  ;;  %v821_v61 = vmul.f32 %v3875_v6, %v553_v58  ;;  %v818_v47 = vmul.f32 %v3871_v5, %v550_v20  ;;  %v2219_v28 = vrot.slane %v1864_v22, %v4305_v13 }
  0xd5   : > { %v1976_v51 = vsel %vm1975_vm4, %v1974_v63, %v4529_v16  ;;  %v1835_v36 = vunpack.c.l.b16 %v1643_v8  ;;  %v1836_v25 = vunpack.c.h.b16 %v1643_v8  ;;  %v1555_v15 = vmax.f32 %v1427_v49, 0.0  ;;  %1161 = vadd.xlane.f32.xlu0 %v4459_v56  ;;  %v1126_v26 = vpop.xlane.xlu1 %1125 }
  0xd6   : > { %v4632_v34 = vsel %vm1982_vm5, %v1981_v30, %v1976_v51  ;;  %v1442_v48 = vadd.f32 %v4268_v42, %v1126_v26  ;;  %v1122_v37 = vpop.xlane.xlu0 %1121  ;;  %v2215_v56 = vrot.slane %v1863_v21, %v4302_v1  ;;  %v1171_v63 = vsel %vm862_vm0, %v761_v40, 0.0 }
  0xd7   : > { %v2076_v23 = vrot.slane %v1835_v36, %v4410_v53  ;;  %v2081_v16 = vrot.slane %v1836_v25, %v4419_v62  ;;  %v1658_v11 = vpack.c.bf16 %v1556_v24, %v1555_v15  ;;  %v1441_v35 = vadd.f32 %v4268_v42, %v1122_v37  ;;  %v464_v25 = vld [vmem:[%s3867_s28 + $0x3f0] sm:$0xff]  ;;  %v465_v37 = vld [vmem:[%s3867_s28 + $0x3f8] sm:$0xff] }
  0xd8   : > { %v1570_v41 = vmax.f32 %v1442_v48, 0.0  ;;  %1285 = vadd.xlane.f32.xlu1 %v4461_v57  ;;  %v1167_v57 = vsel %vm862_vm0, %v759_v59, 0.0  ;;  %v819_v40 = vmul.f32 %v3875_v6, %v551_v54  ;;  %v2220_v15 = vsel %vm1954_vm1, %v2219_v28, %v2215_v56 }
  0xd9   : > { %v2077_v30 = vsel %vm1975_vm4, %v2076_v23, %v4550_v32  ;;  %v1865_v8 = vunpack.c.l.b16 %v1658_v11  ;;  %v1866_v49 = vunpack.c.h.b16 %v1658_v11  ;;  %v1569_v58 = vmax.f32 %v1441_v35, 0.0  ;;  %1281 = vadd.xlane.f32.xlu0 %v4467_v9  ;;  %v1014_v20 = vpop.xlane.xlu1 %1013 }
  0xda   : > { %v4649_v21 = vsel %vm1982_vm5, %v2081_v16, %v2077_v30  ;;  %v1414_v22 = vadd.f32 %v4268_v42, %v1014_v20  ;;  %v1010_v24 = vpop.xlane.xlu0 %1009  ;;  %v4661_v48 = vadd.f32 %v1047_v45, %v4600_v60  ;;  %v1291_v59 = vsel %vm862_vm0, %v821_v61, 0.0 }
  0xdb   : > { %v2224_v51 = vrot.slane %v1865_v8, %v4315_v7  ;;  %v2229_v32 = vrot.slane %v1866_v49, %v4336_v39  ;;  %v1665_v36 = vpack.c.bf16 %v1570_v41, %v1569_v58  ;;  %v1413_v9 = vadd.f32 %v4268_v42, %v1010_v24  ;;  %v525_v8 = vld [vmem:[%s3867_s28 + $0x5d8] sm:$0xff] }
  0xdc   : > { %v1542_v26 = vmax.f32 %v1414_v22, 0.0  ;;  %925 = vadd.xlane.f32.xlu1 %v4474_v31  ;;  %v4668_v35 = vadd.f32 %v1171_v63, %v4610_v19  ;;  %v4670_v54 = vadd.f32 %v1167_v57, %v758_v52  ;;  %v462_v31 = vld [vmem:[%s3867_s28 + $0x3e0] sm:$0xff]  ;;  %v1287_v56 = vsel %vm862_vm0, %v819_v40, 0.0  ;;  %v463_v52 = vld [vmem:[%s3867_s28 + $0x3e8] sm:$0xff]  ;;  %v524_v63 = vld [vmem:[%s3867_s28 + $0x5d0] sm:$0xff] }
  0xdd   : > { %v2225_v23 = vsel %vm1961_vm2, %v2224_v51, %v2220_v15  ;;  %v1541_v16 = vmax.f32 %v1413_v9, 0.0  ;;  %921 = vadd.xlane.f32.xlu0 %v4489_v18  ;;  %v1134_v11 = vpop.xlane.xlu1 %1133  ;;  %v4679_v28 = vmul.f32 %v3871_v5, %v464_v25  ;;  %v4682_v30 = vadd.f32 %v1291_v59, %v820_v10 }
  0xde   : > { %v4674_v60 = vsel %vm1968_vm3, %v2229_v32, %v2225_v23  ;;  %v1444_v45 = vadd.f32 %v4268_v42, %v1134_v11  ;;  %v1130_v61 = vpop.xlane.xlu0 %1129  ;;  %v733_v19 = vmul.f32 %v3875_v6, %v465_v37  ;;  %v1879_v49 = vunpack.c.l.b16 %v1665_v36  ;;  %v523_v37 = vld [vmem:[%s3867_s28 + $0x5c8] sm:$0xff] }
  0xdf   : > { %v1651_v18 = vpack.c.bf16 %v1542_v26, %v1541_v16  ;;  %v1443_v41 = vadd.f32 %v4268_v42, %v1130_v61  ;;  %v1880_v58 = vunpack.c.h.b16 %v1665_v36  ;;  %v730_v22 = vmul.f32 %v3871_v5, %v462_v31 }
  0xe0   : > { %v1572_v20 = vmax.f32 %v1444_v45, 0.0  ;;  %989 = vadd.xlane.f32.xlu1 %v4496_v55  ;;  %v4691_v51 = vadd.f32 %v1287_v56, %v818_v47  ;;  %v731_v36 = vmul.f32 %v3875_v6, %v463_v52  ;;  %v792_v25 = vmul.f32 %v3871_v5, %v524_v63  ;;  %v585_v47 = vld [vmem:[%s3867_s28 + $0x7b8] sm:$0xff]  ;;  %v522_v52 = vld [vmem:[%s3867_s28 + $0x5c0] sm:$0xff] }
  0xe1   : > { %v1851_v24 = vunpack.c.l.b16 %v1651_v18  ;;  %v1852_v57 = vunpack.c.h.b16 %v1651_v18  ;;  %v1571_v40 = vmax.f32 %v1443_v41, 0.0  ;;  %985 = vadd.xlane.f32.xlu0 %v4498_v46  ;;  %v1190_v10 = vpop.xlane.xlu1 %1189  ;;  %v793_v55 = vmul.f32 %v3875_v6, %v525_v8 }
  0xe2   : > { %v1458_v32 = vadd.f32 %v4268_v42, %v1190_v10  ;;  %v1186_v9 = vpop.xlane.xlu0 %1185  ;;  %v2294_v23 = vrot.slane %v1879_v49, %v4302_v1  ;;  %v2298_v16 = vrot.slane %v1880_v58, %v4305_v13  ;;  %v1115_v31 = vsel %vm862_vm0, %v733_v19, 0.0  ;;  %v584_v19 = vld [vmem:[%s3867_s28 + $0x7b0] sm:$0xff] }
  0xe3   : > { %v2155_v15 = vrot.slane %v1851_v24, %v4410_v53  ;;  %v2160_v26 = vrot.slane %v1852_v57, %v4419_v62  ;;  %v1666_v59 = vpack.c.bf16 %v1572_v20, %v1571_v40  ;;  %v1457_v46 = vadd.f32 %v4268_v42, %v1186_v9 }
  0xe4   : > { %v1586_v11 = vmax.f32 %v1458_v32, 0.0  ;;  %1109 = vadd.xlane.f32.xlu1 %v4507_v17  ;;  %v791_v17 = vmul.f32 %v3875_v6, %v523_v37  ;;  %v853_v58 = vmul.f32 %v3875_v6, %v585_v47  ;;  %v2299_v57 = vsel %vm1954_vm1, %v2298_v16, %v2294_v23  ;;  %v582_v37 = vld [vmem:[%s3867_s28 + $0x7a0] sm:$0xff]  ;;  %v583_v47 = vld [vmem:[%s3867_s28 + $0x7a8] sm:$0xff] }
  0xe5   : > { %v2156_v45 = vsel %vm1975_vm4, %v2155_v15, %v4589_v14  ;;  %v1881_v61 = vunpack.c.l.b16 %v1666_v59  ;;  %v1882_v56 = vunpack.c.h.b16 %v1666_v59  ;;  %v1585_v18 = vmax.f32 %v1457_v46, 0.0  ;;  %1105 = vadd.xlane.f32.xlu0 %v4510_v43  ;;  %v894_v41 = vpop.xlane.xlu1 %893 }
  0xe6   : > { %v4711_v63 = vsel %vm1982_vm5, %v2160_v26, %v2156_v45  ;;  %v1384_v8 = vadd.f32 %v4268_v42, %v894_v41  ;;  %v890_v49 = vpop.xlane.xlu0 %889  ;;  %v1111_v10 = vsel %vm862_vm0, %v731_v36, 0.0  ;;  %v790_v32 = vmul.f32 %v3871_v5, %v522_v52 }
  0xe7   : > { %v2303_v14 = vrot.slane %v1881_v61, %v4315_v7  ;;  %v2308_v20 = vrot.slane %v1882_v56, %v4336_v39  ;;  %v4719_v43 = vpack.c.bf16 %v1586_v11, %v1585_v18  ;;  %v1383_v24 = vadd.f32 %v4268_v42, %v890_v49  ;;  %v496_v56 = vld [vmem:[%s3867_s28 + $0x4f0] sm:$0xff]  ;;  %v497_v18 = vld [vmem:[%s3867_s28 + $0x4f8] sm:$0xff] }
  0xe8   : > { %v1512_v40 = vmax.f32 %v1384_v8, 0.0  ;;  %1229 = vadd.xlane.f32.xlu1 %v4579_v50  ;;  %v1235_v59 = vsel %vm862_vm0, %v793_v55, 0.0  ;;  %v852_v46 = vmul.f32 %v3871_v5, %v584_v19  ;;  %v4737_v16 = vadd.f32 %v1115_v31, %v4679_v28 }
  0xe9   : > { %v2304_v9 = vsel %vm1961_vm2, %v2303_v14, %v2299_v57  ;;  %v1511_v15 = vmax.f32 %v1383_v24, 0.0  ;;  %1225 = vadd.xlane.f32.xlu0 %v4592_v33  ;;  %v958_v26 = vpop.xlane.xlu1 %957  ;;  %v1231_v11 = vsel %vm862_vm0, %v791_v17, 0.0  ;;  %v4741_v55 = vadd.f32 %v1111_v10, %v730_v22  ;;  %v495_v14 = vld [vmem:[%s3867_s28 + $0x4e8] sm:$0xff] }
  0xea   : > { %v4733_v50 = vsel %vm1968_vm3, %v2308_v20, %v2304_v9  ;;  %v1400_v36 = vadd.f32 %v4268_v42, %v958_v26  ;;  %v954_v23 = vpop.xlane.xlu0 %953  ;;  %v1355_v61 = vsel %vm862_vm0, %v853_v58, 0.0  ;;  %v4747_v52 = vadd.f32 %v1235_v59, %v792_v25  ;;  %v494_v58 = vld [vmem:[%s3867_s28 + $0x4e0] sm:$0xff] }
  0xeb   : > { %v1636_v33 = vpack.c.bf16 %v1512_v40, %v1511_v15  ;;  %v1399_v45 = vadd.f32 %v4268_v42, %v954_v23  ;;  %v850_v28 = vmul.f32 %v3871_v5, %v582_v37  ;;  %v851_v31 = vmul.f32 %v3875_v6, %v583_v47 }
  0xec   : > { %v1528_v41 = vmax.f32 %v1400_v36, 0.0  ;;  %1349 = vadd.xlane.f32.xlu1 %v4597_v27  ;;  %v4752_v19 = vadd.f32 %v1231_v11, %v790_v32  ;;  %v4757_v27 = vadd.f32 %v1355_v61, %v852_v46  ;;  %v764_v25 = vmul.f32 %v3871_v5, %v496_v56 }
  0xed   : > { %v1821_v8 = vunpack.c.l.b16 %v1636_v33  ;;  %v1822_v49 = vunpack.c.h.b16 %v1636_v33  ;;  %v1527_v17 = vmax.f32 %v1399_v45, 0.0  ;;  %1345 = vadd.xlane.f32.xlu0 %v4605_v38  ;;  %v1078_v22 = vpop.xlane.xlu1 %1077  ;;  %v765_v57 = vmul.f32 %v3875_v6, %v497_v18 }
  0xee   : > { %v1430_v20 = vadd.f32 %v4268_v42, %v1078_v22  ;;  %v1074_v24 = vpop.xlane.xlu0 %1073  ;;  %v1351_v15 = vsel %vm862_vm0, %v851_v31, 0.0  ;;  %v762_v26 = vmul.f32 %v3871_v5, %v494_v58  ;;  %v763_v59 = vmul.f32 %v3875_v6, %v495_v14 }
  0xef   : > { %v1988_v40 = vrot.slane %v1821_v8, %v4513_v44  ;;  %v1995_v10 = vrot.slane %v1822_v49, %v4542_v12  ;;  %v1644_v9 = vpack.c.bf16 %v1528_v41, %v1527_v17  ;;  %v1429_v38 = vadd.f32 %v4268_v42, %v1074_v24 }
  0xf0   : > { %v1558_v32 = vmax.f32 %v1430_v20, 0.0  ;;  %1053 = vadd.xlane.f32.xlu1 %v4607_v0  ;;  %v1998_v45 = vadd.s32 4294967232, %v4248_v29  ;;  %v2005_v61 = vadd.s32 4294967224, %v4248_v29  ;;  %v1896_v31 = vunpack.c.h.b16 %v4719_v43 }
  0xf1   : > { %v1990_v46 = vsel %vm1989_vm6, %v1988_v40, %v4632_v34  ;;  %v1837_v37 = vunpack.c.l.b16 %v1644_v9  ;;  %v1838_v47 = vunpack.c.h.b16 %v1644_v9  ;;  %v1557_v36 = vmax.f32 %v1429_v38, 0.0  ;;  %1049 = vadd.xlane.f32.xlu0 %v4661_v48  ;;  %v1198_v23 = vpop.xlane.xlu1 %1197 }
  0xf2   : > { %v4772_v11 = vsel %vm1996_vm7, %v1995_v10, %v1990_v46  ;;  %v1460_v0 = vadd.f32 %v4268_v42, %v1198_v23  ;;  %v1194_v33 = vpop.xlane.xlu0 %1193  ;;  %v1895_v48 = vunpack.c.l.b16 %v4719_v43  ;;  %v1179_v49 = vsel %vm862_vm0, %v765_v57, 0.0 }
  0xf3   : > { %v2086_v56 = vrot.slane %v1837_v37, %v4513_v44  ;;  %v2091_v34 = vrot.slane %v1838_v47, %v4542_v12  ;;  %v1659_v18 = vpack.c.bf16 %v1558_v32, %v1557_v36  ;;  %v1459_v41 = vadd.f32 %v4268_v42, %v1194_v33 }
  0xf4   : > { %v1588_v8 = vmax.f32 %v1460_v0, 0.0  ;;  %1173 = vadd.xlane.f32.xlu1 %v4668_v35  ;;  %v4791_v10 = vadd.f32 %v1351_v15, %v850_v28  ;;  %v1175_v35 = vsel %vm862_vm0, %v763_v59, 0.0  ;;  %v2373_v32 = vrot.slane %v1895_v48, %v4302_v1  ;;  %v555_v0 = vld [vmem:[%s3867_s28 + $0x6c8] sm:$0xff] }
  0xf5   : > { %v2087_v17 = vsel %vm1989_vm6, %v2086_v56, %v4649_v21  ;;  %v1867_v22 = vunpack.c.l.b16 %v1659_v18  ;;  %v1868_v58 = vunpack.c.h.b16 %v1659_v18  ;;  %v1587_v14 = vmax.f32 %v1459_v41, 0.0  ;;  %1169 = vadd.xlane.f32.xlu0 %v4670_v54  ;;  %v1254_v20 = vpop.xlane.xlu1 %1253  ;;  %v557_v54 = vld [vmem:[%s3867_s28 + $0x6d8] sm:$0xff] }
  0xf6   : > { %v4788_v24 = vsel %vm1996_vm7, %v2091_v34, %v2087_v17  ;;  %v1474_v43 = vadd.f32 %v4268_v42, %v1254_v20  ;;  %v1250_v40 = vpop.xlane.xlu0 %1249  ;;  %v2377_v46 = vrot.slane %v1896_v31, %v4305_v13  ;;  %v4801_v28 = vadd.f32 %v1179_v49, %v764_v25  ;;  %v556_v34 = vld [vmem:[%s3867_s28 + $0x6d0] sm:$0xff]  ;;  %v554_v31 = vld [vmem:[%s3867_s28 + $0x6c0] sm:$0xff] }
  0xf7   : > { %v2234_v57 = vrot.slane %v1867_v22, %v4410_v53  ;;  %v2239_v21 = vrot.slane %v1868_v58, %v4419_v62  ;;  %v1674_v9 = vpack.c.bf16 %v1588_v8, %v1587_v14  ;;  %v1473_v38 = vadd.f32 %v4268_v42, %v1250_v40  ;;  %v529_v8 = vld [vmem:[%s3867_s28 + $0x5f8] sm:$0xff]  ;;  %v528_v58 = vld [vmem:[%s3867_s28 + $0x5f0] sm:$0xff] }
  0xf8   : > { %v1602_v37 = vmax.f32 %v1474_v43, 0.0  ;;  %1293 = vadd.xlane.f32.xlu1 %v4682_v30  ;;  %v4811_v25 = vadd.f32 %v1175_v35, %v762_v26  ;;  %v2378_v49 = vsel %vm1954_vm1, %v2377_v46, %v2373_v32  ;;  %v4825_v26 = vsub.s32 %v1998_v45, %v3860_v2 }
  0xf9   : > { %v2235_v15 = vsel %vm1975_vm4, %v2234_v57, %v4674_v60  ;;  %v1897_v59 = vunpack.c.l.b16 %v1674_v9  ;;  %v1898_v47 = vunpack.c.h.b16 %v1674_v9  ;;  %v1601_v36 = vmax.f32 %v1473_v38, 0.0  ;;  %1289 = vadd.xlane.f32.xlu0 %v4691_v51  ;;  %v1022_v23 = vpop.xlane.xlu1 %1021  ;;  %v527_v57 = vld [vmem:[%s3867_s28 + $0x5e8] sm:$0xff] }
  0xfa   : > { %v4808_v33 = vsel %vm1982_vm5, %v2239_v21, %v2235_v15  ;;  %v1416_v56 = vadd.f32 %v4268_v42, %v1022_v23  ;;  %v1018_v30 = vpop.xlane.xlu0 %1017  ;;  %v825_v60 = vmul.f32 %v3875_v6, %v557_v54  ;;  %v823_v22 = vmul.f32 %v3875_v6, %v555_v0  ;;  %v589_v15 = vld [vmem:[%s3867_s28 + $0x7d8] sm:$0xff] }
  0xfb   : > { %v2382_v18 = vrot.slane %v1897_v59, %v4315_v7  ;;  %v2387_v41 = vrot.slane %v1898_v47, %v4336_v39  ;;  %v4817_v48 = vpack.c.bf16 %v1602_v37, %v1601_v36  ;;  %v1415_v51 = vadd.f32 %v4268_v42, %v1018_v30 }
  0xfc   : > { %v1544_v17 = vmax.f32 %v1416_v56, 0.0  ;;  %1117 = vadd.xlane.f32.xlu1 %v4737_v16  ;;  %v4832_v40 = vsub.s32 %v2005_v61, %v3860_v2  ;;  %v824_v35 = vmul.f32 %v3871_v5, %v556_v34  ;;  %v526_v16 = vld [vmem:[%s3867_s28 + $0x5e0] sm:$0xff]  ;;  %v822_v38 = vmul.f32 %v3871_v5, %v554_v31 }
  0xfd   : > { %v2383_v14 = vsel %vm1961_vm2, %v2382_v18, %v2378_v49  ;;  %v1543_v20 = vmax.f32 %v1415_v51, 0.0  ;;  %1113 = vadd.xlane.f32.xlu0 %v4741_v55  ;;  %v1142_v43 = vpop.xlane.xlu1 %1141  ;;  %v797_v54 = vmul.f32 %v3875_v6, %v529_v8  ;;  %v588_v55 = vld [vmem:[%s3867_s28 + $0x7d0] sm:$0xff]  ;;  %v1299_v61 = vsel %vm862_vm0, %v825_v60, 0.0 }
  0xfe   : > { %v4838_v45 = vsel %vm1968_vm3, %v2387_v41, %v2383_v14  ;;  %v1446_v21 = vadd.f32 %v4268_v42, %v1142_v43  ;;  %v1138_v9 = vpop.xlane.xlu0 %1137  ;;  %v796_v37 = vmul.f32 %v3871_v5, %v528_v58  ;;  %v1295_v47 = vsel %vm862_vm0, %v823_v22, 0.0 }
  0xff   : > { %v1652_v32 = vpack.c.bf16 %v1544_v17, %v1543_v20  ;;  %v1445_v46 = vadd.f32 %v4268_v42, %v1138_v9  ;;  %v4851_v36 = vmul.f32 %v3871_v5, %v526_v16  ;;  %v795_v23 = vmul.f32 %v3875_v6, %v527_v57  ;;  %v587_v9 = vld [vmem:[%s3867_s28 + $0x7c8] sm:$0xff] }
 0x100   : > { %v1574_v59 = vmax.f32 %v1446_v21, 0.0  ;;  %1237 = vadd.xlane.f32.xlu1 %v4747_v52  ;;  %v4856_v60 = vmul.f32 %v3871_v5, %v588_v55  ;;  %v1300_v52 = vadd.f32 %v1299_v61, %v824_v35  ;;  %v1243_v51 = vsel %vm862_vm0, %v797_v54, 0.0 }
 0x101   : > { %v1853_v0 = vunpack.c.l.b16 %v1652_v32  ;;  %v1854_v56 = vunpack.c.h.b16 %v1652_v32  ;;  %v1573_v30 = vmax.f32 %v1445_v46, 0.0  ;;  %1233 = vadd.xlane.f32.xlu0 %v4752_v19  ;;  %v1262_v34 = vpop.xlane.xlu1 %1261  ;;  %v857_v31 = vmul.f32 %v3875_v6, %v589_v15 }
 0x102   : > { %v1476_v18 = vadd.f32 %v4268_v42, %v1262_v34  ;;  %v1258_v41 = vpop.xlane.xlu0 %1257  ;;  %v1911_v22 = vunpack.c.l.b16 %v4817_v48  ;;  %v1912_v58 = vunpack.c.h.b16 %v4817_v48  ;;  %v1296_v20 = vadd.f32 %v1295_v47, %v822_v38 }
 0x103   : > { %v2165_v8 = vrot.slane %v1853_v0, %v4513_v44  ;;  %v2170_v49 = vrot.slane %v1854_v56, %v4542_v12  ;;  %v1667_v17 = vpack.c.bf16 %v1574_v59, %v1573_v30  ;;  %v1475_v19 = vadd.f32 %v4268_v42, %v1258_v41 }
 0x104   : > { %v1604_v14 = vmax.f32 %v1476_v18, 0.0  ;;  %1357 = vadd.xlane.f32.xlu1 %v4757_v27  ;;  %v1244_v32 = vadd.f32 %v1243_v51, %v796_v37  ;;  %v1239_v27 = vsel %vm862_vm0, %v795_v23, 0.0  ;;  %v2452_v15 = vrot.slane %v1911_v22, %v4302_v1  ;;  %v586_v18 = vld [vmem:[%s3867_s28 + $0x7c0] sm:$0xff] }
 0x105   : > { %v2166_v43 = vsel %vm1989_vm6, %v2165_v8, %v4711_v63  ;;  %v1883_v35 = vunpack.c.l.b16 %v1667_v17  ;;  %v1884_v16 = vunpack.c.h.b16 %v1667_v17  ;;  %v1603_v57 = vmax.f32 %v1475_v19, 0.0  ;;  %1353 = vadd.xlane.f32.xlu0 %v4791_v10  ;;  %v1318_v21 = vpop.xlane.xlu1 %1317  ;;  %v561_v10 = vld [vmem:[%s3867_s28 + $0x6f8] sm:$0xff] }
 0x106   : > { %v4872_v54 = vsel %vm1996_vm7, %v2170_v49, %v2166_v43  ;;  %v1490_v48 = vadd.f32 %v4268_v42, %v1318_v21  ;;  %v1314_v55 = vpop.xlane.xlu0 %1313  ;;  %v2456_v59 = vrot.slane %v1912_v58, %v4305_v13  ;;  %v855_v37 = vmul.f32 %v3875_v6, %v587_v9  ;;  %v559_v49 = vld [vmem:[%s3867_s28 + $0x6e8] sm:$0xff]  ;;  %v560_v58 = vld [vmem:[%s3867_s28 + $0x6f0] sm:$0xff] }
 0x107   : > { %v2313_v38 = vrot.slane %v1883_v35, %v4410_v53  ;;  %v2318_v63 = vrot.slane %v1884_v16, %v4419_v62  ;;  %v1682_v46 = vpack.c.bf16 %v1604_v14, %v1603_v57  ;;  %v1489_v61 = vadd.f32 %v4268_v42, %v1314_v55  ;;  %v558_v16 = vld [vmem:[%s3867_s28 + $0x6e0] sm:$0xff] }
 0x108   : > { %v1618_v47 = vmax.f32 %v1490_v48, 0.0  ;;  %1181 = vadd.xlane.f32.xlu1 %v4801_v28  ;;  %v1363_v8 = vsel %vm862_vm0, %v857_v31, 0.0  ;;  %v2457_v14 = vsel %vm1954_vm1, %v2456_v59, %v2452_v15  ;;  %v1240_v31 = vadd.f32 %v1239_v27, %v4851_v36 }
 0x109   : > { %v2314_v23 = vsel %vm1975_vm4, %v2313_v38, %v4733_v50  ;;  %v1913_v0 = vunpack.c.l.b16 %v1682_v46  ;;  %v1914_v56 = vunpack.c.h.b16 %v1682_v46  ;;  %v1617_v30 = vmax.f32 %v1489_v61, 0.0  ;;  %1177 = vadd.xlane.f32.xlu0 %v4811_v25  ;;  %v902_v34 = vpop.xlane.xlu1 %901  ;;  %v593_v38 = vld [vmem:[%s3867_s28 + $0x7f8] sm:$0xff] }
 0x10a   : > { %v4889_v41 = vsel %vm1982_vm5, %v2318_v63, %v2314_v23  ;;  %v1386_v51 = vadd.f32 %v4268_v42, %v902_v34  ;;  %v898_v28 = vpop.xlane.xlu0 %897  ;;  %v829_v50 = vmul.f32 %v3875_v6, %v561_v10  ;;  %v854_v35 = vmul.f32 %v3871_v5, %v586_v18  ;;  %v591_v63 = vld [vmem:[%s3867_s28 + $0x7e8] sm:$0xff] }
 0x10b   : > { %v2461_v17 = vrot.slane %v1913_v0, %v4315_v7  ;;  %v2466_v19 = vrot.slane %v1914_v56, %v4336_v39  ;;  %v4897_v25 = vpack.c.bf16 %v1618_v47, %v1617_v30  ;;  %v1385_v22 = vadd.f32 %v4268_v42, %v898_v28  ;;  %v592_v47 = vld [vmem:[%s3867_s28 + $0x7f0] sm:$0xff] }
 0x10c   : > { %v1514_v43 = vmax.f32 %v1386_v51, 0.0  ;;  %1301 = vadd.xlane.f32.xlu1 %v1300_v52  ;;  %v1359_v48 = vsel %vm862_vm0, %v855_v37, 0.0  ;;  %v827_v55 = vmul.f32 %v3875_v6, %v559_v49  ;;  %v1364_v46 = vadd.f32 %v1363_v8, %v4856_v60  ;;  %v590_v37 = vld [vmem:[%s3867_s28 + $0x7e0] sm:$0xff] }
 0x10d   : > { %v2462_v57 = vsel %vm1961_vm2, %v2461_v17, %v2457_v14  ;;  %v1513_v21 = vmax.f32 %v1385_v22, 0.0  ;;  %1297 = vadd.xlane.f32.xlu0 %v1296_v20  ;;  %v966_v9 = vpop.xlane.xlu1 %965  ;;  %v828_v61 = vmul.f32 %v3871_v5, %v560_v58  ;;  %v1307_v15 = vsel %vm862_vm0, %v829_v50, 0.0 }
 0x10e   : > { %v4911_v52 = vsel %vm1968_vm3, %v2466_v19, %v2462_v57  ;;  %v1402_v36 = vadd.f32 %v4268_v42, %v966_v9  ;;  %v962_v27 = vpop.xlane.xlu0 %961  ;;  %v826_v59 = vmul.f32 %v3871_v5, %v558_v16  ;;  %v1360_v0 = vadd.f32 %v1359_v48, %v854_v35 }
 0x10f   : > { %v1637_v10 = vpack.c.bf16 %v1514_v43, %v1513_v21  ;;  %v1401_v20 = vadd.f32 %v4268_v42, %v962_v27  ;;  %v861_v56 = vmul.f32 %v3875_v6, %v593_v38  ;;  %v859_v30 = vmul.f32 %v3875_v6, %v591_v63 }
 0x110   : > { %v1530_v23 = vmax.f32 %v1402_v36, 0.0  ;;  %1245 = vadd.xlane.f32.xlu1 %v1244_v32  ;;  %v1303_v28 = vsel %vm862_vm0, %v827_v55, 0.0  ;;  %v1308_v49 = vadd.f32 %v1307_v15, %v828_v61  ;;  %v860_v17 = vmul.f32 %v3871_v5, %v592_v47 }
 0x111   : > { %v1823_v34 = vunpack.c.l.b16 %v1637_v10  ;;  %v1824_v60 = vunpack.c.h.b16 %v1637_v10  ;;  %v1529_v18 = vmax.f32 %v1401_v20, 0.0  ;;  %1241 = vadd.xlane.f32.xlu0 %v1240_v31  ;;  %v1086_v51 = vpop.xlane.xlu1 %1085  ;;  %v858_v32 = vmul.f32 %v3871_v5, %v590_v37 }
 0x112   : > { %v1432_v8 = vadd.f32 %v4268_v42, %v1086_v51  ;;  %v1082_v50 = vpop.xlane.xlu0 %1081  ;;  %v1304_v43 = vadd.f32 %v1303_v28, %v826_v59  ;;  %v1371_v31 = vsel %vm862_vm0, %v861_v56, 0.0  ;;  %v1367_v35 = vsel %vm862_vm0, %v859_v30, 0.0 }
 0x113   : > { %v2002_v19 = vrot.slane %v1823_v34, %v4825_v26  ;;  %v2009_v22 = vrot.slane %v1824_v60, %v4832_v40  ;;  %v1645_v6 = vpack.c.bf16 %v1530_v23, %v1529_v18  ;;  %v1431_v58 = vadd.f32 %v4268_v42, %v1082_v50  ;;  %v3599_v23 = vld [vmem:[%s5562_s3 + $0x4] ss:$16 sps:$4 sm:$0xff]   ;;  %v3604_v60 = vld [vmem:[%s5562_s3 + $0x8] ss:$16 sps:$4 sm:$0xff]  }
 0x114   : > { %v1560_v14 = vmax.f32 %v1432_v8, 0.0  ;;  %1365 = vadd.xlane.f32.xlu1 %v1364_v46  ;;  %v1368_v10 = vadd.f32 %v1367_v35, %v858_v32  ;;  %2783 = vmatprep.subr.bf16.mxu0 %v3599_v23  ;;  %v1927_v50 = vunpack.c.l.b16 %v4897_v25  ;;  %v3609_v35 = vld [vmem:[%s5562_s3 + $0x20] ss:$16 sps:$4 sm:$0xff]   ;;  %vm2607_vm0 = vcmask 1041409  }
 0x115   : > { %v2004_v16 = vsel %vm2003_vm8, %v2002_v19, %v4772_v11  ;;  %v1839_v57 = vunpack.c.l.b16 %v1645_v6  ;;  %v1840_v21 = vunpack.c.h.b16 %v1645_v6  ;;  %v1559_v5 = vmax.f32 %v1431_v58, 0.0  ;;  %1361 = vadd.xlane.f32.xlu0 %v1360_v0  ;;  %v1206_v9 = vpop.xlane.xlu1 %1205  ;;  %v3601_v0 = vld [vmem:[%s5562_s3 + $0xc] ss:$16 sps:$4 sm:$0xff]  }
 0x116   : > { %v4935_v48 = vsel %vm2010_vm9, %v2009_v22, %v2004_v16  ;;  %v1462_v55 = vadd.f32 %v4268_v42, %v1206_v9  ;;  %v1202_v38 = vpop.xlane.xlu0 %1201  ;;  %v1372_v11 = vadd.f32 %v1371_v31, %v860_v17  ;;  %2824 = vmatprep.subr.bf16.mxu1 %v3601_v0  ;;  %v3610_v16 = vld [vmem:[%s5562_s3 + $0x28] ss:$16 sps:$4 sm:$0xff]  }
 0x117   : > { %v2096_v63 = vrot.slane %v1839_v57, %v4825_v26  ;;  %v2101_v36 = vrot.slane %v1840_v21, %v4832_v40  ;;  %v1660_v27 = vpack.c.bf16 %v1560_v14, %v1559_v5  ;;  %v1461_v46 = vadd.f32 %v4268_v42, %v1202_v38  ;;  %v3605_v14 = vld [vmem:[%s5562_s3 + $0x24] ss:$16 sps:$4 sm:$0xff]   ;;  %2825 = vmatpush1.bf16.msra.mxu1 %v3604_v60 }
 0x118   : > { %v1590_v61 = vmax.f32 %v1462_v55, 0.0  ;;  %1309 = vadd.xlane.f32.xlu1 %v1308_v49  ;;  %v1928_v49 = vunpack.c.h.b16 %v4897_v25  ;;  %v3607_v25 = vld [vmem:[%s5562_s3 + $0x2c] ss:$16 sps:$4 sm:$0xff]   ;;  %v2531_v55 = vrot.slane %v1927_v50, %v4302_v1 }
 0x119   : > { %v2097_v20 = vsel %vm2003_vm8, %v2096_v63, %v4788_v24  ;;  %v1869_v15 = vunpack.c.l.b16 %v1660_v27  ;;  %v1870_v59 = vunpack.c.h.b16 %v1660_v27  ;;  %v1589_v47 = vmax.f32 %v1461_v46, 0.0  ;;  %1305 = vadd.xlane.f32.xlu0 %v1304_v43  ;;  %v1326_v37 = vpop.xlane.xlu1 %1325  ;;  %v3603_v24 = vld [vmem:[%s5562_s3] ss:$16 sps:$4 sm:$0xff]   ;;  %2826 = vmatprep.subr.bf16.mxu1 %v3607_v25  ;;  %v3613_v1 = vld [vmem:[%s5562_s3 + $0x4c] ss:$16 sps:$4 sm:$0xff]  }
 0x11a   : > { %v4950_v56 = vsel %vm2010_vm9, %v2101_v36, %v2097_v20  ;;  %v1492_v30 = vadd.f32 %v4268_v42, %v1326_v37  ;;  %v1322_v34 = vpop.xlane.xlu0 %1321  ;;  %2784 = vmatpush1.bf16.msra.mxu0 %v3603_v24  ;;  %v2535_v38 = vrot.slane %v1928_v49, %v4305_v13 }
 0x11b   : > { %v2244_v18 = vrot.slane %v1869_v15, %v4513_v44  ;;  %v2249_v51 = vrot.slane %v1870_v59, %v4542_v12  ;;  %v1675_v28 = vpack.c.bf16 %v1590_v61, %v1589_v47  ;;  %v1491_v8 = vadd.f32 %v4268_v42, %v1322_v34  ;;  %2785 = vmatprep.subr.bf16.mxu0 %v3605_v14  ;;  %v3616_v59 = vld [vmem:[%s5562_s3 + $0x48] ss:$16 sps:$4 sm:$0xff]  }
 0x11c   : > { %v1620_v17 = vmax.f32 %v1492_v30, 0.0  ;;  %1373 = vadd.xlane.f32.xlu1 %v1372_v11  ;;  %2827 = vmatpush1.bf16.msra.mxu1 %v3610_v16  ;;  %v2536_v30 = vsel %vm1954_vm1, %v2535_v38, %v2531_v55  ;;  %v2019_v55 = vadd.s32 4294967208, %v4248_v29  ;;  %vm2609_vm1 = vcmask 1042434  }
 0x11d   : > { %v2245_v32 = vsel %vm1989_vm6, %v2244_v18, %v4808_v33  ;;  %v1899_v19 = vunpack.c.l.b16 %v1675_v28  ;;  %v1900_v22 = vunpack.c.h.b16 %v1675_v28  ;;  %v1619_v6 = vmax.f32 %v1491_v8, 0.0  ;;  %1369 = vadd.xlane.f32.xlu0 %v1368_v10  ;;  %v1030_v58 = vpop.xlane.xlu1 %1029  ;;  %v3611_v10 = vld [vmem:[%s5562_s3 + $0x44] ss:$16 sps:$4 sm:$0xff]   ;;  %2828 = vmatprep.subr.bf16.mxu1 %v3613_v1 }
 0x11e   : > { %v4973_v43 = vsel %vm1996_vm7, %v2249_v51, %v2245_v32  ;;  %v1418_v31 = vadd.f32 %v4268_v42, %v1030_v58  ;;  %v1026_v33 = vpop.xlane.xlu0 %1025  ;;  %2786 = vmatpush1.bf16.msra.mxu0 %v3609_v35  ;;  %v3622_v32 = vld [vmem:[%s5562_s3 + $0x68] ss:$16 sps:$4 sm:$0xff]  }
 0x11f   : > { %v2392_v57 = vrot.slane %v1899_v19, %v4410_v53  ;;  %v2397_v21 = vrot.slane %v1900_v22, %v4419_v62  ;;  %v1690_v5 = vpack.c.bf16 %v1620_v17, %v1619_v6  ;;  %v1417_v9 = vadd.f32 %v4268_v42, %v1026_v33  ;;  %2787 = vmatprep.subr.bf16.mxu0 %v3611_v10  ;;  %v3621_v17 = vld [vmem:[%s5562_s3 + $0x60] ss:$16 sps:$4 sm:$0xff]  }
 0x120   : > { %v1546_v63 = vmax.f32 %v1418_v31, 0.0  ;;  %2829 = vmatpush1.bf16.msra.mxu1 %v3616_v59 }
 0x121   : > { %v2393_v36 = vsel %vm1975_vm4, %v2392_v57, %v4838_v45  ;;  %v1929_v27 = vunpack.c.l.b16 %v1690_v5  ;;  %v1930_v46 = vunpack.c.h.b16 %v1690_v5  ;;  %v1545_v61 = vmax.f32 %v1417_v9, 0.0  ;;  %v1150_v11 = vpop.xlane.xlu1 %1149  ;;  %v3615_v45 = vld [vmem:[%s5562_s3 + $0x40] ss:$16 sps:$4 sm:$0xff]   ;;  %v3623_v57 = vld [vmem:[%s5562_s3 + $0x84] ss:$16 sps:$4 sm:$0xff]  }
 0x122   : > { %v4996_v13 = vsel %vm1982_vm5, %v2397_v21, %v2393_v36  ;;  %v1448_v20 = vadd.f32 %v4268_v42, %v1150_v11  ;;  %v1146_v15 = vpop.xlane.xlu0 %1145  ;;  %2788 = vmatpush1.bf16.msra.mxu0 %v3615_v45  ;;  %v3625_v21 = vld [vmem:[%s5562_s3 + $0x8c] ss:$16 sps:$4 sm:$0xff]   ;;  %v3628_v36 = vld [vmem:[%s5562_s3 + $0x88] ss:$16 sps:$4 sm:$0xff]  }
 0x123   : > { %v2540_v47 = vrot.slane %v1929_v27, %v4315_v7  ;;  %v2545_v37 = vrot.slane %v1930_v46, %v4336_v39  ;;  %v1653_v23 = vpack.c.bf16 %v1546_v63, %v1545_v61  ;;  %v1447_v0 = vadd.f32 %v4268_v42, %v1146_v15  ;;  %v3617_v7 = vld [vmem:[%s5562_s3 + $0x64] ss:$16 sps:$4 sm:$0xff]   ;;  %v3619_v39 = vld [vmem:[%s5562_s3 + $0x6c] ss:$16 sps:$4 sm:$0xff]   ;;  %v3627_v63 = vld [vmem:[%s5562_s3 + $0x80] ss:$16 sps:$4 sm:$0xff]  }
 0x124   : > { %v1576_v34 = vmax.f32 %v1448_v20, 0.0  ;;  %2789 = vmatprep.subr.bf16.mxu0 %v3617_v7  ;;  %2830 = vmatprep.subr.bf16.mxu1 %v3619_v39 }
 0x125   : > { %v2541_v24 = vsel %vm1961_vm2, %v2540_v47, %v2536_v30  ;;  %v1855_v60 = vunpack.c.l.b16 %v1653_v23  ;;  %v1856_v18 = vunpack.c.h.b16 %v1653_v23  ;;  %v1575_v51 = vmax.f32 %v1447_v0, 0.0  ;;  %v1270_v28 = vpop.xlane.xlu1 %1269  ;;  %2831 = vmatpush1.bf16.msra.mxu1 %v3622_v32  ;;  %v3629_v47 = vld [vmem:[%s5562_s3 + $0xa4] ss:$16 sps:$4 sm:$0xff]  }
 0x126   : > { %v5017_v8 = vsel %vm1968_vm3, %v2545_v37, %v2541_v24  ;;  %v1478_v50 = vadd.f32 %v4268_v42, %v1270_v28  ;;  %v1266_v49 = vpop.xlane.xlu0 %1265  ;;  %2790 = vmatpush1.bf16.msra.mxu0 %v3621_v17  ;;  %2832 = vmatprep.subr.bf16.mxu1 %v3625_v21  ;;  %v3631_v37 = vld [vmem:[%s5562_s3 + $0xac] ss:$16 sps:$4 sm:$0xff]   ;;  %v3633_v24 = vld [vmem:[%s5562_s3 + $0xa0] ss:$16 sps:$4 sm:$0xff]   ;;  %v3641_v21 = vld [vmem:[%s5562_s3 + $0xe4] ss:$16 sps:$4 sm:$0xff]  }
 0x127   : > { %v2175_v19 = vrot.slane %v1855_v60, %v4825_v26  ;;  %v2180_v22 = vrot.slane %v1856_v18, %v4832_v40  ;;  %v1668_v6 = vpack.c.bf16 %v1576_v34, %v1575_v51  ;;  %v1477_v58 = vadd.f32 %v4268_v42, %v1266_v49  ;;  %2791 = vmatprep.subr.bf16.mxu0 %v3623_v57  ;;  %v3634_v60 = vld [vmem:[%s5562_s3 + $0xa8] ss:$16 sps:$4 sm:$0xff]  }
 0x128   : > { %v1606_v14 = vmax.f32 %v1478_v50, 0.0  ;;  %vm2611_vm2 = vcmask 1043459   ;;  %vm2613_vm3 = vcmask 1044484  }
 0x129   : > { %v2176_v25 = vsel %vm2003_vm8, %v2175_v19, %v4872_v54  ;;  %v1885_v31 = vunpack.c.l.b16 %v1668_v6  ;;  %v1886_v33 = vunpack.c.h.b16 %v1668_v6  ;;  %v1605_v35 = vmax.f32 %v1477_v58, 0.0  ;;  %v910_v16 = vpop.xlane.xlu1 %909  ;;  %2833 = vmatpush1.bf16.msra.mxu1 %v3628_v36  ;;  %v3637_v6 = vld [vmem:[%s5562_s3 + $0xcc] ss:$16 sps:$4 sm:$0xff]  }
 0x12a   : > { %v5038_v5 = vsel %vm2010_vm9, %v2180_v22, %v2176_v25  ;;  %v1388_v9 = vadd.f32 %v4268_v42, %v910_v16  ;;  %v2012_v54 = vadd.s32 4294967216, %v4248_v29  ;;  %v906_v38 = vpop.xlane.xlu0 %905  ;;  %2792 = vmatpush1.bf16.msra.mxu0 %v3627_v63  ;;  %2834 = vmatprep.subr.bf16.mxu1 %v3631_v37  ;;  %v3635_v22 = vld [vmem:[%s5562_s3 + $0xc4] ss:$16 sps:$4 sm:$0xff]   ;;  %v3639_v25 = vld [vmem:[%s5562_s3 + $0xc0] ss:$16 sps:$4 sm:$0xff]  }
 0x12b   : > { %v2323_v27 = vrot.slane %v1885_v31, %v4513_v44  ;;  %v2328_v46 = vrot.slane %v1886_v33, %v4542_v12  ;;  %v1683_v61 = vpack.c.bf16 %v1606_v14, %v1605_v35  ;;  %v1387_v11 = vadd.f32 %v4268_v42, %v906_v38  ;;  %2793 = vmatprep.subr.bf16.mxu0 %v3629_v47  ;;  %v3640_v31 = vld [vmem:[%s5562_s3 + $0xc8] ss:$16 sps:$4 sm:$0xff]  }
 0x12c   : > { %v1516_v10 = vmax.f32 %v1388_v9, 0.0  ;;  %v5064_v0 = vsub.s32 %v2012_v54, %v3860_v2  ;;  %v3643_v9 = vld [vmem:[%s5562_s3 + $0xec] ss:$16 sps:$4 sm:$0xff]  }
 0x12d   : > { %v2324_v1 = vsel %vm1989_vm6, %v2323_v27, %v4889_v41  ;;  %v1915_v20 = vunpack.c.l.b16 %v1683_v61  ;;  %v1916_v15 = vunpack.c.h.b16 %v1683_v61  ;;  %v1515_v45 = vmax.f32 %v1387_v11, 0.0  ;;  %v974_v59 = vpop.xlane.xlu1 %973  ;;  %2835 = vmatpush1.bf16.msra.mxu1 %v3634_v60 }
 0x12e   : > { %v5061_v23 = vsel %vm1996_vm7, %v2328_v46, %v2324_v1  ;;  %v5067_v41 = vsub.s32 %v2019_v55, %v3860_v2  ;;  %v1404_v30 = vadd.f32 %v4268_v42, %v974_v59  ;;  %v970_v34 = vpop.xlane.xlu0 %969  ;;  %2794 = vmatpush1.bf16.msra.mxu0 %v3633_v24  ;;  %2836 = vmatprep.subr.bf16.mxu1 %v3637_v6  ;;  %v3645_v46 = vld [vmem:[%s5562_s3 + $0xe0] ss:$16 sps:$4 sm:$0xff]   ;;  %v3750_v61 = vmov 0  }
 0x12f   : > { %v2471_v18 = vrot.slane %v1915_v20, %v4410_v53  ;;  %v2476_v51 = vrot.slane %v1916_v15, %v4419_v62  ;;  %v1638_v28 = vpack.c.bf16 %v1516_v10, %v1515_v45  ;;  %v1403_v7 = vadd.f32 %v4268_v42, %v970_v34  ;;  %2795 = vmatprep.subr.bf16.mxu0 %v3635_v22 }
 0x130   : > { %v1532_v39 = vmax.f32 %v1404_v30, 0.0  ;;  %2815 = vmatprep.mubr.bf16.mxu0 %v3750_v61  ;;  %2856 = vmatprep.mubr.bf16.mxu1 %v3750_v61 }
 0x131   : > { %v2472_v50 = vsel %vm1975_vm4, %v2471_v18, %v4911_v52  ;;  %v1825_v49 = vunpack.c.l.b16 %v1638_v28  ;;  %v1826_v17 = vunpack.c.h.b16 %v1638_v28  ;;  %v1531_v32 = vmax.f32 %v1403_v7, 0.0  ;;  %v1094_v19 = vpop.xlane.xlu1 %1093  ;;  %2837 = vmatpush1.bf16.msra.mxu1 %v3640_v31  ;;  %v3647_v7 = vld [vmem:[%s5564_s5 + $0x40] sm:$0xff]  }
 0x132   : > { %v5088_v58 = vsel %vm1982_vm5, %v2476_v51, %v2472_v50  ;;  %v1434_v52 = vadd.f32 %v4268_v42, %v1094_v19  ;;  %v1090_v14 = vpop.xlane.xlu0 %1089  ;;  %2796 = vmatpush1.bf16.msra.mxu0 %v3639_v25  ;;  %2838 = vmatprep.subr.bf16.mxu1 %v3643_v9 }
 0x133   : > { %v2016_v33 = vrot.slane %v1825_v49, %v5064_v0  ;;  %v2023_v35 = vrot.slane %v1826_v17, %v5067_v41  ;;  %v1646_v16 = vpack.c.bf16 %v1532_v39, %v1531_v32  ;;  %v1433_v57 = vadd.f32 %v4268_v42, %v1090_v14  ;;  %2797 = vmatprep.subr.bf16.mxu0 %v3641_v21 }
 0x134   : > { %v1562_v54 = vmax.f32 %v1434_v52, 0.0 }
 0x135   : > { %v2018_v55 = vsel %vm2017_vm10, %v2016_v33, %v4935_v48  ;;  %v1841_v38 = vunpack.c.l.b16 %v1646_v16  ;;  %v1842_v63 = vunpack.c.h.b16 %v1646_v16  ;;  %v1561_v36 = vmax.f32 %v1433_v57, 0.0  ;;  %v1214_v27 = vpop.xlane.xlu1 %1213  ;;  %v3646_v48 = vld [vmem:[%s5562_s3 + $0xe8] ss:$16 sps:$4 sm:$0xff]  }
 0x136   : > { %v5112_v11 = vsel %vm2024_vm11, %v2023_v35, %v2018_v55  ;;  %v1464_v10 = vadd.f32 %v4268_v42, %v1214_v27  ;;  %v1210_v1 = vpop.xlane.xlu0 %1209  ;;  %2798 = vmatpush1.bf16.msra.mxu0 %v3645_v46  ;;  %2839 = vmatpush1.bf16.msra.mxu1 %v3646_v48 }
 0x137   : > { %v2106_v20 = vrot.slane %v1841_v38, %v5064_v0  ;;  %v2111_v15 = vrot.slane %v1842_v63, %v5067_v41  ;;  %v1661_v45 = vpack.c.bf16 %v1562_v54, %v1561_v36  ;;  %v1463_v59 = vadd.f32 %v4268_v42, %v1210_v1  ;;  %3487 = vmatprep.subr.bf16.mxu0 %v3647_v7 }
 0x138   : > { %v1592_v47 = vmax.f32 %v1464_v10, 0.0 }
 0x139   : > { %v2107_v37 = vsel %vm2017_vm10, %v2106_v20, %v4950_v56  ;;  %v1871_v30 = vunpack.c.l.b16 %v1661_v45  ;;  %v1872_v34 = vunpack.c.h.b16 %v1661_v45  ;;  %v1591_v24 = vmax.f32 %v1463_v59, 0.0  ;;  %v1334_v60 = vpop.xlane.xlu1 %1333  ;;  %v3648_v56 = vld [vmem:[%s5564_s5 + $0xc0] sm:$0xff]  }
 0x13a   : > { %v5124_v18 = vsel %vm2024_vm11, %v2111_v15, %v2107_v37  ;;  %v1494_v51 = vadd.f32 %v4268_v42, %v1334_v60  ;;  %v1330_v28 = vpop.xlane.xlu0 %1329  ;;  %3509 = vmatprep.subr.bf16.mxu1 %v3648_v56 }
 0x13b   : > { %v2254_v39 = vrot.slane %v1871_v30, %v4825_v26  ;;  %v2259_v50 = vrot.slane %v1872_v34, %v4832_v40  ;;  %v1676_v49 = vpack.c.bf16 %v1592_v47, %v1591_v24  ;;  %v1493_v17 = vadd.f32 %v4268_v42, %v1330_v28 }
 0x13c   : > { %v1622_v32 = vmax.f32 %v1494_v51, 0.0 }
 0x13d   : > { %v2255_v19 = vsel %vm2003_vm8, %v2254_v39, %v4973_v43  ;;  %v1901_v22 = vunpack.c.l.b16 %v1676_v49  ;;  %v1902_v6 = vunpack.c.h.b16 %v1676_v49  ;;  %v1621_v52 = vmax.f32 %v1493_v17, 0.0  ;;  %v1038_v14 = vpop.xlane.xlu1 %1037 }
 0x13e   : > { %v5139_v25 = vsel %vm2010_vm9, %v2259_v50, %v2255_v19  ;;  %v1420_v31 = vadd.f32 %v4268_v42, %v1038_v14  ;;  %v1034_v33 = vpop.xlane.xlu0 %1033  ;;  %v2026_v17 = vadd.s32 4294967200, %v4248_v29 }
 0x13f   : > { %v2402_v35 = vrot.slane %v1901_v22, %v4513_v44  ;;  %v2407_v16 = vrot.slane %v1902_v6, %v4542_v12  ;;  %v1691_v57 = vpack.c.bf16 %v1622_v32, %v1621_v52  ;;  %v1419_v21 = vadd.f32 %v4268_v42, %v1034_v33 }
 0x140   : > { %v1548_v9 = vmax.f32 %v1420_v31, 0.0  ;;  %v2033_v32 = vadd.s32 4294967192, %v4248_v29 }
 0x141   : > { %v2403_v43 = vsel %vm1989_vm6, %v2402_v35, %v4996_v13  ;;  %v1931_v54 = vunpack.c.l.b16 %v1691_v57  ;;  %v1932_v55 = vunpack.c.h.b16 %v1691_v57  ;;  %v1547_v38 = vmax.f32 %v1419_v21, 0.0  ;;  %v1158_v63 = vpop.xlane.xlu1 %1157 }
 0x142   : > { %v5148_v36 = vsel %vm1996_vm7, %v2407_v16, %v2403_v43  ;;  %v1450_v27 = vadd.f32 %v4268_v42, %v1158_v63  ;;  %v1154_v46 = vpop.xlane.xlu0 %1153  ;;  %v5183_v43 = vsub.s32 %v2033_v32, %v3860_v2 }
 0x143   : > { %v2550_v61 = vrot.slane %v1931_v54, %v4410_v53  ;;  %v2555_v10 = vrot.slane %v1932_v55, %v4419_v62  ;;  %v1654_v1 = vpack.c.bf16 %v1548_v9, %v1547_v38  ;;  %v1449_v48 = vadd.f32 %v4268_v42, %v1154_v46 }
 0x144   : > { %v1578_v20 = vmax.f32 %v1450_v27, 0.0  ;;  %v5180_v9 = vsub.s32 %v2026_v17, %v3860_v2 }
 0x145   : > { %v2551_v13 = vsel %vm1975_vm4, %v2550_v61, %v5017_v8  ;;  %v1857_v15 = vunpack.c.l.b16 %v1654_v1  ;;  %v1858_v45 = vunpack.c.h.b16 %v1654_v1  ;;  %v1577_v59 = vmax.f32 %v1449_v48, 0.0  ;;  %v1278_v47 = vpop.xlane.xlu1 %1277 }
 0x146   : > { %v5157_v37 = vsel %vm1982_vm5, %v2555_v10, %v2551_v13  ;;  %v1480_v30 = vadd.f32 %v4268_v42, %v1278_v47  ;;  %v1274_v34 = vpop.xlane.xlu0 %1273  ;;  %vm2615_vm4 = vcmask 1045509   ;;  %vm2617_vm5 = vcmask 1046534  }
 0x147   : > { %v2185_v53 = vrot.slane %v1857_v15, %v5064_v0  ;;  %v2190_v62 = vrot.slane %v1858_v45, %v5067_v41  ;;  %v1669_v24 = vpack.c.bf16 %v1578_v20, %v1577_v59  ;;  %v1479_v60 = vadd.f32 %v4268_v42, %v1274_v34 }
 0x148   : > { %v1608_v51 = vmax.f32 %v1480_v30, 0.0 }
 0x149   : > { %v2186_v8 = vsel %vm2017_vm10, %v2185_v53, %v5038_v5  ;;  %v1887_v28 = vunpack.c.l.b16 %v1669_v24  ;;  %v1888_v7 = vunpack.c.h.b16 %v1669_v24  ;;  %v1607_v56 = vmax.f32 %v1479_v60, 0.0  ;;  %v918_v39 = vpop.xlane.xlu1 %917 }
 0x14a   : > { %v5166_v50 = vsel %vm2024_vm11, %v2190_v62, %v2186_v8  ;;  %v1390_v49 = vadd.f32 %v4268_v42, %v918_v39  ;;  %v914_v19 = vpop.xlane.xlu0 %913 }
 0x14b   : > { %v2333_v22 = vrot.slane %v1887_v28, %v4825_v26  ;;  %v2338_v6 = vrot.slane %v1888_v7, %v4832_v40  ;;  %v1684_v52 = vpack.c.bf16 %v1608_v51, %v1607_v56  ;;  %v1389_v5 = vadd.f32 %v4268_v42, %v914_v19 }
 0x14c   : > { %v1518_v14 = vmax.f32 %v1390_v49, 0.0 }
 0x14d   : > { %v2334_v31 = vsel %vm2003_vm8, %v2333_v22, %v5061_v23  ;;  %v1917_v33 = vunpack.c.l.b16 %v1684_v52  ;;  %v1918_v35 = vunpack.c.h.b16 %v1684_v52  ;;  %v1517_v16 = vmax.f32 %v1389_v5, 0.0  ;;  %v982_v57 = vpop.xlane.xlu1 %981 }
 0x14e   : > { %v5177_v21 = vsel %vm2010_vm9, %v2338_v6, %v2334_v31  ;;  %v1406_v54 = vadd.f32 %v4268_v42, %v982_v57  ;;  %v978_v55 = vpop.xlane.xlu0 %977 }
 0x14f   : > { %v2481_v38 = vrot.slane %v1917_v33, %v4513_v44  ;;  %v2486_v23 = vrot.slane %v1918_v35, %v4542_v12  ;;  %v1639_v63 = vpack.c.bf16 %v1518_v14, %v1517_v16  ;;  %v1405_v27 = vadd.f32 %v4268_v42, %v978_v55 }
 0x150   : > { %v1534_v46 = vmax.f32 %v1406_v54, 0.0 }
 0x151   : > { %v2482_v61 = vsel %vm1989_vm6, %v2481_v38, %v5088_v58  ;;  %v1827_v10 = vunpack.c.l.b16 %v1639_v63  ;;  %v1828_v1 = vunpack.c.h.b16 %v1639_v63  ;;  %v1533_v48 = vmax.f32 %v1405_v27, 0.0  ;;  %v1102_v20 = vpop.xlane.xlu1 %1101 }
 0x152   : > { %v5192_v13 = vsel %vm1996_vm7, %v2486_v23, %v2482_v61  ;;  %v1436_v15 = vadd.f32 %v4268_v42, %v1102_v20  ;;  %v1098_v45 = vpop.xlane.xlu0 %1097 }
 0x153   : > { %v2030_v59 = vrot.slane %v1827_v10, %v5180_v9  ;;  %v2037_v47 = vrot.slane %v1828_v1, %v5183_v43  ;;  %v1647_v30 = vpack.c.bf16 %v1534_v46, %v1533_v48  ;;  %v1435_v34 = vadd.f32 %v4268_v42, %v1098_v45 }
 0x154   : > { %v1564_v58 = vmax.f32 %v1436_v15, 0.0 }
 0x155   : > { %v2032_v53 = vsel %vm2031_vm12, %v2030_v59, %v5112_v11  ;;  %v1843_v62 = vunpack.c.l.b16 %v1647_v30  ;;  %v1844_v24 = vunpack.c.h.b16 %v1647_v30  ;;  %v1563_v60 = vmax.f32 %v1435_v34, 0.0  ;;  %v1222_v51 = vpop.xlane.xlu1 %1221 }
 0x156   : > { %v5201_v8 = vsel %vm2038_vm13, %v2037_v47, %v2032_v53  ;;  %v1466_v28 = vadd.f32 %v4268_v42, %v1222_v51  ;;  %v1218_v7 = vpop.xlane.xlu0 %1217 }
 0x157   : > { %v2116_v56 = vrot.slane %v1843_v62, %v5180_v9  ;;  %v2121_v39 = vrot.slane %v1844_v24, %v5183_v43  ;;  %v1662_v49 = vpack.c.bf16 %v1564_v58, %v1563_v60  ;;  %v1465_v17 = vadd.f32 %v4268_v42, %v1218_v7 }
 0x158   : > { %v1594_v32 = vmax.f32 %v1466_v28, 0.0 }
 0x159   : > { %v2117_v11 = vsel %vm2031_vm12, %v2116_v56, %v5124_v18  ;;  %v1873_v19 = vunpack.c.l.b16 %v1662_v49  ;;  %v1874_v22 = vunpack.c.h.b16 %v1662_v49  ;;  %v1593_v6 = vmax.f32 %v1465_v17, 0.0  ;;  %v1342_v52 = vpop.xlane.xlu1 %1341 }
 0x15a   : > { %v5210_v5 = vsel %vm2038_vm13, %v2121_v39, %v2117_v11  ;;  %v1496_v14 = vadd.f32 %v4268_v42, %v1342_v52  ;;  %v1338_v31 = vpop.xlane.xlu0 %1337 }
 0x15b   : > { %v2264_v33 = vrot.slane %v1873_v19, %v5064_v0  ;;  %v2269_v35 = vrot.slane %v1874_v22, %v5067_v41  ;;  %v1677_v16 = vpack.c.bf16 %v1594_v32, %v1593_v6  ;;  %v1495_v57 = vadd.f32 %v4268_v42, %v1338_v31 }
 0x15c   : > { %v1624_v54 = vmax.f32 %v1496_v14, 0.0 }
 0x15d   : > { %v2265_v18 = vsel %vm2017_vm10, %v2264_v33, %v5139_v25  ;;  %v1903_v55 = vunpack.c.l.b16 %v1677_v16  ;;  %v1904_v38 = vunpack.c.h.b16 %v1677_v16  ;;  %v1623_v23 = vmax.f32 %v1495_v57, 0.0  ;;  %v1046_v63 = vpop.xlane.xlu1 %1045 }
 0x15e   : > { %v5219_v27 = vsel %vm2024_vm11, %v2269_v35, %v2265_v18  ;;  %v1422_v46 = vadd.f32 %v4268_v42, %v1046_v63  ;;  %v1042_v61 = vpop.xlane.xlu0 %1041  ;;  %v2040_v16 = vadd.s32 4294967184, %v4248_v29 }
 0x15f   : > { %v2412_v10 = vrot.slane %v1903_v55, %v4825_v26  ;;  %v2417_v1 = vrot.slane %v1904_v38, %v4832_v40  ;;  %v1692_v48 = vpack.c.bf16 %v1624_v54, %v1623_v23  ;;  %v1421_v20 = vadd.f32 %v4268_v42, %v1042_v61 }
 0x160   : > { %v1550_v15 = vmax.f32 %v1422_v46, 0.0  ;;  %v2047_v23 = vadd.s32 4294967176, %v4248_v29  ;;  %v5263_v61 = vsub.s32 %v2040_v16, %v3860_v2 }
 0x161   : > { %v2413_v25 = vsel %vm2003_vm8, %v2412_v10, %v5148_v36  ;;  %v1933_v45 = vunpack.c.l.b16 %v1692_v48  ;;  %v1934_v59 = vunpack.c.h.b16 %v1692_v48  ;;  %v1549_v47 = vmax.f32 %v1421_v20, 0.0  ;;  %v1166_v30 = vpop.xlane.xlu1 %1165 }
 0x162   : > { %v5228_v34 = vsel %vm2010_vm9, %v2417_v1, %v2413_v25  ;;  %v1452_v58 = vadd.f32 %v4268_v42, %v1166_v30  ;;  %v1162_v53 = vpop.xlane.xlu0 %1161  ;;  %v5267_v25 = vsub.s32 %v2047_v23, %v3860_v2 }
 0x163   : > { %v2560_v62 = vrot.slane %v1933_v45, %v4513_v44  ;;  %v2565_v24 = vrot.slane %v1934_v59, %v4542_v12  ;;  %v1655_v60 = vpack.c.bf16 %v1550_v15, %v1549_v47  ;;  %v1451_v51 = vadd.f32 %v4268_v42, %v1162_v53 }
 0x164   : > { %v1580_v28 = vmax.f32 %v1452_v58, 0.0 }
 0x165   : > { %v2561_v36 = vsel %vm1989_vm6, %v2560_v62, %v5157_v37  ;;  %v1859_v7 = vunpack.c.l.b16 %v1655_v60  ;;  %v1860_v56 = vunpack.c.h.b16 %v1655_v60  ;;  %v1579_v39 = vmax.f32 %v1451_v51, 0.0  ;;  %v5236_v49 = vpop.xlane.xlu1 %1285 }
 0x166   : > { %v5239_v17 = vsel %vm1996_vm7, %v2565_v24, %v2561_v36  ;;  %v5241_v32 = vpop.xlane.xlu0 %1281  ;;  %v1482_v16 = vadd.f32 %v4268_v42, %v5236_v49  ;;  %vm2619_vm6 = vcmask 1047559   ;;  %vm3281_vm7 = vcmask 1041408  }
 0x167   : > { %v2195_v44 = vrot.slane %v1859_v7, %v5180_v9  ;;  %v2200_v12 = vrot.slane %v1860_v56, %v5183_v43  ;;  %v1670_v11 = vpack.c.bf16 %v1580_v28, %v1579_v39 }
 0x169   : > { %v2196_v19 = vsel %vm2031_vm12, %v2195_v44, %v5166_v50  ;;  %v1889_v22 = vunpack.c.l.b16 %v1670_v11  ;;  %v1890_v37 = vunpack.c.h.b16 %v1670_v11  ;;  %v926_v6 = vpop.xlane.xlu1 %925 }
 0x16a   : > { %v5248_v52 = vsel %vm2038_vm13, %v2200_v12, %v2196_v19  ;;  %v1392_v14 = vadd.f32 %v4268_v42, %v926_v6  ;;  %v922_v31 = vpop.xlane.xlu0 %921 }
 0x16b   : > { %v2343_v33 = vrot.slane %v1889_v22, %v5064_v0  ;;  %v2348_v35 = vrot.slane %v1890_v37, %v5067_v41  ;;  %v1391_v57 = vadd.f32 %v4268_v42, %v922_v31 }
 0x16c   : > { %v1520_v54 = vmax.f32 %v1392_v14, 0.0 }
 0x16d   : > { %v2344_v50 = vsel %vm2017_vm10, %v2343_v33, %v5177_v21  ;;  %v1519_v18 = vmax.f32 %v1391_v57, 0.0  ;;  %v990_v55 = vpop.xlane.xlu1 %989  ;;  %v1481_v57 = vadd.f32 %v4268_v42, %v5241_v32 }
 0x16e   : > { %v5258_v38 = vsel %vm2024_vm11, %v2348_v35, %v2344_v50  ;;  %v1408_v63 = vadd.f32 %v4268_v42, %v990_v55  ;;  %v986_v46 = vpop.xlane.xlu0 %985 }
 0x16f   : > { %v1640_v10 = vpack.c.bf16 %v1520_v54, %v1519_v18  ;;  %v1407_v1 = vadd.f32 %v4268_v42, %v986_v46 }
 0x170   : > { %v1536_v48 = vmax.f32 %v1408_v63, 0.0 }
 0x171   : > { %v1829_v20 = vunpack.c.l.b16 %v1640_v10  ;;  %v1535_v15 = vmax.f32 %v1407_v1, 0.0  ;;  %v1110_v21 = vpop.xlane.xlu1 %1109  ;;  %v1830_v45 = vunpack.c.h.b16 %v1640_v10  ;;  %v1610_v1 = vmax.f32 %v1482_v16, 0.0 }
 0x172   : > { %v1106_v59 = vpop.xlane.xlu0 %1105  ;;  %v1438_v11 = vadd.f32 %v4268_v42, %v1110_v21 }
 0x173   : > { %v2044_v29 = vrot.slane %v1829_v20, %v5263_v61  ;;  %v1648_v47 = vpack.c.bf16 %v1536_v48, %v1535_v15  ;;  %v2051_v62 = vrot.slane %v1830_v45, %v5267_v25  ;;  %v1437_v19 = vadd.f32 %v4268_v42, %v1106_v59 }
 0x174   : > { %v1566_v6 = vmax.f32 %v1438_v11, 0.0  ;;  %v1609_v48 = vmax.f32 %v1481_v57, 0.0 }
 0x175   : > { %v1845_v30 = vunpack.c.l.b16 %v1648_v47  ;;  %v1846_v58 = vunpack.c.h.b16 %v1648_v47  ;;  %v1230_v53 = vpop.xlane.xlu1 %1229  ;;  %v2046_v60 = vsel %vm2045_vm14, %v2044_v29, %v5201_v8  ;;  %v1565_v14 = vmax.f32 %v1437_v19, 0.0 }
 0x176   : > { %v1226_v24 = vpop.xlane.xlu0 %1225  ;;  %v2053_v56 = vsel %vm2052_vm15, %v2051_v62, %v2046_v60  ;;  %v1468_v55 = vadd.f32 %v4268_v42, %v1230_v53 }
 0x177   : > { %v2126_v51 = vrot.slane %v1845_v30, %v5263_v61  ;;  %v2131_v28 = vrot.slane %v1846_v58, %v5267_v25  ;;  %v1663_v50 = vpack.c.bf16 %v1566_v6, %v1565_v14  ;;  %v1467_v23 = vadd.f32 %v4268_v42, %v1226_v24 }
 0x178   : > { %v1596_v32 = vmax.f32 %v1468_v55, 0.0  ;;  %v1685_v58 = vpack.c.bf16 %v1610_v1, %v1609_v48 }
 0x179   : > { %v2127_v36 = vsel %vm2045_vm14, %v2126_v51, %v5210_v5  ;;  %v1350_v7 = vpop.xlane.xlu1 %1349  ;;  %v1875_v15 = vunpack.c.l.b16 %v1663_v50  ;;  %v1595_v45 = vmax.f32 %v1467_v23, 0.0  ;;  %v1876_v60 = vunpack.c.h.b16 %v1663_v50 }
 0x17a   : > { %v2132_v39 = vsel %vm2052_vm15, %v2131_v28, %v2127_v36  ;;  %v1346_v44 = vpop.xlane.xlu0 %1345  ;;  %v1919_v14 = vunpack.c.l.b16 %v1685_v58  ;;  %v1920_v55 = vunpack.c.h.b16 %v1685_v58 }
 0x17b   : > { %v2608_v12 = vsel %vm2607_vm0, %v2132_v39, %v2053_v56  ;;  %v2274_v51 = vrot.slane %v1875_v15, %v5180_v9  ;;  %v1678_v56 = vpack.c.bf16 %v1596_v32, %v1595_v45 }
 0x17d   : > { %v1054_v8 = vpop.xlane.xlu1 %1053  ;;  %v1906_v1 = vunpack.c.h.b16 %v1678_v56 }
 0x17e   : > { %v1424_v22 = vadd.f32 %v4268_v42, %v1054_v8  ;;  %v1050_v37 = vpop.xlane.xlu0 %1049 }
 0x17f   : > { %v1423_v31 = vadd.f32 %v4268_v42, %v1050_v37  ;;  %v1497_v37 = vadd.f32 %v4268_v42, %v1346_v44 }
 0x180   : > { %v1552_v5 = vmax.f32 %v1424_v22, 0.0 }
 0x181   : > { %v1551_v33 = vmax.f32 %v1423_v31, 0.0  ;;  %v1174_v35 = vpop.xlane.xlu1 %1173  ;;  %v2275_v31 = vsel %vm2031_vm12, %v2274_v51, %v5219_v27 }
 0x182   : > { %v1170_v54 = vpop.xlane.xlu0 %1169  ;;  %v1454_v59 = vadd.f32 %v4268_v42, %v1174_v35 }
 0x183   : > { %v1656_v18 = vpack.c.bf16 %v1552_v5, %v1551_v33  ;;  %v1453_v29 = vadd.f32 %v4268_v42, %v1170_v54  ;;  %v2279_v5 = vrot.slane %v1876_v60, %v5183_v43  ;;  %v1905_v33 = vunpack.c.l.b16 %v1678_v56 }
 0x184   : > { %v1582_v39 = vmax.f32 %v1454_v59, 0.0 }
 0x185   : > { %v1861_v63 = vunpack.c.l.b16 %v1656_v18  ;;  %v1862_v46 = vunpack.c.h.b16 %v1656_v18  ;;  %v1294_v10 = vpop.xlane.xlu1 %1293  ;;  %v1581_v11 = vmax.f32 %v1453_v29, 0.0  ;;  %v2422_v32 = vrot.slane %v1905_v33, %v5064_v0 }
 0x186   : > { %v1290_v20 = vpop.xlane.xlu0 %1289  ;;  %v1484_v16 = vadd.f32 %v4268_v42, %v1294_v10 }
 0x187   : > { %v2205_v49 = vrot.slane %v1861_v63, %v5263_v61  ;;  %v2210_v21 = vrot.slane %v1862_v46, %v5267_v25  ;;  %v1671_v35 = vpack.c.bf16 %v1582_v39, %v1581_v11  ;;  %v1483_v57 = vadd.f32 %v4268_v42, %v1290_v20 }
 0x188   : > { %v1625_v63 = vmax.f32 %v1497_v37, 0.0  ;;  %v2491_v46 = vrot.slane %v1919_v14, %v4825_v26  ;;  %v2280_v20 = vsel %vm2038_vm13, %v2279_v5, %v2275_v31  ;;  %v2496_v39 = vrot.slane %v1920_v55, %v4832_v40 }
 0x189   : > { %v2206_v47 = vsel %vm2045_vm14, %v2205_v49, %v5248_v52  ;;  %v1118_v30 = vpop.xlane.xlu1 %1117  ;;  %v1498_v52 = vadd.f32 %v4268_v42, %v1350_v7  ;;  %v1891_v15 = vunpack.c.l.b16 %v1671_v35  ;;  %v1612_v49 = vmax.f32 %v1484_v16, 0.0 }
 0x18a   : > { %v2211_v53 = vsel %vm2052_vm15, %v2210_v21, %v2206_v47  ;;  %v1440_v62 = vadd.f32 %v4268_v42, %v1118_v30  ;;  %v1114_v24 = vpop.xlane.xlu0 %1113  ;;  %v1611_v21 = vmax.f32 %v1483_v57, 0.0  ;;  %v1892_v58 = vunpack.c.h.b16 %v1671_v35 }
 0x18b   : > { %v2610_v28 = vsel %vm2609_vm1, %v2211_v53, %v2608_v12  ;;  %v1439_v36 = vadd.f32 %v4268_v42, %v1114_v24  ;;  %v1626_v23 = vmax.f32 %v1498_v52, 0.0  ;;  %v2353_v11 = vrot.slane %v1891_v15, %v5180_v9 }
 0x18c   : > { %v1568_v19 = vmax.f32 %v1440_v62, 0.0  ;;  %v2427_v52 = vrot.slane %v1906_v1, %v5067_v41  ;;  %v2423_v31 = vsel %vm2017_vm10, %v2422_v32, %v5228_v34 }
 0x18d   : > { %v1567_v8 = vmax.f32 %v1439_v36, 0.0  ;;  %v1238_v22 = vpop.xlane.xlu1 %1237  ;;  %v1693_v30 = vpack.c.bf16 %v1626_v23, %v1625_v63 }
 0x18e   : > { %v1234_v6 = vpop.xlane.xlu0 %1233  ;;  %v1470_v7 = vadd.f32 %v4268_v42, %v1238_v22  ;;  %v2492_v22 = vsel %vm2003_vm8, %v2491_v46, %v5192_v13 }
 0x18f   : > { %v1664_v12 = vpack.c.bf16 %v1568_v19, %v1567_v8  ;;  %v1469_v44 = vadd.f32 %v4268_v42, %v1234_v6  ;;  %v1686_v19 = vpack.c.bf16 %v1612_v49, %v1611_v21  ;;  %v1935_v5 = vunpack.c.l.b16 %v1693_v30 }
 0x190   : > { %v1598_v59 = vmax.f32 %v1470_v7, 0.0  ;;  %v2497_v13 = vsel %vm2010_vm9, %v2496_v39, %v2492_v22  ;;  %v1936_v46 = vunpack.c.h.b16 %v1693_v30 }
 0x191   : > { %v1877_v54 = vunpack.c.l.b16 %v1664_v12  ;;  %v1878_v50 = vunpack.c.h.b16 %v1664_v12  ;;  %v1358_v18 = vpop.xlane.xlu1 %1357  ;;  %v1597_v29 = vmax.f32 %v1469_v44, 0.0  ;;  %v1921_v7 = vunpack.c.l.b16 %v1686_v19 }
 0x192   : > { %v1354_v27 = vpop.xlane.xlu0 %1353  ;;  %v1500_v60 = vadd.f32 %v4268_v42, %v1358_v18  ;;  %v2570_v1 = vrot.slane %v1935_v5, %v4825_v26  ;;  %v1922_v21 = vunpack.c.h.b16 %v1686_v19 }
 0x193   : > { %v2284_v48 = vrot.slane %v1877_v54, %v5263_v61  ;;  %v2289_v10 = vrot.slane %v1878_v50, %v5267_v25  ;;  %v1499_v51 = vadd.f32 %v4268_v42, %v1354_v27  ;;  %v1679_v37 = vpack.c.bf16 %v1598_v59, %v1597_v29 }
 0x194   : > { %v1628_v35 = vmax.f32 %v1500_v60, 0.0  ;;  %v2354_v50 = vsel %vm2031_vm12, %v2353_v11, %v5258_v38  ;;  %v2428_v27 = vsel %vm2024_vm11, %v2427_v52, %v2423_v31  ;;  %v2501_v29 = vrot.slane %v1921_v7, %v5064_v0 }
 0x195   : > { %v2285_v45 = vsel %vm2045_vm14, %v2284_v48, %v2280_v20  ;;  %v1182_v47 = vpop.xlane.xlu1 %1181  ;;  %v1627_v16 = vmax.f32 %v1499_v51, 0.0  ;;  %v1907_v18 = vunpack.c.l.b16 %v1679_v37 }
 0x196   : > { %v2290_v53 = vsel %vm2052_vm15, %v2289_v10, %v2285_v45  ;;  %v1456_v62 = vadd.f32 %v4268_v42, %v1182_v47  ;;  %v1178_v24 = vpop.xlane.xlu0 %1177  ;;  %v1908_v47 = vunpack.c.h.b16 %v1679_v37  ;;  %v2502_v37 = vsel %vm2017_vm10, %v2501_v29, %v2497_v13 }
 0x197   : > { %v1455_v36 = vadd.f32 %v4268_v42, %v1178_v24  ;;  %v2612_v56 = vsel %vm2611_vm2, %v2290_v53, %v2610_v28  ;;  %v2358_v28 = vrot.slane %v1892_v58, %v5183_v43  ;;  %v1694_v15 = vpack.c.bf16 %v1628_v35, %v1627_v16 }
 0x198   : > { %v1584_v8 = vmax.f32 %v1456_v62, 0.0  ;;  %v2432_v26 = vrot.slane %v1907_v18, %v5180_v9  ;;  %v2575_v53 = vrot.slane %v1936_v46, %v4832_v40 }
 0x199   : > { %v1583_v6 = vmax.f32 %v1455_v36, 0.0  ;;  %v1302_v14 = vpop.xlane.xlu1 %1301  ;;  %v2359_v20 = vsel %vm2038_vm13, %v2358_v28, %v2354_v50  ;;  %v2571_v36 = vsel %vm2003_vm8, %v2570_v1, %v5239_v17  ;;  %v1937_v39 = vunpack.c.l.b16 %v1694_v15 }
 0x19a   : > { %v1486_v12 = vadd.f32 %v4268_v42, %v1302_v14  ;;  %v1298_v33 = vpop.xlane.xlu0 %1297  ;;  %v2437_v14 = vrot.slane %v1908_v47, %v5183_v43  ;;  %v1938_v17 = vunpack.c.h.b16 %v1694_v15  ;;  %v2576_v18 = vsel %vm2010_vm9, %v2575_v53, %v2571_v36 }
 0x19b   : > { %v1672_v57 = vpack.c.bf16 %v1584_v8, %v1583_v6  ;;  %v1485_v54 = vadd.f32 %v4268_v42, %v1298_v33  ;;  %v2506_v8 = vrot.slane %v1922_v21, %v5067_v41  ;;  %v2433_v6 = vsel %vm2031_vm12, %v2432_v26, %v2428_v27 }
 0x19c   : > { %v1614_v44 = vmax.f32 %v1486_v12, 0.0  ;;  %v2580_v35 = vrot.slane %v1937_v39, %v5064_v0  ;;  %v2585_v27 = vrot.slane %v1938_v17, %v5067_v41  ;;  %v3655_v17 = vld [vmem:[%s5564_s5 + $0x50] sm:$0xff]   ;;  %vm3752_vm8 = vmmov 0  }
 0x19d   : > { %v1893_v34 = vunpack.c.l.b16 %v1672_v57  ;;  %v1894_v55 = vunpack.c.h.b16 %v1672_v57  ;;  %v1613_v23 = vmax.f32 %v1485_v54, 0.0  ;;  %v1246_v63 = vpop.xlane.xlu1 %1245  ;;  %v2507_v0 = vsel %vm2024_vm11, %v2506_v8, %v2502_v37  ;;  %v3649_v37 = vld [vmem:[%s5564_s5] sm:$0xff]  }
 0x19e   : > { %v1472_v48 = vadd.f32 %v4268_v42, %v1246_v63  ;;  %v1242_v10 = vpop.xlane.xlu0 %1241  ;;  %vm3277_vm9 = vcmask 818176  }
 0x19f   : > { %v2363_v38 = vrot.slane %v1893_v34, %v5263_v61  ;;  %v2368_v49 = vrot.slane %v1894_v55, %v5267_v25  ;;  %v1687_v32 = vpack.c.bf16 %v1614_v44, %v1613_v23  ;;  %v1471_v59 = vadd.f32 %v4268_v42, %v1242_v10 }
 0x1a0   : > { %v1600_v45 = vmax.f32 %v1472_v48, 0.0  ;;  %v2438_v34 = vsel %vm2038_vm13, %v2437_v14, %v2433_v6  ;;  %v2581_v10 = vsel %vm2017_vm10, %v2580_v35, %v2576_v18  ;;  %v3650_v6 = vld [vmem:[%s5564_s5 + $0x80] sm:$0xff]   ;;  %v3652_v14 = vld [vmem:[%s5564_s5 + $0xc8] sm:$0xff]   ;;  %v3660_v35 = vld [vmem:[%s5564_s5 + $0xd8] sm:$0xff]   ;;  %vm3325_vm10 = vcmask 80896  }
 0x1a1   : > { %v2364_v30 = vsel %vm2045_vm14, %v2363_v38, %v2359_v20  ;;  %v1366_v58 = vpop.xlane.xlu1 %1365  ;;  %v1599_v24 = vmax.f32 %v1471_v59, 0.0  ;;  %v1923_v22 = vunpack.c.l.b16 %v1687_v32  ;;  %v1924_v16 = vunpack.c.h.b16 %v1687_v32  ;;  %v3668_v18 = vld [vmem:[%s5564_s5 + $0xe8] sm:$0xff]  }
 0x1a2   : > { %v2369_v62 = vsel %vm2052_vm15, %v2368_v49, %v2364_v30  ;;  %v1502_v60 = vadd.f32 %v4268_v42, %v1366_v58  ;;  %v1362_v51 = vpop.xlane.xlu0 %1361 }
 0x1a3   : > { %v1501_v11 = vadd.f32 %v4268_v42, %v1362_v51  ;;  %v2614_v19 = vsel %vm2613_vm3, %v2369_v62, %v2612_v56  ;;  %v1680_v52 = vpack.c.bf16 %v1600_v45, %v1599_v24  ;;  %v2511_v13 = vrot.slane %v1923_v22, %v5180_v9 }
 0x1a4   : > { %v1630_v40 = vmax.f32 %v1502_v60, 0.0  ;;  %v2516_v20 = vrot.slane %v1924_v16, %v5183_v43  ;;  %v3661_v16 = vld [vmem:[%s5564_s5 + $0x18] sm:$0xff]  }
 0x1a5   : > { %v1629_v31 = vmax.f32 %v1501_v11, 0.0  ;;  %v1310_v5 = vpop.xlane.xlu1 %1309  ;;  %v1909_v28 = vunpack.c.l.b16 %v1680_v52  ;;  %v1910_v12 = vunpack.c.h.b16 %v1680_v52  ;;  %v2512_v49 = vsel %vm2031_vm12, %v2511_v13, %v2507_v0  ;;  %v3664_v13 = vld [vmem:[%s5564_s5 + $0xe0] sm:$0xff]   ;;  %v3673_v0 = vld [vmem:[%s5564_s5 + $0x30] sm:$0xff]  }
 0x1a6   : > { %v1488_v33 = vadd.f32 %v4268_v42, %v1310_v5  ;;  %v1306_v56 = vpop.xlane.xlu0 %1305  ;;  %v2517_v62 = vsel %vm2038_vm13, %v2516_v20, %v2512_v49  ;;  %v3654_v5 = vld [vmem:[%s5564_s5 + $0x88] sm:$0xff]   ;;  %v3751_v20 = vmov 0.0   ;;  %v1745_v49 = vsub.s32 3, %v3860_v2 }
 0x1a7   : > { %v1695_v57 = vpack.c.bf16 %v1630_v40, %v1629_v31  ;;  %v1487_v54 = vadd.f32 %v4268_v42, %v1306_v56  ;;  %v2442_v50 = vrot.slane %v1909_v28, %v5263_v61  ;;  %v2447_v7 = vrot.slane %v1910_v12, %v5267_v25  ;;  %v3653_v31 = vld [vmem:[%s5564_s5 + $0x8] sm:$0xff]   ;;  %v3656_v28 = vld [vmem:[%s5564_s5 + $0xd0] sm:$0xff]   ;;  %v3659_v56 = vld [vmem:[%s5564_s5 + $0x58] sm:$0xff]  }
 0x1a8   : > { %v1616_v44 = vmax.f32 %v1488_v33, 0.0  ;;  %v3657_v12 = vld [vmem:[%s5564_s5 + $0x10] sm:$0xff]  }
 0x1a9   : > { %v1939_v55 = vunpack.c.l.b16 %v1695_v57  ;;  %v1615_v23 = vmax.f32 %v1487_v54, 0.0  ;;  %v1374_v63 = vpop.xlane.xlu1 %1373  ;;  %v2443_v46 = vsel %vm2045_vm14, %v2442_v50, %v2438_v34  ;;  %v1940_v21 = vunpack.c.h.b16 %v1695_v57  ;;  %v3658_v33 = vld [vmem:[%s5564_s5 + $0x90] sm:$0xff]   ;;  %v3662_v57 = vld [vmem:[%s5564_s5 + $0x98] sm:$0xff]   ;;  %v3663_v54 = vld [vmem:[%s5564_s5 + $0x60] sm:$0xff]  }
 0x1aa   : > { %v1504_v1 = vadd.f32 %v4268_v42, %v1374_v63  ;;  %v1370_v48 = vpop.xlane.xlu0 %1369  ;;  %v2448_v45 = vsel %vm2052_vm15, %v2447_v7, %v2443_v46  ;;  %v3665_v50 = vld [vmem:[%s5564_s5 + $0x20] sm:$0xff]   ;;  %v3669_v34 = vld [vmem:[%s5564_s5 + $0x28] sm:$0xff]   ;;  %v3672_v63 = vld [vmem:[%s5564_s5 + $0xf0] sm:$0xff]  }
 0x1ab   : > { %v1688_v15 = vpack.c.bf16 %v1616_v44, %v1615_v23  ;;  %v1503_v38 = vadd.f32 %v4268_v42, %v1370_v48  ;;  %v2590_v41 = vrot.slane %v1939_v55, %v5180_v9  ;;  %v2616_v26 = vsel %vm2615_vm4, %v2448_v45, %v2614_v19  ;;  %v3666_v7 = vld [vmem:[%s5564_s5 + $0xa0] sm:$0xff]   ;;  %v3667_v44 = vld [vmem:[%s5564_s5 + $0x68] sm:$0xff]   ;;  %v3671_v23 = vld [vmem:[%s5564_s5 + $0x70] sm:$0xff]  }
 0x1ac   : > { %v1632_v32 = vmax.f32 %v1504_v1, 0.0  ;;  %v2586_v42 = vsel %vm2024_vm11, %v2585_v27, %v2581_v10  ;;  %v2595_v24 = vrot.slane %v1940_v21, %v5183_v43  ;;  %v3670_v55 = vld [vmem:[%s5564_s5 + $0xa8] sm:$0xff]   ;;  %v3674_v27 = vld [vmem:[%s5564_s5 + $0xb0] sm:$0xff]   ;;  %v3675_v46 = vld [vmem:[%s5564_s5 + $0x78] sm:$0xff]  }
 0x1ad   : > { %v1925_v59 = vunpack.c.l.b16 %v1688_v15  ;;  %v1926_v29 = vunpack.c.h.b16 %v1688_v15  ;;  %v1631_v47 = vmax.f32 %v1503_v38, 0.0  ;;  %v2591_v60 = vsel %vm2031_vm12, %v2590_v41, %v2586_v42  ;;  %v3676_v1 = vld [vmem:[%s5564_s5 + $0xf8] sm:$0xff]   ;;  %v1729_v38 = vld [vmem:[%s5563_s4] sm:$0xf] }
 0x1ae   : > { %v2596_v22 = vsel %vm2038_vm13, %v2595_v24, %v2591_v60  ;;  %v3677_v48 = vld [vmem:[%s5564_s5 + $0x38] sm:$0xff]   ;;  %v1741_v15 = vsub.s32 2, %v3860_v2  ;;  %v1734_v21 = vrot.slane %v1729_v38, %v598_v3  ;;  %v1738_v45 = vrot.slane %v1729_v38, %v602_v4  ;;  %v3679_v4 = vld [vmem:[%s5566_s7] sm:$0xff]  }
 0x1af   : > { %v2521_v30 = vrot.slane %v1925_v59, %v5263_v61  ;;  %v2526_v58 = vrot.slane %v1926_v29, %v5267_v25  ;;  %v1696_v53 = vpack.c.bf16 %v1632_v32, %v1631_v47  ;;  %v3678_v10 = vld [vmem:[%s5564_s5 + $0xb8] sm:$0xff]   ;;  %v1746_v41 = vrot.slane %v1729_v38, %v1745_v49 }
 0x1b0   : > { %v1742_v32 = vrot.slane %v1729_v38, %v1741_v15 }
 0x1b1   : > { %v1941_v9 = vunpack.c.l.b16 %v1696_v53  ;;  %v1942_v51 = vunpack.c.h.b16 %v1696_v53  ;;  %v2522_v36 = vsel %vm2045_vm14, %v2521_v30, %v2517_v62 }
 0x1b2   : > { %v2527_v39 = vsel %vm2052_vm15, %v2526_v58, %v2522_v36 }
 0x1b3   : > { %v2600_v11 = vrot.slane %v1941_v9, %v5263_v61  ;;  %v2605_v19 = vrot.slane %v1942_v51, %v5267_v25  ;;  %v2618_v8 = vsel %vm2617_vm5, %v2527_v39, %v2616_v26  ;;  %v3651_v25 = vld [vmem:[%s5564_s5 + $0x48] sm:$0xff]  }
 0x1b5   : > { %v2601_v52 = vsel %vm2045_vm14, %v2600_v11, %v2596_v22  ;;  %v3680_v22 = vld [vmem:[%s5566_s7 + $0x8] sm:$0xff]  }
 0x1b6   : > { %v2606_v43 = vsel %vm2052_vm15, %v2605_v19, %v2601_v52  ;;  %v3681_v52 = vld [vmem:[%s5566_s7 + $0x10] sm:$0xff]  }
 0x1b7   : > { %v2620_v40 = vsel %vm2619_vm6, %v2606_v43, %v2618_v8  ;;  %v3682_v43 = vld [vmem:[%s5566_s7 + $0x18] sm:$0xff]  }
 0x1b8   : > { %v2621_v61 = vpack.c.b16 %v2620_v40, %v2620_v40  ;;  %v3683_v40 = vld [vmem:[%s5566_s7 + $0x20] sm:$0xff]  }
 0x1ba   : > { %2816 = vmatmul.mubr.bf16.vlgmr.msra.gmra.mrb[0].mxu0 %v2621_v61  ;;  %2857 = vmatmul.mubr.bf16.vlgmr.msra.gmra.mrb[0].mxu1 %v2621_v61 }
 0x1bb   : > { %3488 = vmatpush3.bf16.msra.mxu0 %v3649_v37  ;;  %3510 = vmatpush3.bf16.msra.mxu1 %v3650_v6  ;;  %v3684_v37 = vld [vmem:[%s5566_s7 + $0x28] sm:$0xff]   ;;  %v3685_v6 = vld [vmem:[%s5566_s7 + $0x30] ss:$0 sps:$4 sm:$0x33]  }
 0x1bc   : > { %3489 = vmatprep.subr.bf16.mxu0 %v3651_v25  ;;  %3511 = vmatprep.subr.bf16.mxu1 %v3652_v14  ;;  %v3283_v61 = vsel %vm3281_vm7, %v3685_v6, 0 }
 0x1bf   : > { %3490 = vmatpush3.bf16.msra.mxu0 %v3653_v31  ;;  %3512 = vmatpush3.bf16.msra.mxu1 %v3654_v5  ;;  %v3440_v31 = vld [vmem:[%s5565_s6] ss:$0 sm:$0xff] }
 0x1c0   : > { %3491 = vmatprep.subr.bf16.mxu0 %v3655_v17  ;;  %3513 = vmatprep.subr.bf16.mxu1 %v3656_v28 }
 0x1c3   : > { %3492 = vmatpush3.bf16.msra.mxu0 %v3657_v12  ;;  %3514 = vmatpush3.bf16.msra.mxu1 %v3658_v33 }
 0x1c4   : > { %3493 = vmatprep.subr.bf16.mxu0 %v3659_v56  ;;  %3515 = vmatprep.subr.bf16.mxu1 %v3660_v35 }
 0x1c7   : > { %3494 = vmatpush3.bf16.msra.mxu0 %v3661_v16  ;;  %3516 = vmatpush3.bf16.msra.mxu1 %v3662_v57 }
 0x1c8   : > { %3495 = vmatprep.subr.bf16.mxu0 %v3663_v54  ;;  %3517 = vmatprep.subr.bf16.mxu1 %v3664_v13 }
 0x1cb   : > { %3496 = vmatpush3.bf16.msra.mxu0 %v3665_v50  ;;  %3518 = vmatpush3.bf16.msra.mxu1 %v3666_v7  ;;  %v3473_v7 = vld [vmem:[%s5567_s8] ss:$0 sm:$0xff] }
 0x1cc   : > { %3497 = vmatprep.subr.bf16.mxu0 %v3667_v44  ;;  %3519 = vmatprep.subr.bf16.mxu1 %v3668_v18 }
 0x1cf   : > { %3498 = vmatpush3.bf16.msra.mxu0 %v3669_v34  ;;  %3520 = vmatpush3.bf16.msra.mxu1 %v3670_v55 }
 0x1d0   : > { %3499 = vmatprep.subr.bf16.mxu0 %v3671_v23  ;;  %3521 = vmatprep.subr.bf16.mxu1 %v3672_v63 }
 0x1d3   : > { %3500 = vmatpush3.bf16.msra.mxu0 %v3673_v0  ;;  %3522 = vmatpush3.bf16.msra.mxu1 %v3674_v27 }
 0x1d4   : > { %3501 = vmatprep.subr.bf16.mxu0 %v3675_v46  ;;  %3523 = vmatprep.subr.bf16.mxu1 %v3676_v1 }
 0x1d7   : > { %3502 = vmatpush3.bf16.msra.mxu0 %v3677_v48  ;;  %3524 = vmatpush3.bf16.msra.mxu1 %v3678_v10 }
 0x1d8   : > { %3539 = vmatprep.subr.bf16.mxu0 %v3751_v20 }
 0x28d   : > { %v2817_v59 = vpop.f32.mrb[0].mxu0  ;;  %v2858_v29 = vpop.f32.mrb[0].mxu1 }
 0x28e   : > { %v2818_v47 = vadd.f32 %v2817_v59, %v1734_v21  ;;  %v2859_v26 = vadd.f32 %v2858_v29, %v1742_v32  ;;  %v2819_v30 = vpop.f32.mrb[1].mxu0  ;;  %v2860_v58 = vpop.f32.mrb[1].mxu1 }
 0x28f   : > { %v2820_v53 = vadd.f32 %v2819_v30, %v1738_v45  ;;  %v2861_v42 = vadd.f32 %v2860_v58, %v1746_v41  ;;  %v2821_v62 = vpop.f32.mrb[2].mxu0  ;;  %v2862_v24 = vpop.f32.mrb[2].mxu1 }
 0x290   : > { %v2865_v60 = vmax.f32 %v2818_v47, 0.0  ;;  %v2867_v9 = vmax.f32 %v2859_v26, 0.0  ;;  %v2822_v51 = vpop.f32.mrb[3].mxu0  ;;  %v2863_v36 = vpop.f32.mrb[3].mxu1 }
 0x291   : > { %v2866_v3 = vmax.f32 %v2820_v53, 0.0  ;;  %v2868_v39 = vmax.f32 %v2861_v42, 0.0 }
 0x292   : > { %v2869_v19 = vpack.c.bf16 %v2865_v60, %v2865_v60  ;;  %v2871_v8 = vpack.c.bf16 %v2867_v9, %v2867_v9 }
 0x293   : > { %v2870_v11 = vpack.c.bf16 %v2866_v3, %v2866_v3  ;;  %v2872_v2 = vpack.c.bf16 %v2868_v39, %v2868_v39 }
 0x295   : > { %3168 = vmatprep.mubr.bf16.mxu0 %v2870_v11  ;;  %3208 = vmatprep.mubr.bf16.mxu1 %v2872_v2 }
 0x296   : > { %3169 = vmatmul.mubr.bf16.vlgmr.msra.gmra.mrb[4].mxu0 %v2869_v19  ;;  %3209 = vmatmul.mubr.bf16.vlgmr.msra.gmra.mrb[4].mxu1 %v2871_v8 }
 0x297   : > { %3540 = vmatpush3.bf16.msra.mxu0 %v3679_v4  ;;  %3553 = vmatprep.mubr.msk.bf16.mxu0 %vm3752_vm8, %v3751_v20 }
 0x298   : > { %3541 = vmatprep.subr.bf16.mxu0 %v3751_v20 }
 0x29b   : > { %3542 = vmatpush3.bf16.msra.mxu0 %v3680_v22 }
 0x29c   : > { %3543 = vmatprep.subr.bf16.mxu0 %v3751_v20 }
 0x29f   : > { %3544 = vmatpush3.bf16.msra.mxu0 %v3681_v52 }
 0x2a0   : > { %3545 = vmatprep.subr.bf16.mxu0 %v3751_v20 }
 0x2a3   : > { %3546 = vmatpush3.bf16.msra.mxu0 %v3682_v43 }
 0x2a4   : > { %3547 = vmatprep.subr.bf16.mxu0 %v3751_v20 }
 0x2a7   : > { %3548 = vmatpush3.bf16.msra.mxu0 %v3683_v40 }
 0x2a8   : > { %3549 = vmatprep.subr.bf16.mxu0 %v3751_v20 }
 0x2ab   : > { %3550 = vmatpush3.bf16.msra.mxu0 %v3684_v37 }
 0x2ac   : > { %3551 = vmatprep.subr.bf16.mxu0 %v3751_v20 }
 0x2af   : > { %3552 = vmatpush3.bf16.msra.mxu0 %v3283_v61 }
 0x369   : > { %v3503_v25 = vpop.f32.mrb[4].mxu0  ;;  %v3525_v14 = vpop.f32.mrb[4].mxu1 }
 0x36a   : > { %v3504_v5 = vpop.f32.mrb[5].mxu0  ;;  %v3526_v17 = vpop.f32.mrb[5].mxu1 }
 0x36b   : > { %v3505_v28 = vadd.f32 %v3504_v5, %v3503_v25  ;;  %v3527_v12 = vadd.f32 %v3526_v17, %v3525_v14  ;;  %v3506_v33 = vpop.f32.mrb[6].mxu0  ;;  %v3528_v56 = vpop.f32.mrb[6].mxu1 }
 0x36c   : > { %v3507_v35 = vpop.f32.mrb[7].mxu0  ;;  %v3529_v16 = vpop.f32.mrb[7].mxu1 }
 0x36d   : > { %v3171_v57 = vadd.f32 %v3505_v28, %v3440_v31 }
 0x36f   : > { %v3211_v54 = vadd.f32 %v3527_v12, %v3171_v57 }
 0x371   : > { %v3216_v13 = vmax.f32 %v3211_v54, 0.0 }
 0x373   : > { %v3217_v50 = vpack.c.bf16 %v3216_v13, %v3216_v13 }
 0x375   : > { %3554 = vmatmul.mubr.msk.bf16.vlgmr.msra.gmra.mrb[8].mxu0 %vm3277_vm9, %v3217_v50 }
 0x448   : > { %v3319_v44 = vpop.f32.mrb[8].mxu0 }
 0x449   : > { %v3320_v18 = vadd.f32 %v3473_v7, %v3319_v44  ;;  %v3555_v34 = vpop.f32.mrb[9].mxu0 }
 0x44a   : > { %v3322_v55 = vpop.f32.mrb[10].mxu0 }
 0x44b   : > { %v3556_v23 = vpop.f32.mrb[11].mxu0  ;;  %3326 = vst.msk [vmem:[%s329_s25] sm:$0xff] %vm3325_vm10, %v3320_v18 }
 0x44c   : > { %3699 = shalt.err (!%p3696_p3)
}
 0x44d   : > { %s3700_s17 = scalar_lea.hbm %s5517_s29, 128  ;;  %s3704_s24 = scalar_lea.hbm %s5568_s9, 256 }
 0x44e   : > { %p3701_p4 = scmp.ne.s32.totalorder %s5517_s29, %s3700_s17  ;;  %p3705_p9 = scmp.lt.u32.totalorder %s5517_s29, %s5568_s9 }
 0x44f   : > { %p3706_p10 = scmp.lt.u32.totalorder %s3704_s24, %s3700_s17  ;;  %p3708_p12 = scmp.lt.u32.totalorder %s3700_s17, %s5517_s29 }
 0x450   : > { %p3702_p7 = pnand %p3701_p4, %p3845_p5 }
 0x451   : > { %p3707_p11 = por %p3706_p10, %p3705_p9 }
 0x452   : > { %p3703_p8 = pneg %p3702_p7 }
 0x453   : > { %p3709_p13 = por %p3708_p12, %p3707_p11 }
 0x455   : > { %p3710_p0 = pnand %p3709_p13, %p3703_p8 }
 0x457   : > { %3713 = shalt.err (!%p3710_p0)
}
 0x458   : > { %3557 = dma.vmem_to_hbm [thread:$0]  (%p3845_p5), %s5519_s26, 128, %s5517_s29, %s3328_s2  }
 0x459 PF: > { %p3563_p1 = scmp.ge.s32.totalorder %s3748_s14, 2  ;;  %s3353_s28 = sand.u32 1, %s3736_s11  }
 0x45a   : > { %s3354_s30 = scalar_lea.sflag [#allocation4], %s3353_s28 }
 0x45b   : > { %p3560_p2 = pnand %p3563_p1, %p3849_p6 }
 0x45d   : > { %3731 = dma.done.wait (!%p3560_p2), %s3354_s30, 128  }
 0x45e   : > { %3733 = vsyncadd (!%p3560_p2), %s3354_s30, 4294967168  ;;  %p20_p3 = scmp.ge.s32.totalorder %s3832_s16, 4   ;;  %s5571_s11 = smov %s3740_s12 }
 0x45f   : > { %s5572_s12 = smov %s3744_s13  ;;  %s5573_s13 = smov %s3843_s19 }
 0x460   : > { %s5574_s14 = smov %s3832_s16  ;;  %22 = sbr.rel (!%p20_p3) target bundleno = 5 (0x5), region = 91 }
 0x467   :  { %3359 = vsyncpa [#allocation4], 1 }
 0x468   :  { %3361 = vsyncpa [#allocation4 + $0x1], 1 }

</bundles_post_ra>
